<compile_context>
chip_gen: v7x
topology: tpu7x:2x2x1
jax: 0.10.0
libtpu: 0.0.40
codegen_flags: <defaults>
</compile_context>

<pallas_src>
import functools

import jax
import jax.numpy as jnp
from jax.experimental import pallas as pl
from jax.experimental.pallas import tpu as pltpu

_EPS = 1e-5


def _round_up(x, m):
    return (x + m - 1) // m * m


def _residual_kernel(use_conv3, *refs):
    """Fused residual block. All operands live in VMEM (single grid point at these shapes)."""
    if use_conv3:
        (p1_ref, xf_ref, w1_ref, w2_ref, w3_ref,
         g1_ref, be1_ref, g2_ref, be2_ref, b3_ref,
         out_ref, y1pad_ref) = refs
    else:
        (p1_ref, xf_ref, w1_ref, w2_ref,
         g1_ref, be1_ref, g2_ref, be2_ref,
         out_ref, y1pad_ref) = refs
        w3_ref = b3_ref = None

    N, Hp, Wp, C = y1pad_ref.shape          # C = lane-padded channel width (multiple of 128)
    H, W = Hp - 2, Wp - 2
    M = N * H * W
    inv_m = 1.0 / M

    # Hoisted ones operand for the MXU-based BN reductions (used by both BN stages).
    ones8 = jnp.ones((8, M), jnp.float32)

    def bn_affine(acc, g, be):
        # Sum and sum-of-squares from ONE MXU matmul, folded into per-channel scale + shift.
        both = jnp.concatenate([acc, acc * acc], axis=1)                        # (M, 2C), lane-aligned
        stats = jnp.dot(ones8, both, preferred_element_type=jnp.float32)[0:1]   # (1, 2C)
        mu = stats[:, :C] * inv_m
        var = stats[:, C:] * inv_m - mu * mu
        scale = jax.lax.rsqrt(var + _EPS) * g                                   # rsqrt -> EUP slot
        return scale, be - mu * scale

    # ---- conv1: single tile-aligned MXU dot on the pre-built im2col patch.
    #      (conv biases dropped: BN subtracts the batch mean, so they cancel exactly.)
    acc1 = jnp.dot(p1_ref[...], w1_ref[...], preferred_element_type=jnp.float32)  # (M, C) f32
    a1, c1 = bn_affine(acc1, g1_ref[...], be1_ref[...])
    y1 = jnp.maximum(acc1 * a1 + c1, 0.0)

    # ---- stage y1 with a zero halo: one unmasked full-buffer clear + one interior write.
    y1pad_ref[...] = jnp.zeros((N, Hp, Wp, C), jnp.float32)
    y1pad_ref[:, 1:H + 1, 1:W + 1, :] = y1.reshape(N, H, W, C)

    # ---- conv2: 3 kw sublane shifts (XLU, overlaps MXU); kh slices are tile-aligned & free;
    #      9 aligned (M,C)x(C,C) MXU dots accumulated in f32.
    acc2 = jnp.zeros((M, C), jnp.float32)
    for kw in range(3):
        band = y1pad_ref[:, :, kw:kw + W, :]                   # (N, Hp, W, C)
        for kh in range(3):
            patch = band[:, kh:kh + H].reshape(M, C)           # tile-aligned slice + free reshape
            acc2 = acc2 + jnp.dot(patch, w2_ref[kh * 3 + kw],
                                  preferred_element_type=jnp.float32)
    a2, c2 = bn_affine(acc2, g2_ref[...], be2_ref[...])

    # ---- shortcut: lane-dense flat input (no in-kernel strided gather).
    if use_conv3:
        sc = jnp.dot(xf_ref[...], w3_ref[...], preferred_element_type=jnp.float32)
        c2 = c2 + b3_ref[...]                                  # fold 1x1-conv bias into the shift
    else:
        sc = xf_ref[...]                                       # Cin == Cout, guarded in wrapper

    out_ref[...] = jnp.maximum(acc2 * a2 + c2 + sc, 0.0)       # (M, C): unmasked 128-lane store


@functools.partial(jax.jit, static_argnames=("use1x1conv",))
def residual_forward(x_nchw, params, use1x1conv):
    """NCHW in / NCHW out, parameters in PyTorch layout (stride=1 path)."""
    x = jnp.transpose(x_nchw, (0, 2, 3, 1)).astype(jnp.float32)    # NHWC
    N, H, W, Cin = x.shape
    Cout = params["w1"].shape[0]
    if not use1x1conv and Cin != Cout:
        raise ValueError("identity shortcut requires in_channels == out_channels")

    M = N * H * W
    Cp = _round_up(Cout, 128)           # lane-padded output channels
    Cip = _round_up(Cin, 128)           # lane-padded input channels
    K1p = _round_up(9 * Cin, 128)       # lane-padded conv1 im2col depth

    # conv1 im2col in XLA (pure layout plumbing on the input), zero-padded to K1p lanes.
    xp = jnp.pad(x, ((0, 0), (1, 1), (1, 1), (0, 0)))
    taps = [xp[:, kh:kh + H, kw:kw + W, :] for kh in range(3) for kw in range(3)]
    patch1 = jnp.concatenate(taps, axis=-1).reshape(M, 9 * Cin)
    patch1 = jnp.pad(patch1, ((0, 0), (0, K1p - 9 * Cin)))

    # Lane-dense flat input for the shortcut path.
    x_flat = jnp.pad(x.reshape(M, Cin), ((0, 0), (0, Cip - Cin)))

    # PyTorch conv weights -> tile-aligned (zero-padded) matmul operands, tap-major order.
    w1 = jnp.transpose(params["w1"], (2, 3, 1, 0)).reshape(9 * Cin, Cout)
    w1p = jnp.pad(w1, ((0, K1p - 9 * Cin), (0, Cp - Cout)))
    w2 = jnp.transpose(params["w2"], (2, 3, 1, 0)).reshape(9, Cout, Cout)
    w2p = jnp.pad(w2, ((0, 0), (0, Cp - Cout), (0, Cp - Cout)))

    def vecp(v):
        return jnp.pad(v.reshape(1, Cout), ((0, 0), (0, Cp - Cout)))

    args = [patch1, x_flat, w1p, w2p]
    if use1x1conv:
        w3 = jnp.transpose(params["w3"].reshape(Cout, Cin), (1, 0))    # (Cin, Cout)
        args.append(jnp.pad(w3, ((0, Cip - Cin), (0, Cp - Cout))))
    args += [vecp(params["g1"]), vecp(params["be1"]),
             vecp(params["g2"]), vecp(params["be2"])]
    if use1x1conv:
        args.append(vecp(params["b3"]))

    # VMEM budget from actual buffer sizes (x2 headroom for transients), floored at 16 MiB --
    # half of v7x's 32 MiB scoped default.
    in_bytes = sum(int(a.size) * a.dtype.itemsize for a in args)
    out_bytes = M * Cp * 4
    scratch_bytes = N * (H + 2) * _round_up(W + 2, 8) * Cp * 4
    vmem_limit = int(max(16 << 20, 2 * (in_bytes + out_bytes + scratch_bytes)))

    vmem = pl.BlockSpec(memory_space=pltpu.MemorySpace.VMEM)
    kernel = functools.partial(_residual_kernel, bool(use1x1conv))

    out2d = pl.pallas_call(
        kernel,
        out_shape=jax.ShapeDtypeStruct((M, Cp), jnp.float32),
        in_specs=[vmem] * len(args),
        out_specs=vmem,
        scratch_shapes=[pltpu.VMEM((N, H + 2, W + 2, Cp), jnp.float32)],
        compiler_params=pltpu.CompilerParams(vmem_limit_bytes=vmem_limit),
    )(*args)

    out = out2d[:, :Cout].reshape(N, H, W, Cout)    # row-major identical to NHWC: free reshape
    return jnp.transpose(out, (0, 3, 1, 2))         # back to NCHW


# ------------------------- pure-JAX reference (for validation) -------------------------
def residual_ref(x_nchw, params, use1x1conv):
    x = jnp.transpose(x_nchw, (0, 2, 3, 1)).astype(jnp.float32)

    def conv(inp, w, b, pad):
        w_hwio = jnp.transpose(w, (2, 3, 1, 0))
        y = jax.lax.conv_general_dilated(
            inp, w_hwio, window_strides=(1, 1), padding=[(pad, pad), (pad, pad)],
            dimension_numbers=("NHWC", "HWIO", "NHWC"))
        return y + b.reshape(1, 1, 1, -1)

    def bn(y, g, be):
        mu = jnp.mean(y, axis=(0, 1, 2), keepdims=True)
        var = jnp.mean((y - mu) ** 2, axis=(0, 1, 2), keepdims=True)
        return (y - mu) * jax.lax.rsqrt(var + _EPS) * g.reshape(1, 1, 1, -1) + be.reshape(1, 1, 1, -1)

    y = jax.nn.relu(bn(conv(x, params["w1"], params["b1"], 1), params["g1"], params["be1"]))
    y = bn(conv(y, params["w2"], params["b2"], 1), params["g2"], params["be2"])
    sc = conv(x, params["w3"], params["b3"], 0) if use1x1conv else x
    return jnp.transpose(jax.nn.relu(y + sc), (0, 3, 1, 2))


def make_params(key, cin, cout, use1x1conv):
    ks = jax.random.split(key, 6)
    p = {
        "w1": 0.1 * jax.random.normal(ks[0], (cout, cin, 3, 3), jnp.float32),
        "b1": 0.1 * jax.random.normal(ks[1], (cout,), jnp.float32),
        "w2": 0.1 * jax.random.normal(ks[2], (cout, cout, 3, 3), jnp.float32),
        "b2": 0.1 * jax.random.normal(ks[3], (cout,), jnp.float32),
        # PyTorch BatchNorm2d default init: weight=1, bias=0
        "g1": jnp.ones((cout,), jnp.float32), "be1": jnp.zeros((cout,), jnp.float32),
        "g2": jnp.ones((cout,), jnp.float32), "be2": jnp.zeros((cout,), jnp.float32),
    }
    if use1x1conv:
        p["w3"] = 0.1 * jax.random.normal(ks[4], (cout, cin, 1, 1), jnp.float32)
        p["b3"] = 0.1 * jax.random.normal(ks[5], (cout,), jnp.float32)
    return p


if __name__ == "__main__":
    key = jax.random.PRNGKey(0)
    kx, kp1, kp2 = jax.random.split(key, 3)

    N, H, W = 2, 16, 16

    # Case 1: channel-changing block with 1x1 shortcut conv (in=4 -> out=8, stride=1)
    x1 = jax.random.normal(kx, (N, 4, H, W), jnp.float32)
    p1 = make_params(kp1, 4, 8, use1x1conv=True)
    out1 = jax.block_until_ready(residual_forward(x1, p1, use1x1conv=True))
    ref1 = residual_ref(x1, p1, use1x1conv=True)
    assert out1.shape == (N, 8, H, W)
    assert jnp.max(jnp.abs(out1 - ref1)) < 1e-3, float(jnp.max(jnp.abs(out1 - ref1)))

    # Case 2: identity shortcut (in = out = 4, stride=1, no 1x1 conv)
    x2 = jax.random.normal(kx, (N, 4, H, W), jnp.float32)
    p2 = make_params(kp2, 4, 4, use1x1conv=False)
    out2 = jax.block_until_ready(residual_forward(x2, p2, use1x1conv=False))
    ref2 = residual_ref(x2, p2, use1x1conv=False)
    assert out2.shape == (N, 4, H, W)
    assert jnp.max(jnp.abs(out2 - ref2)) < 1e-3, float(jnp.max(jnp.abs(out2 - ref2)))

    print("KERNEL_OK")
</pallas_src>

<mosaic_0001>
module attributes {stable_mosaic.version = 11 : i64} {
  func.func @_residual_kernel(%arg0: memref<512x128xf32, #tpu.memory_space<vmem>>, %arg1: memref<512x128xf32, #tpu.memory_space<vmem>>, %arg2: memref<128x128xf32, #tpu.memory_space<vmem>>, %arg3: memref<9x128x128xf32, #tpu.memory_space<vmem>>, %arg4: memref<128x128xf32, #tpu.memory_space<vmem>>, %arg5: memref<1x128xf32, #tpu.memory_space<vmem>>, %arg6: memref<1x128xf32, #tpu.memory_space<vmem>>, %arg7: memref<1x128xf32, #tpu.memory_space<vmem>>, %arg8: memref<1x128xf32, #tpu.memory_space<vmem>>, %arg9: memref<1x128xf32, #tpu.memory_space<vmem>>, %arg10: memref<512x128xf32, #tpu.memory_space<vmem>>, %arg11: memref<2x18x18x128xf32, #tpu.memory_space<vmem>>) attributes {dimension_semantics = [], scalar_prefetch = 0 : i64, scratch_operands = 1 : i64, tpu.core_type = #tpu.core_type<tc>} {
    %cst = arith.constant 1.000000e+00 : f32
    %0 = vector.broadcast %cst : f32 to vector<8x512xf32>
    %c0 = arith.constant 0 : index
    %c0_0 = arith.constant 0 : index
    %1 = vector.load %arg0[%c0, %c0_0] : memref<512x128xf32, #tpu.memory_space<vmem>>, vector<512x128xf32>
    %c0_1 = arith.constant 0 : index
    %c0_2 = arith.constant 0 : index
    %2 = vector.load %arg2[%c0_1, %c0_2] : memref<128x128xf32, #tpu.memory_space<vmem>>, vector<128x128xf32>
    %cst_3 = arith.constant dense<0.000000e+00> : vector<512x128xf32>
    %3 = tpu.matmul %1, %2, %cst_3 {dimension_numbers = #tpu.dot_dimension_numbers<[1], [0], [0], [1], [0, 0, 1, 1], [], []>} : vector<512x128xf32>, vector<128x128xf32>, vector<512x128xf32> -> vector<512x128xf32>
    %c0_4 = arith.constant 0 : index
    %c0_5 = arith.constant 0 : index
    %4 = vector.load %arg5[%c0_4, %c0_5] : memref<1x128xf32, #tpu.memory_space<vmem>>, vector<1x128xf32>
    %c0_6 = arith.constant 0 : index
    %c0_7 = arith.constant 0 : index
    %5 = vector.load %arg6[%c0_6, %c0_7] : memref<1x128xf32, #tpu.memory_space<vmem>>, vector<1x128xf32>
    %6 = arith.mulf %3, %3 : vector<512x128xf32>
    %7 = tpu.concatenate %3, %6 in 1 : vector<512x128xf32>, vector<512x128xf32> -> vector<512x256xf32>
    %cst_8 = arith.constant dense<0.000000e+00> : vector<8x256xf32>
    %8 = tpu.matmul %0, %7, %cst_8 {dimension_numbers = #tpu.dot_dimension_numbers<[1], [0], [0], [1], [0, 0, 1, 1], [], []>} : vector<8x512xf32>, vector<512x256xf32>, vector<8x256xf32> -> vector<8x256xf32>
    %9 = vector.extract_strided_slice %8 {offsets = [0, 0], sizes = [1, 256], strides = [1, 1]} : vector<8x256xf32> to vector<1x256xf32>
    %10 = vector.extract_strided_slice %9 {offsets = [0, 0], sizes = [1, 128], strides = [1, 1]} : vector<1x256xf32> to vector<1x128xf32>
    %cst_9 = arith.constant 0.001953125 : f32
    %11 = vector.broadcast %cst_9 : f32 to vector<1x128xf32>
    %12 = arith.mulf %10, %11 : vector<1x128xf32>
    %13 = vector.extract_strided_slice %9 {offsets = [0, 128], sizes = [1, 128], strides = [1, 1]} : vector<1x256xf32> to vector<1x128xf32>
    %cst_10 = arith.constant 0.001953125 : f32
    %14 = vector.broadcast %cst_10 : f32 to vector<1x128xf32>
    %15 = arith.mulf %13, %14 : vector<1x128xf32>
    %16 = arith.mulf %12, %12 : vector<1x128xf32>
    %17 = arith.subf %15, %16 : vector<1x128xf32>
    %cst_11 = arith.constant 9.99999974E-6 : f32
    %18 = vector.broadcast %cst_11 : f32 to vector<1x128xf32>
    %19 = arith.addf %17, %18 : vector<1x128xf32>
    %20 = math.rsqrt %19 : vector<1x128xf32>
    %21 = arith.mulf %20, %4 : vector<1x128xf32>
    %22 = arith.mulf %12, %21 : vector<1x128xf32>
    %23 = arith.subf %5, %22 : vector<1x128xf32>
    %24 = vector.broadcast %21 : vector<1x128xf32> to vector<512x128xf32>
    %25 = arith.mulf %3, %24 : vector<512x128xf32>
    %26 = vector.broadcast %23 : vector<1x128xf32> to vector<512x128xf32>
    %27 = arith.addf %25, %26 : vector<512x128xf32>
    %cst_12 = arith.constant 0.000000e+00 : f32
    %28 = vector.broadcast %cst_12 : f32 to vector<512x128xf32>
    %29 = arith.maximumf %27, %28 : vector<512x128xf32>
    %cst_13 = arith.constant 0.000000e+00 : f32
    %30 = vector.broadcast %cst_13 : f32 to vector<2x18x18x128xf32>
    %c0_14 = arith.constant 0 : index
    %c0_15 = arith.constant 0 : index
    %c0_16 = arith.constant 0 : index
    %c0_17 = arith.constant 0 : index
    %31 = vector.load %arg11[%c0_14, %c0_15, %c0_16, %c0_17] : memref<2x18x18x128xf32, #tpu.memory_space<vmem>>, vector<2x18x18x128xf32>
    tpu.vector_store %arg11[%c0_14, %c0_15, %c0_16, %c0_17], %30 {strides = array<i32>} : memref<2x18x18x128xf32, #tpu.memory_space<vmem>>, vector<2x18x18x128xf32>,
    %32 = vector.shape_cast %29 : vector<512x128xf32> to vector<2x16x16x128xf32>
    %c0_18 = arith.constant 0 : index
    %c1 = arith.constant 1 : index
    %c1_19 = arith.constant 1 : index
    %c0_20 = arith.constant 0 : index
    %33 = vector.load %arg11[%c0_18, %c1, %c1_19, %c0_20] : memref<2x18x18x128xf32, #tpu.memory_space<vmem>>, vector<2x16x16x128xf32>
    tpu.vector_store %arg11[%c0_18, %c1, %c1_19, %c0_20], %32 {strides = array<i32>} : memref<2x18x18x128xf32, #tpu.memory_space<vmem>>, vector<2x16x16x128xf32>,
    %cst_21 = arith.constant 0.000000e+00 : f32
    %34 = vector.broadcast %cst_21 : f32 to vector<512x128xf32>
    %c0_22 = arith.constant 0 : index
    %c0_23 = arith.constant 0 : index
    %c0_24 = arith.constant 0 : index
    %c0_25 = arith.constant 0 : index
    %35 = vector.load %arg11[%c0_22, %c0_23, %c0_24, %c0_25] : memref<2x18x18x128xf32, #tpu.memory_space<vmem>>, vector<2x18x16x128xf32>
    %36 = vector.extract_strided_slice %35 {offsets = [0, 0, 0, 0], sizes = [2, 16, 16, 128], strides = [1, 1, 1, 1]} : vector<2x18x16x128xf32> to vector<2x16x16x128xf32>
    %37 = vector.shape_cast %36 : vector<2x16x16x128xf32> to vector<512x128xf32>
    %c0_26 = arith.constant 0 : index
    %c0_27 = arith.constant 0 : index
    %c0_28 = arith.constant 0 : index
    %38 = vector.load %arg3[%c0_26, %c0_27, %c0_28] : memref<9x128x128xf32, #tpu.memory_space<vmem>>, vector<1x128x128xf32>
    %39 = vector.shape_cast %38 : vector<1x128x128xf32> to vector<128x128xf32>
    %cst_29 = arith.constant dense<0.000000e+00> : vector<512x128xf32>
    %40 = tpu.matmul %37, %39, %cst_29 {dimension_numbers = #tpu.dot_dimension_numbers<[1], [0], [0], [1], [0, 0, 1, 1], [], []>} : vector<512x128xf32>, vector<128x128xf32>, vector<512x128xf32> -> vector<512x128xf32>
    %41 = arith.addf %34, %40 : vector<512x128xf32>
    %42 = vector.extract_strided_slice %35 {offsets = [0, 1, 0, 0], sizes = [2, 16, 16, 128], strides = [1, 1, 1, 1]} : vector<2x18x16x128xf32> to vector<2x16x16x128xf32>
    %43 = vector.shape_cast %42 : vector<2x16x16x128xf32> to vector<512x128xf32>
    %c3 = arith.constant 3 : index
    %c0_30 = arith.constant 0 : index
    %c0_31 = arith.constant 0 : index
    %44 = vector.load %arg3[%c3, %c0_30, %c0_31] : memref<9x128x128xf32, #tpu.memory_space<vmem>>, vector<1x128x128xf32>
    %45 = vector.shape_cast %44 : vector<1x128x128xf32> to vector<128x128xf32>
    %cst_32 = arith.constant dense<0.000000e+00> : vector<512x128xf32>
    %46 = tpu.matmul %43, %45, %cst_32 {dimension_numbers = #tpu.dot_dimension_numbers<[1], [0], [0], [1], [0, 0, 1, 1], [], []>} : vector<512x128xf32>, vector<128x128xf32>, vector<512x128xf32> -> vector<512x128xf32>
    %47 = arith.addf %41, %46 : vector<512x128xf32>
    %48 = vector.extract_strided_slice %35 {offsets = [0, 2, 0, 0], sizes = [2, 16, 16, 128], strides = [1, 1, 1, 1]} : vector<2x18x16x128xf32> to vector<2x16x16x128xf32>
    %49 = vector.shape_cast %48 : vector<2x16x16x128xf32> to vector<512x128xf32>
    %c6 = arith.constant 6 : index
    %c0_33 = arith.constant 0 : index
    %c0_34 = arith.constant 0 : index
    %50 = vector.load %arg3[%c6, %c0_33, %c0_34] : memref<9x128x128xf32, #tpu.memory_space<vmem>>, vector<1x128x128xf32>
    %51 = vector.shape_cast %50 : vector<1x128x128xf32> to vector<128x128xf32>
    %cst_35 = arith.constant dense<0.000000e+00> : vector<512x128xf32>
    %52 = tpu.matmul %49, %51, %cst_35 {dimension_numbers = #tpu.dot_dimension_numbers<[1], [0], [0], [1], [0, 0, 1, 1], [], []>} : vector<512x128xf32>, vector<128x128xf32>, vector<512x128xf32> -> vector<512x128xf32>
    %53 = arith.addf %47, %52 : vector<512x128xf32>
    %c0_36 = arith.constant 0 : index
    %c0_37 = arith.constant 0 : index
    %c1_38 = arith.constant 1 : index
    %c0_39 = arith.constant 0 : index
    %54 = vector.load %arg11[%c0_36, %c0_37, %c1_38, %c0_39] : memref<2x18x18x128xf32, #tpu.memory_space<vmem>>, vector<2x18x16x128xf32>
    %55 = vector.extract_strided_slice %54 {offsets = [0, 0, 0, 0], sizes = [2, 16, 16, 128], strides = [1, 1, 1, 1]} : vector<2x18x16x128xf32> to vector<2x16x16x128xf32>
    %56 = vector.shape_cast %55 : vector<2x16x16x128xf32> to vector<512x128xf32>
    %c1_40 = arith.constant 1 : index
    %c0_41 = arith.constant 0 : index
    %c0_42 = arith.constant 0 : index
    %57 = vector.load %arg3[%c1_40, %c0_41, %c0_42] : memref<9x128x128xf32, #tpu.memory_space<vmem>>, vector<1x128x128xf32>
    %58 = vector.shape_cast %57 : vector<1x128x128xf32> to vector<128x128xf32>
    %cst_43 = arith.constant dense<0.000000e+00> : vector<512x128xf32>
    %59 = tpu.matmul %56, %58, %cst_43 {dimension_numbers = #tpu.dot_dimension_numbers<[1], [0], [0], [1], [0, 0, 1, 1], [], []>} : vector<512x128xf32>, vector<128x128xf32>, vector<512x128xf32> -> vector<512x128xf32>
    %60 = arith.addf %53, %59 : vector<512x128xf32>
    %61 = vector.extract_strided_slice %54 {offsets = [0, 1, 0, 0], sizes = [2, 16, 16, 128], strides = [1, 1, 1, 1]} : vector<2x18x16x128xf32> to vector<2x16x16x128xf32>
    %62 = vector.shape_cast %61 : vector<2x16x16x128xf32> to vector<512x128xf32>
    %c4 = arith.constant 4 : index
    %c0_44 = arith.constant 0 : index
    %c0_45 = arith.constant 0 : index
    %63 = vector.load %arg3[%c4, %c0_44, %c0_45] : memref<9x128x128xf32, #tpu.memory_space<vmem>>, vector<1x128x128xf32>
    %64 = vector.shape_cast %63 : vector<1x128x128xf32> to vector<128x128xf32>
    %cst_46 = arith.constant dense<0.000000e+00> : vector<512x128xf32>
    %65 = tpu.matmul %62, %64, %cst_46 {dimension_numbers = #tpu.dot_dimension_numbers<[1], [0], [0], [1], [0, 0, 1, 1], [], []>} : vector<512x128xf32>, vector<128x128xf32>, vector<512x128xf32> -> vector<512x128xf32>
    %66 = arith.addf %60, %65 : vector<512x128xf32>
    %67 = vector.extract_strided_slice %54 {offsets = [0, 2, 0, 0], sizes = [2, 16, 16, 128], strides = [1, 1, 1, 1]} : vector<2x18x16x128xf32> to vector<2x16x16x128xf32>
    %68 = vector.shape_cast %67 : vector<2x16x16x128xf32> to vector<512x128xf32>
    %c7 = arith.constant 7 : index
    %c0_47 = arith.constant 0 : index
    %c0_48 = arith.constant 0 : index
    %69 = vector.load %arg3[%c7, %c0_47, %c0_48] : memref<9x128x128xf32, #tpu.memory_space<vmem>>, vector<1x128x128xf32>
    %70 = vector.shape_cast %69 : vector<1x128x128xf32> to vector<128x128xf32>
    %cst_49 = arith.constant dense<0.000000e+00> : vector<512x128xf32>
    %71 = tpu.matmul %68, %70, %cst_49 {dimension_numbers = #tpu.dot_dimension_numbers<[1], [0], [0], [1], [0, 0, 1, 1], [], []>} : vector<512x128xf32>, vector<128x128xf32>, vector<512x128xf32> -> vector<512x128xf32>
    %72 = arith.addf %66, %71 : vector<512x128xf32>
    %c0_50 = arith.constant 0 : index
    %c0_51 = arith.constant 0 : index
    %c2 = arith.constant 2 : index
    %c0_52 = arith.constant 0 : index
    %73 = vector.load %arg11[%c0_50, %c0_51, %c2, %c0_52] : memref<2x18x18x128xf32, #tpu.memory_space<vmem>>, vector<2x18x16x128xf32>
    %74 = vector.extract_strided_slice %73 {offsets = [0, 0, 0, 0], sizes = [2, 16, 16, 128], strides = [1, 1, 1, 1]} : vector<2x18x16x128xf32> to vector<2x16x16x128xf32>
    %75 = vector.shape_cast %74 : vector<2x16x16x128xf32> to vector<512x128xf32>
    %c2_53 = arith.constant 2 : index
    %c0_54 = arith.constant 0 : index
    %c0_55 = arith.constant 0 : index
    %76 = vector.load %arg3[%c2_53, %c0_54, %c0_55] : memref<9x128x128xf32, #tpu.memory_space<vmem>>, vector<1x128x128xf32>
    %77 = vector.shape_cast %76 : vector<1x128x128xf32> to vector<128x128xf32>
    %cst_56 = arith.constant dense<0.000000e+00> : vector<512x128xf32>
    %78 = tpu.matmul %75, %77, %cst_56 {dimension_numbers = #tpu.dot_dimension_numbers<[1], [0], [0], [1], [0, 0, 1, 1], [], []>} : vector<512x128xf32>, vector<128x128xf32>, vector<512x128xf32> -> vector<512x128xf32>
    %79 = arith.addf %72, %78 : vector<512x128xf32>
    %80 = vector.extract_strided_slice %73 {offsets = [0, 1, 0, 0], sizes = [2, 16, 16, 128], strides = [1, 1, 1, 1]} : vector<2x18x16x128xf32> to vector<2x16x16x128xf32>
    %81 = vector.shape_cast %80 : vector<2x16x16x128xf32> to vector<512x128xf32>
    %c5 = arith.constant 5 : index
    %c0_57 = arith.constant 0 : index
    %c0_58 = arith.constant 0 : index
    %82 = vector.load %arg3[%c5, %c0_57, %c0_58] : memref<9x128x128xf32, #tpu.memory_space<vmem>>, vector<1x128x128xf32>
    %83 = vector.shape_cast %82 : vector<1x128x128xf32> to vector<128x128xf32>
    %cst_59 = arith.constant dense<0.000000e+00> : vector<512x128xf32>
    %84 = tpu.matmul %81, %83, %cst_59 {dimension_numbers = #tpu.dot_dimension_numbers<[1], [0], [0], [1], [0, 0, 1, 1], [], []>} : vector<512x128xf32>, vector<128x128xf32>, vector<512x128xf32> -> vector<512x128xf32>
    %85 = arith.addf %79, %84 : vector<512x128xf32>
    %86 = vector.extract_strided_slice %73 {offsets = [0, 2, 0, 0], sizes = [2, 16, 16, 128], strides = [1, 1, 1, 1]} : vector<2x18x16x128xf32> to vector<2x16x16x128xf32>
    %87 = vector.shape_cast %86 : vector<2x16x16x128xf32> to vector<512x128xf32>
    %c8 = arith.constant 8 : index
    %c0_60 = arith.constant 0 : index
    %c0_61 = arith.constant 0 : index
    %88 = vector.load %arg3[%c8, %c0_60, %c0_61] : memref<9x128x128xf32, #tpu.memory_space<vmem>>, vector<1x128x128xf32>
    %89 = vector.shape_cast %88 : vector<1x128x128xf32> to vector<128x128xf32>
    %cst_62 = arith.constant dense<0.000000e+00> : vector<512x128xf32>
    %90 = tpu.matmul %87, %89, %cst_62 {dimension_numbers = #tpu.dot_dimension_numbers<[1], [0], [0], [1], [0, 0, 1, 1], [], []>} : vector<512x128xf32>, vector<128x128xf32>, vector<512x128xf32> -> vector<512x128xf32>
    %91 = arith.addf %85, %90 : vector<512x128xf32>
    %c0_63 = arith.constant 0 : index
    %c0_64 = arith.constant 0 : index
    %92 = vector.load %arg7[%c0_63, %c0_64] : memref<1x128xf32, #tpu.memory_space<vmem>>, vector<1x128xf32>
    %c0_65 = arith.constant 0 : index
    %c0_66 = arith.constant 0 : index
    %93 = vector.load %arg8[%c0_65, %c0_66] : memref<1x128xf32, #tpu.memory_space<vmem>>, vector<1x128xf32>
    %94 = arith.mulf %91, %91 : vector<512x128xf32>
    %95 = tpu.concatenate %91, %94 in 1 : vector<512x128xf32>, vector<512x128xf32> -> vector<512x256xf32>
    %cst_67 = arith.constant dense<0.000000e+00> : vector<8x256xf32>
    %96 = tpu.matmul %0, %95, %cst_67 {dimension_numbers = #tpu.dot_dimension_numbers<[1], [0], [0], [1], [0, 0, 1, 1], [], []>} : vector<8x512xf32>, vector<512x256xf32>, vector<8x256xf32> -> vector<8x256xf32>
    %97 = vector.extract_strided_slice %96 {offsets = [0, 0], sizes = [1, 256], strides = [1, 1]} : vector<8x256xf32> to vector<1x256xf32>
    %98 = vector.extract_strided_slice %97 {offsets = [0, 0], sizes = [1, 128], strides = [1, 1]} : vector<1x256xf32> to vector<1x128xf32>
    %cst_68 = arith.constant 0.001953125 : f32
    %99 = vector.broadcast %cst_68 : f32 to vector<1x128xf32>
    %100 = arith.mulf %98, %99 : vector<1x128xf32>
    %101 = vector.extract_strided_slice %97 {offsets = [0, 128], sizes = [1, 128], strides = [1, 1]} : vector<1x256xf32> to vector<1x128xf32>
    %cst_69 = arith.constant 0.001953125 : f32
    %102 = vector.broadcast %cst_69 : f32 to vector<1x128xf32>
    %103 = arith.mulf %101, %102 : vector<1x128xf32>
    %104 = arith.mulf %100, %100 : vector<1x128xf32>
    %105 = arith.subf %103, %104 : vector<1x128xf32>
    %cst_70 = arith.constant 9.99999974E-6 : f32
    %106 = vector.broadcast %cst_70 : f32 to vector<1x128xf32>
    %107 = arith.addf %105, %106 : vector<1x128xf32>
    %108 = math.rsqrt %107 : vector<1x128xf32>
    %109 = arith.mulf %108, %92 : vector<1x128xf32>
    %110 = arith.mulf %100, %109 : vector<1x128xf32>
    %111 = arith.subf %93, %110 : vector<1x128xf32>
    %c0_71 = arith.constant 0 : index
    %c0_72 = arith.constant 0 : index
    %112 = vector.load %arg1[%c0_71, %c0_72] : memref<512x128xf32, #tpu.memory_space<vmem>>, vector<512x128xf32>
    %c0_73 = arith.constant 0 : index
    %c0_74 = arith.constant 0 : index
    %113 = vector.load %arg4[%c0_73, %c0_74] : memref<128x128xf32, #tpu.memory_space<vmem>>, vector<128x128xf32>
    %cst_75 = arith.constant dense<0.000000e+00> : vector<512x128xf32>
    %114 = tpu.matmul %112, %113, %cst_75 {dimension_numbers = #tpu.dot_dimension_numbers<[1], [0], [0], [1], [0, 0, 1, 1], [], []>} : vector<512x128xf32>, vector<128x128xf32>, vector<512x128xf32> -> vector<512x128xf32>
    %c0_76 = arith.constant 0 : index
    %c0_77 = arith.constant 0 : index
    %115 = vector.load %arg9[%c0_76, %c0_77] : memref<1x128xf32, #tpu.memory_space<vmem>>, vector<1x128xf32>
    %116 = arith.addf %111, %115 : vector<1x128xf32>
    %117 = vector.broadcast %109 : vector<1x128xf32> to vector<512x128xf32>
    %118 = arith.mulf %91, %117 : vector<512x128xf32>
    %119 = vector.broadcast %116 : vector<1x128xf32> to vector<512x128xf32>
    %120 = arith.addf %118, %119 : vector<512x128xf32>
    %121 = arith.addf %120, %114 : vector<512x128xf32>
    %cst_78 = arith.constant 0.000000e+00 : f32
    %122 = vector.broadcast %cst_78 : f32 to vector<512x128xf32>
    %123 = arith.maximumf %121, %122 : vector<512x128xf32>
    %c0_79 = arith.constant 0 : index
    %c0_80 = arith.constant 0 : index
    %124 = vector.load %arg10[%c0_79, %c0_80] : memref<512x128xf32, #tpu.memory_space<vmem>>, vector<512x128xf32>
    tpu.vector_store %arg10[%c0_79, %c0_80], %123 {strides = array<i32>} : memref<512x128xf32, #tpu.memory_space<vmem>>, vector<512x128xf32>,
    return
  }
}

</mosaic_0001>

<bundles_post_ra>
// kernel: residual_forward.1
= control target key start
LH: loop header
LB: loop body
LE: loop exit
PB: predicated region body
PF: predicated region fallthrough
CT: control target
= control target key end

     0   :  { %s14167_s2 = inlined_call_operand.vmem [shape: f32[128,128], index: 2, kind: input, shape index: {}]   ;;  %s14168_s0 = inlined_call_operand.vmem [shape: f32[512,128], index: 0, kind: input, shape index: {}]   ;;  %s14169_s3 = inlined_call_operand.vmem [shape: f32[9,128,128], index: 3, kind: input, shape index: {}]   ;;  %s14170_s5 = inlined_call_operand.vmem [shape: f32[1,128], index: 5, kind: input, shape index: {}]   ;;  %s14171_s6 = inlined_call_operand.vmem [shape: f32[1,128], index: 6, kind: input, shape index: {}]   ;;  %s14172_s4 = inlined_call_operand.vmem [shape: f32[128,128], index: 4, kind: input, shape index: {}]   ;;  %s14173_s1 = inlined_call_operand.vmem [shape: f32[512,128], index: 1, kind: input, shape index: {}]   ;;  %s14174_s7 = inlined_call_operand.vmem [shape: f32[1,128], index: 7, kind: input, shape index: {}]   ;;  %s14175_s8 = inlined_call_operand.vmem [shape: f32[1,128], index: 8, kind: input, shape index: {}]   ;;  %s14176_s9 = inlined_call_operand.vmem [shape: f32[1,128], index: 9, kind: input, shape index: {}]   ;;  %s14177_s10 = inlined_call_operand.vmem [shape: f32[512,128], index: 10, kind: output, shape index: {}]  }
   0x1   :  { %v99_v0 = vld [vmem:[%s14167_s2] sm:$0xff]  ;;  %v100_v1 = vld [vmem:[%s14167_s2 + $0x8] sm:$0xff]  ;;  %v101_v2 = vld [vmem:[%s14167_s2 + $0x10] sm:$0xff] }
   0x2   :  { %v8807_v3 = vpack.c.bf16 %v100_v1, %v99_v0  ;;  %v102_v4 = vld [vmem:[%s14167_s2 + $0x18] sm:$0xff]  ;;  %v103_v6 = vld [vmem:[%s14167_s2 + $0x20] sm:$0xff]  ;;  %v104_v7 = vld [vmem:[%s14167_s2 + $0x28] sm:$0xff] }
   0x3   :  { %v8811_v5 = vpack.c.bf16 %v102_v4, %v101_v2  ;;  %v8815_v8 = vpack.c.bf16 %v104_v7, %v103_v6  ;;  %v35_v9 = vld [vmem:[%s14168_s0] sm:$0xff]  ;;  %v105_v10 = vld [vmem:[%s14167_s2 + $0x30] sm:$0xff]  ;;  %v106_v11 = vld [vmem:[%s14167_s2 + $0x38] sm:$0xff]  ;;  %v10012_v6 = vmov 0.0  }
   0x4   :  { %8808 = vmatprep.subr.bf16.mxu1 %v8807_v3  ;;  %7431 = vmatprep.mubr.f32.mxu1 %v35_v9  ;;  %v8819_v12 = vpack.c.bf16 %v106_v11, %v105_v10  ;;  %v107_v13 = vld [vmem:[%s14167_s2 + $0x40] sm:$0xff]  ;;  %v108_v14 = vld [vmem:[%s14167_s2 + $0x48] sm:$0xff]  ;;  %v109_v16 = vld [vmem:[%s14167_s2 + $0x50] sm:$0xff]  ;;  %923 = vst [vmem:[#allocation2 + $0x20] sm:$0xff] %v10012_v6 }
   0x5   :  { %8810 = vmatpush3.bf16.msra.mxu1 %v8807_v3  ;;  %v8823_v15 = vpack.c.bf16 %v108_v14, %v107_v13  ;;  %v110_v17 = vld [vmem:[%s14167_s2 + $0x58] sm:$0xff]  ;;  %v111_v19 = vld [vmem:[%s14167_s2 + $0x60] sm:$0xff]  ;;  %v112_v20 = vld [vmem:[%s14167_s2 + $0x68] sm:$0xff]  ;;  %924 = vst [vmem:[#allocation2 + $0x28] sm:$0x3] %v10012_v6 }
   0x6   :  { %8812 = vmatprep.subr.bf16.mxu1 %v8811_v5  ;;  %v8827_v18 = vpack.c.bf16 %v110_v17, %v109_v16  ;;  %v8831_v21 = vpack.c.bf16 %v112_v20, %v111_v19  ;;  %v113_v22 = vld [vmem:[%s14167_s2 + $0x70] sm:$0xff]  ;;  %v114_v23 = vld [vmem:[%s14167_s2 + $0x78] sm:$0xff]  ;;  %v36_v25 = vld [vmem:[%s14168_s0 + $0x8] sm:$0xff]  ;;  %919 = vst [vmem:[#allocation2] sm:$0xff] %v10012_v6 }
   0x7   :  { %v8835_v24 = vpack.c.bf16 %v114_v23, %v113_v22  ;;  %v37_v26 = vld [vmem:[%s14168_s0 + $0x10] sm:$0xff]  ;;  %v38_v27 = vld [vmem:[%s14168_s0 + $0x18] sm:$0xff]  ;;  %v39_v28 = vld [vmem:[%s14168_s0 + $0x20] sm:$0xff]  ;;  %920 = vst [vmem:[#allocation2 + $0x8] sm:$0xff] %v10012_v6 }
   0x8   :  { %v40_v29 = vld [vmem:[%s14168_s0 + $0x28] sm:$0xff]  ;;  %v41_v30 = vld [vmem:[%s14168_s0 + $0x30] sm:$0xff]  ;;  %v42_v31 = vld [vmem:[%s14168_s0 + $0x38] sm:$0xff]  ;;  %921 = vst [vmem:[#allocation2 + $0x10] sm:$0x3] %v10012_v6 }
   0x9   :  { %8814 = vmatpush3.bf16.msra.mxu1 %v8811_v5  ;;  %v43_v32 = vld [vmem:[%s14168_s0 + $0x40] sm:$0xff]  ;;  %v44_v33 = vld [vmem:[%s14168_s0 + $0x48] sm:$0xff]  ;;  %v45_v34 = vld [vmem:[%s14168_s0 + $0x50] sm:$0xff]  ;;  %922 = vst [vmem:[#allocation2 + $0x18] sm:$0xff] %v10012_v6 }
   0xa   :  { %8816 = vmatprep.subr.bf16.mxu1 %v8815_v8  ;;  %v46_v35 = vld [vmem:[%s14168_s0 + $0x58] sm:$0xff]  ;;  %v47_v36 = vld [vmem:[%s14168_s0 + $0x60] sm:$0xff]  ;;  %v48_v37 = vld [vmem:[%s14168_s0 + $0x68] sm:$0xff]  ;;  %925 = vst [vmem:[#allocation2 + $0x30] sm:$0xff] %v10012_v6 }
   0xb   :  { %v49_v38 = vld [vmem:[%s14168_s0 + $0x70] sm:$0xff]  ;;  %v50_v39 = vld [vmem:[%s14168_s0 + $0x78] sm:$0xff]  ;;  %v51_v40 = vld [vmem:[%s14168_s0 + $0x80] sm:$0xff]  ;;  %926 = vst [vmem:[#allocation2 + $0x38] sm:$0xff] %v10012_v6 }
   0xc   :  { %v52_v41 = vld [vmem:[%s14168_s0 + $0x88] sm:$0xff]  ;;  %v53_v42 = vld [vmem:[%s14168_s0 + $0x90] sm:$0xff]  ;;  %v54_v43 = vld [vmem:[%s14168_s0 + $0x98] sm:$0xff]  ;;  %927 = vst [vmem:[#allocation2 + $0x40] sm:$0x3] %v10012_v6 }
   0xd   :  { %8818 = vmatpush3.bf16.msra.mxu1 %v8815_v8  ;;  %v55_v44 = vld [vmem:[%s14168_s0 + $0xa0] sm:$0xff]  ;;  %v56_v45 = vld [vmem:[%s14168_s0 + $0xa8] sm:$0xff]  ;;  %v57_v46 = vld [vmem:[%s14168_s0 + $0xb0] sm:$0xff]  ;;  %928 = vst [vmem:[#allocation2 + $0x48] sm:$0xff] %v10012_v6 }
   0xe   :  { %8820 = vmatprep.subr.bf16.mxu1 %v8819_v12  ;;  %v58_v47 = vld [vmem:[%s14168_s0 + $0xb8] sm:$0xff]  ;;  %v59_v48 = vld [vmem:[%s14168_s0 + $0xc0] sm:$0xff]  ;;  %v60_v49 = vld [vmem:[%s14168_s0 + $0xc8] sm:$0xff]  ;;  %929 = vst [vmem:[#allocation2 + $0x50] sm:$0xff] %v10012_v6 }
   0xf   :  { %v61_v50 = vld [vmem:[%s14168_s0 + $0xd0] sm:$0xff]  ;;  %v62_v51 = vld [vmem:[%s14168_s0 + $0xd8] sm:$0xff]  ;;  %v63_v52 = vld [vmem:[%s14168_s0 + $0xe0] sm:$0xff]  ;;  %930 = vst [vmem:[#allocation2 + $0x58] sm:$0x3] %v10012_v6 }
  0x10   :  { %v64_v53 = vld [vmem:[%s14168_s0 + $0xe8] sm:$0xff]  ;;  %v65_v54 = vld [vmem:[%s14168_s0 + $0xf0] sm:$0xff]  ;;  %v66_v55 = vld [vmem:[%s14168_s0 + $0xf8] sm:$0xff]  ;;  %931 = vst [vmem:[#allocation2 + $0x60] sm:$0xff] %v10012_v6 }
  0x11   :  { %8822 = vmatpush3.bf16.msra.mxu1 %v8819_v12  ;;  %v67_v56 = vld [vmem:[%s14168_s0 + $0x100] sm:$0xff]  ;;  %v68_v57 = vld [vmem:[%s14168_s0 + $0x108] sm:$0xff]  ;;  %v69_v58 = vld [vmem:[%s14168_s0 + $0x110] sm:$0xff]  ;;  %932 = vst [vmem:[#allocation2 + $0x68] sm:$0xff] %v10012_v6 }
  0x12   :  { %8824 = vmatprep.subr.bf16.mxu1 %v8823_v15  ;;  %v70_v59 = vld [vmem:[%s14168_s0 + $0x118] sm:$0xff]  ;;  %v71_v60 = vld [vmem:[%s14168_s0 + $0x120] sm:$0xff]  ;;  %v72_v61 = vld [vmem:[%s14168_s0 + $0x128] sm:$0xff]  ;;  %933 = vst [vmem:[#allocation2 + $0x70] sm:$0x3] %v10012_v6 }
  0x13   :  { %v73_v62 = vld [vmem:[%s14168_s0 + $0x130] sm:$0xff]  ;;  %v74_v63 = vld [vmem:[%s14168_s0 + $0x138] sm:$0xff]  ;;  %v75_v0 = vld [vmem:[%s14168_s0 + $0x140] sm:$0xff]  ;;  %934 = vst [vmem:[#allocation2 + $0x78] sm:$0xff] %v10012_v6 }
  0x14   :  { %v76_v1 = vld [vmem:[%s14168_s0 + $0x148] sm:$0xff]  ;;  %v77_v2 = vld [vmem:[%s14168_s0 + $0x150] sm:$0xff]  ;;  %v78_v3 = vld [vmem:[%s14168_s0 + $0x158] sm:$0xff]  ;;  %935 = vst [vmem:[#allocation2 + $0x80] sm:$0xff] %v10012_v6 }
  0x15   :  { %8826 = vmatpush3.bf16.msra.mxu1 %v8823_v15  ;;  %v79_v4 = vld [vmem:[%s14168_s0 + $0x160] sm:$0xff]  ;;  %v10255_v5 = vld [vmem:[%s14168_s0 + $0x168] sm:$0xff]  ;;  %936 = vst [vmem:[#allocation2 + $0x88] sm:$0x3] %v10012_v6  ;;  %937 = vst [vmem:[#allocation2 + $0x90] sm:$0xff] %v10012_v6 }
  0x16   :  { %8828 = vmatprep.subr.bf16.mxu1 %v8827_v18  ;;  %938 = vst [vmem:[#allocation2 + $0x98] sm:$0xff] %v10012_v6  ;;  %939 = vst [vmem:[#allocation2 + $0xa0] sm:$0x3] %v10012_v6  ;;  %v81_v7 = vld [vmem:[%s14168_s0 + $0x170] sm:$0xff]  ;;  %v82_v8 = vld [vmem:[%s14168_s0 + $0x178] sm:$0xff] }
  0x17   :  { %940 = vst [vmem:[#allocation2 + $0xa8] sm:$0xff] %v10012_v6  ;;  %941 = vst [vmem:[#allocation2 + $0xb0] sm:$0xff] %v10012_v6  ;;  %v83_v9 = vld [vmem:[%s14168_s0 + $0x180] sm:$0xff]  ;;  %v84_v10 = vld [vmem:[%s14168_s0 + $0x188] sm:$0xff] }
  0x18   :  { %942 = vst [vmem:[#allocation2 + $0xb8] sm:$0x3] %v10012_v6  ;;  %943 = vst [vmem:[#allocation2 + $0xc0] sm:$0xff] %v10012_v6  ;;  %v85_v11 = vld [vmem:[%s14168_s0 + $0x190] sm:$0xff]  ;;  %v86_v12 = vld [vmem:[%s14168_s0 + $0x198] sm:$0xff] }
  0x19   :  { %8830 = vmatpush3.bf16.msra.mxu1 %v8827_v18  ;;  %944 = vst [vmem:[#allocation2 + $0xc8] sm:$0xff] %v10012_v6  ;;  %945 = vst [vmem:[#allocation2 + $0xd0] sm:$0x3] %v10012_v6  ;;  %v87_v13 = vld [vmem:[%s14168_s0 + $0x1a0] sm:$0xff]  ;;  %v88_v14 = vld [vmem:[%s14168_s0 + $0x1a8] sm:$0xff] }
  0x1a   :  { %8832 = vmatprep.subr.bf16.mxu1 %v8831_v21  ;;  %946 = vst [vmem:[#allocation2 + $0xd8] sm:$0xff] %v10012_v6  ;;  %947 = vst [vmem:[#allocation2 + $0xe0] sm:$0xff] %v10012_v6  ;;  %v89_v15 = vld [vmem:[%s14168_s0 + $0x1b0] sm:$0xff]  ;;  %v90_v16 = vld [vmem:[%s14168_s0 + $0x1b8] sm:$0xff] }
  0x1b   :  { %948 = vst [vmem:[#allocation2 + $0xe8] sm:$0x3] %v10012_v6  ;;  %949 = vst [vmem:[#allocation2 + $0xf0] sm:$0xff] %v10012_v6  ;;  %v91_v17 = vld [vmem:[%s14168_s0 + $0x1c0] sm:$0xff]  ;;  %v92_v18 = vld [vmem:[%s14168_s0 + $0x1c8] sm:$0xff] }
  0x1c   :  { %950 = vst [vmem:[#allocation2 + $0xf8] sm:$0xff] %v10012_v6  ;;  %951 = vst [vmem:[#allocation2 + $0x100] sm:$0x3] %v10012_v6  ;;  %v93_v19 = vld [vmem:[%s14168_s0 + $0x1d0] sm:$0xff]  ;;  %v94_v20 = vld [vmem:[%s14168_s0 + $0x1d8] sm:$0xff] }
  0x1d   :  { %8834 = vmatpush3.bf16.msra.mxu1 %v8831_v21  ;;  %952 = vst [vmem:[#allocation2 + $0x108] sm:$0xff] %v10012_v6  ;;  %953 = vst [vmem:[#allocation2 + $0x110] sm:$0xff] %v10012_v6  ;;  %v95_v21 = vld [vmem:[%s14168_s0 + $0x1e0] sm:$0xff]  ;;  %v96_v22 = vld [vmem:[%s14168_s0 + $0x1e8] sm:$0xff] }
  0x1e   :  { %8836 = vmatprep.subr.bf16.mxu1 %v8835_v24  ;;  %954 = vst [vmem:[#allocation2 + $0x118] sm:$0x3] %v10012_v6  ;;  %955 = vst [vmem:[#allocation2 + $0x120] sm:$0xff] %v10012_v6  ;;  %v97_v23 = vld [vmem:[%s14168_s0 + $0x1f0] sm:$0xff] }
  0x1f   :  { %956 = vst [vmem:[#allocation2 + $0x128] sm:$0xff] %v10012_v6  ;;  %957 = vst [vmem:[#allocation2 + $0x130] sm:$0x3] %v10012_v6 }
  0x20   :  { %958 = vst [vmem:[#allocation2 + $0x138] sm:$0xff] %v10012_v6  ;;  %959 = vst [vmem:[#allocation2 + $0x140] sm:$0xff] %v10012_v6 }
  0x21   :  { %8838 = vmatpush3.bf16.msra.mxu1 %v8835_v24  ;;  %960 = vst [vmem:[#allocation2 + $0x148] sm:$0x3] %v10012_v6  ;;  %961 = vst [vmem:[#allocation2 + $0x150] sm:$0xff] %v10012_v6  ;;  %v98_v24 = vld [vmem:[%s14168_s0 + $0x1f8] sm:$0xff] }
  0x22   :  { %962 = vst [vmem:[#allocation2 + $0x158] sm:$0xff] %v10012_v6  ;;  %963 = vst [vmem:[#allocation2 + $0x160] sm:$0x3] %v10012_v6 }
  0x23   :  { %964 = vst [vmem:[#allocation2 + $0x168] sm:$0xff] %v10012_v6  ;;  %965 = vst [vmem:[#allocation2 + $0x170] sm:$0xff] %v10012_v6 }
  0x24   :  { %7432 = vmatmul.mubr.f32.vlgmr.msra.gmra.mrb[0].mxu1 %v36_v25  ;;  %966 = vst [vmem:[#allocation2 + $0x178] sm:$0x3] %v10012_v6  ;;  %967 = vst [vmem:[#allocation2 + $0x180] sm:$0xff] %v10012_v6  ;;  %v14178_v25 = vmov 1.0  }
  0x25   :  { %7434 = vmatprep.mubr.f32.mxu1 %v37_v26  ;;  %968 = vst [vmem:[#allocation2 + $0x188] sm:$0xff] %v10012_v6  ;;  %969 = vst [vmem:[#allocation2 + $0x190] sm:$0x3] %v10012_v6 }
  0x26   :  { %970 = vst [vmem:[#allocation2 + $0x198] sm:$0xff] %v10012_v6  ;;  %971 = vst [vmem:[#allocation2 + $0x1a0] sm:$0xff] %v10012_v6 }
  0x27   :  { %972 = vst [vmem:[#allocation2 + $0x1a8] sm:$0x3] %v10012_v6  ;;  %973 = vst [vmem:[#allocation2 + $0x1b0] sm:$0xff] %v10012_v6 }
  0x28   :  { %7435 = vmatmul.mubr.f32.gmra.mrb[2].mxu1 %v38_v27  ;;  %974 = vst [vmem:[#allocation2 + $0x1b8] sm:$0xff] %v10012_v6  ;;  %975 = vst [vmem:[#allocation2 + $0x1c0] sm:$0x3] %v10012_v6 }
  0x29   :  { %7437 = vmatprep.mubr.f32.mxu1 %v39_v28  ;;  %976 = vst [vmem:[#allocation2 + $0x1c8] sm:$0xff] %v10012_v6  ;;  %977 = vst [vmem:[#allocation2 + $0x1d0] sm:$0xff] %v10012_v6 }
  0x2a   :  { %978 = vst [vmem:[#allocation2 + $0x1d8] sm:$0x3] %v10012_v6  ;;  %979 = vst [vmem:[#allocation2 + $0x1e0] sm:$0xff] %v10012_v6 }
  0x2b   :  { %980 = vst [vmem:[#allocation2 + $0x1e8] sm:$0xff] %v10012_v6  ;;  %981 = vst [vmem:[#allocation2 + $0x1f0] sm:$0x3] %v10012_v6 }
  0x2c   :  { %7438 = vmatmul.mubr.f32.gmra.mrb[4].mxu1 %v40_v29  ;;  %982 = vst [vmem:[#allocation2 + $0x1f8] sm:$0xff] %v10012_v6  ;;  %983 = vst [vmem:[#allocation2 + $0x200] sm:$0xff] %v10012_v6 }
  0x2d   :  { %7440 = vmatprep.mubr.f32.mxu1 %v41_v30  ;;  %984 = vst [vmem:[#allocation2 + $0x208] sm:$0x3] %v10012_v6  ;;  %985 = vst [vmem:[#allocation2 + $0x210] sm:$0xff] %v10012_v6 }
  0x2e   :  { %986 = vst [vmem:[#allocation2 + $0x218] sm:$0xff] %v10012_v6  ;;  %987 = vst [vmem:[#allocation2 + $0x220] sm:$0x3] %v10012_v6 }
  0x2f   :  { %988 = vst [vmem:[#allocation2 + $0x228] sm:$0xff] %v10012_v6  ;;  %989 = vst [vmem:[#allocation2 + $0x230] sm:$0xff] %v10012_v6 }
  0x30   :  { %7441 = vmatmul.mubr.f32.gmra.mrb[6].mxu1 %v42_v31  ;;  %990 = vst [vmem:[#allocation2 + $0x238] sm:$0x3] %v10012_v6  ;;  %991 = vst [vmem:[#allocation2 + $0x240] sm:$0xff] %v10012_v6 }
  0x31   :  { %7443 = vmatprep.mubr.f32.mxu1 %v43_v32  ;;  %992 = vst [vmem:[#allocation2 + $0x248] sm:$0xff] %v10012_v6  ;;  %993 = vst [vmem:[#allocation2 + $0x250] sm:$0x3] %v10012_v6 }
  0x32   :  { %994 = vst [vmem:[#allocation2 + $0x258] sm:$0xff] %v10012_v6  ;;  %995 = vst [vmem:[#allocation2 + $0x260] sm:$0xff] %v10012_v6 }
  0x33   :  { %996 = vst [vmem:[#allocation2 + $0x268] sm:$0x3] %v10012_v6  ;;  %997 = vst [vmem:[#allocation2 + $0x270] sm:$0xff] %v10012_v6 }
  0x34   :  { %7444 = vmatmul.mubr.f32.gmra.mrb[8].mxu1 %v44_v33  ;;  %998 = vst [vmem:[#allocation2 + $0x278] sm:$0xff] %v10012_v6  ;;  %999 = vst [vmem:[#allocation2 + $0x280] sm:$0x3] %v10012_v6 }
  0x35   :  { %7446 = vmatprep.mubr.f32.mxu1 %v45_v34  ;;  %1000 = vst [vmem:[#allocation2 + $0x288] sm:$0xff] %v10012_v6  ;;  %1001 = vst [vmem:[#allocation2 + $0x290] sm:$0xff] %v10012_v6 }
  0x36   :  { %1002 = vst [vmem:[#allocation2 + $0x298] sm:$0x3] %v10012_v6  ;;  %1003 = vst [vmem:[#allocation2 + $0x2a0] sm:$0xff] %v10012_v6 }
  0x37   :  { %1004 = vst [vmem:[#allocation2 + $0x2a8] sm:$0xff] %v10012_v6  ;;  %1005 = vst [vmem:[#allocation2 + $0x2b0] sm:$0x3] %v10012_v6 }
  0x38   :  { %7447 = vmatmul.mubr.f32.gmra.mrb[10].mxu1 %v46_v35  ;;  %1006 = vst [vmem:[#allocation2 + $0x2b8] sm:$0xff] %v10012_v6  ;;  %1007 = vst [vmem:[#allocation2 + $0x2c0] sm:$0xff] %v10012_v6 }
  0x39   :  { %7449 = vmatprep.mubr.f32.mxu1 %v47_v36  ;;  %1008 = vst [vmem:[#allocation2 + $0x2c8] sm:$0x3] %v10012_v6  ;;  %1009 = vst [vmem:[#allocation2 + $0x2d0] sm:$0xff] %v10012_v6 }
  0x3a   :  { %1010 = vst [vmem:[#allocation2 + $0x2d8] sm:$0xff] %v10012_v6  ;;  %1011 = vst [vmem:[#allocation2 + $0x2e0] sm:$0x3] %v10012_v6 }
  0x3b   :  { %1012 = vst [vmem:[#allocation2 + $0x2e8] sm:$0xff] %v10012_v6  ;;  %1013 = vst [vmem:[#allocation2 + $0x2f0] sm:$0xff] %v10012_v6 }
  0x3c   :  { %7450 = vmatmul.mubr.f32.gmra.mrb[12].mxu1 %v48_v37  ;;  %1014 = vst [vmem:[#allocation2 + $0x2f8] sm:$0x3] %v10012_v6  ;;  %1015 = vst [vmem:[#allocation2 + $0x300] sm:$0xff] %v10012_v6 }
  0x3d   :  { %7452 = vmatprep.mubr.f32.mxu1 %v49_v38  ;;  %1016 = vst [vmem:[#allocation2 + $0x308] sm:$0xff] %v10012_v6  ;;  %1017 = vst [vmem:[#allocation2 + $0x310] sm:$0x3] %v10012_v6 }
  0x3e   :  { %1018 = vst [vmem:[#allocation2 + $0x318] sm:$0xff] %v10012_v6  ;;  %1019 = vst [vmem:[#allocation2 + $0x320] sm:$0xff] %v10012_v6 }
  0x3f   :  { %1020 = vst [vmem:[#allocation2 + $0x328] sm:$0x3] %v10012_v6  ;;  %1021 = vst [vmem:[#allocation2 + $0x330] sm:$0xff] %v10012_v6 }
  0x40   :  { %7453 = vmatmul.mubr.f32.gmra.mrb[14].mxu1 %v50_v39  ;;  %1022 = vst [vmem:[#allocation2 + $0x338] sm:$0xff] %v10012_v6  ;;  %1023 = vst [vmem:[#allocation2 + $0x340] sm:$0x3] %v10012_v6 }
  0x41   :  { %7455 = vmatprep.mubr.f32.mxu1 %v51_v40  ;;  %1024 = vst [vmem:[#allocation2 + $0x348] sm:$0xff] %v10012_v6  ;;  %1025 = vst [vmem:[#allocation2 + $0x350] sm:$0xff] %v10012_v6 }
  0x42   :  { %1026 = vst [vmem:[#allocation2 + $0x358] sm:$0x3] %v10012_v6 }
  0x44   :  { %7456 = vmatmul.mubr.f32.gmra.mrb[16].mxu1 %v52_v41 }
  0x45   :  { %7458 = vmatprep.mubr.f32.mxu1 %v53_v42 }
  0x48   :  { %7459 = vmatmul.mubr.f32.gmra.mrb[18].mxu1 %v54_v43 }
  0x49   :  { %7461 = vmatprep.mubr.f32.mxu1 %v55_v44 }
  0x4c   :  { %7462 = vmatmul.mubr.f32.gmra.mrb[20].mxu1 %v56_v45 }
  0x4d   :  { %7464 = vmatprep.mubr.f32.mxu1 %v57_v46 }
  0x50   :  { %7465 = vmatmul.mubr.f32.gmra.mrb[22].mxu1 %v58_v47 }
  0x51   :  { %7467 = vmatprep.mubr.f32.mxu1 %v59_v48 }
  0x54   :  { %7468 = vmatmul.mubr.f32.gmra.mrb[24].mxu1 %v60_v49 }
  0x55   :  { %7470 = vmatprep.mubr.f32.mxu1 %v61_v50 }
  0x58   :  { %7471 = vmatmul.mubr.f32.gmra.mrb[26].mxu1 %v62_v51 }
  0x59   :  { %7473 = vmatprep.mubr.f32.mxu1 %v63_v52 }
  0x5c   :  { %7474 = vmatmul.mubr.f32.gmra.mrb[28].mxu1 %v64_v53 }
  0x5d   :  { %7476 = vmatprep.mubr.f32.mxu1 %v65_v54 }
  0x60   :  { %7477 = vmatmul.mubr.f32.gmra.mrb[30].mxu1 %v66_v55 }
  0x61   :  { %7479 = vmatprep.mubr.f32.mxu1 %v67_v56 }
  0x64   :  { %7480 = vmatmul.mubr.f32.gmra.mrb[32].mxu1 %v68_v57 }
  0x65   :  { %7482 = vmatprep.mubr.f32.mxu1 %v69_v58 }
  0x68   :  { %7483 = vmatmul.mubr.f32.gmra.mrb[34].mxu1 %v70_v59 }
  0x69   :  { %7485 = vmatprep.mubr.f32.mxu1 %v71_v60 }
  0x6c   :  { %7486 = vmatmul.mubr.f32.gmra.mrb[36].mxu1 %v72_v61 }
  0x6d   :  { %7488 = vmatprep.mubr.f32.mxu1 %v73_v62 }
  0x70   :  { %7489 = vmatmul.mubr.f32.gmra.mrb[38].mxu1 %v74_v63 }
  0x71   :  { %7491 = vmatprep.mubr.f32.mxu1 %v75_v0 }
  0x74   :  { %7492 = vmatmul.mubr.f32.gmra.mrb[40].mxu1 %v76_v1 }
  0x75   :  { %7494 = vmatprep.mubr.f32.mxu1 %v77_v2 }
  0x78   :  { %7495 = vmatmul.mubr.f32.gmra.mrb[42].mxu1 %v78_v3 }
  0x79   :  { %7497 = vmatprep.mubr.f32.mxu1 %v79_v4 }
  0x7c   :  { %7498 = vmatmul.mubr.f32.gmra.mrb[44].mxu1 %v10255_v5 }
  0x7d   :  { %7500 = vmatprep.mubr.f32.mxu1 %v81_v7 }
  0x80   :  { %7501 = vmatmul.mubr.f32.gmra.mrb[46].mxu1 %v82_v8 }
  0x81   :  { %7503 = vmatprep.mubr.f32.mxu1 %v83_v9 }
  0x84   :  { %7504 = vmatmul.mubr.f32.gmra.mrb[48].mxu1 %v84_v10 }
  0x85   :  { %7506 = vmatprep.mubr.f32.mxu1 %v85_v11 }
  0x88   :  { %7507 = vmatmul.mubr.f32.gmra.mrb[50].mxu1 %v86_v12 }
  0x89   :  { %7509 = vmatprep.mubr.f32.mxu1 %v87_v13 }
  0x8c   :  { %7510 = vmatmul.mubr.f32.gmra.mrb[52].mxu1 %v88_v14 }
  0x8d   :  { %7512 = vmatprep.mubr.f32.mxu1 %v89_v15 }
  0x90   :  { %7513 = vmatmul.mubr.f32.gmra.mrb[54].mxu1 %v90_v16 }
  0x91   :  { %7515 = vmatprep.mubr.f32.mxu1 %v91_v17 }
  0x94   :  { %7516 = vmatmul.mubr.f32.gmra.mrb[56].mxu1 %v92_v18 }
  0x95   :  { %7518 = vmatprep.mubr.f32.mxu1 %v93_v19 }
  0x98   :  { %7519 = vmatmul.mubr.f32.gmra.mrb[58].mxu1 %v94_v20 }
  0x99   :  { %7521 = vmatprep.mubr.f32.mxu1 %v95_v21 }
  0x9c   :  { %7522 = vmatmul.mubr.f32.gmra.mrb[60].mxu1 %v96_v22 }
  0x9d   :  { %7524 = vmatprep.mubr.f32.mxu1 %v97_v23 }
  0xa0   :  { %7525 = vmatmul.mubr.f32.gmra.mrb[62].mxu1 %v98_v24 }
  0xa1   :  { %630 = vmatprep.mubr.f32.mxu1 %v14178_v25 }
  0xf7   :  { %v10421_v26 = vpop.f32.mrb[0].mxu1 }
  0xf8   :  { %v503_v27 = vmul.f32 %v10421_v26, %v10421_v26  ;;  %v10425_v28 = vpop.f32.mrb[1].mxu1 }
  0xf9   :  { %v502_v29 = vmul.f32 %v10425_v28, %v10425_v28  ;;  %v8841_v30 = vpack.c.bf16 %v10421_v26, %v10425_v28 }
  0xfb   :  { %v10431_v31 = vpop.f32.mrb[2].mxu1  ;;  %v8839_v32 = vpack.c.bf16 %v503_v27, %v502_v29 }
  0xfc   :  { %v505_v33 = vmul.f32 %v10431_v31, %v10431_v31  ;;  %v10435_v34 = vpop.f32.mrb[3].mxu1 }
  0xfd   :  { %v504_v35 = vmul.f32 %v10435_v34, %v10435_v34  ;;  %v8845_v36 = vpack.c.bf16 %v10431_v31, %v10435_v34  ;;  %8840 = vmatprep.subr.bf16.mxu1 %v8839_v32 }
  0xfe   :  { %8842 = vmatpush1.bf16.msra.mxu1 %v8841_v30 }
  0xff   :  { %v10441_v37 = vpop.f32.mrb[4].mxu1  ;;  %v8843_v38 = vpack.c.bf16 %v505_v33, %v504_v35 }
 0x100   :  { %v507_v39 = vmul.f32 %v10441_v37, %v10441_v37  ;;  %v10445_v40 = vpop.f32.mrb[5].mxu1 }
 0x101   :  { %v506_v41 = vmul.f32 %v10445_v40, %v10445_v40  ;;  %v8849_v42 = vpack.c.bf16 %v10441_v37, %v10445_v40  ;;  %8844 = vmatprep.subr.bf16.mxu1 %v8843_v38 }
 0x102   :  { %8846 = vmatpush1.bf16.msra.mxu1 %v8845_v36 }
 0x103   :  { %v10451_v43 = vpop.f32.mrb[6].mxu1  ;;  %v8847_v44 = vpack.c.bf16 %v507_v39, %v506_v41 }
 0x104   :  { %v509_v45 = vmul.f32 %v10451_v43, %v10451_v43  ;;  %v10455_v46 = vpop.f32.mrb[7].mxu1 }
 0x105   :  { %v508_v47 = vmul.f32 %v10455_v46, %v10455_v46  ;;  %v8853_v48 = vpack.c.bf16 %v10451_v43, %v10455_v46  ;;  %8848 = vmatprep.subr.bf16.mxu1 %v8847_v44 }
 0x106   :  { %8850 = vmatpush1.bf16.msra.mxu1 %v8849_v42 }
 0x107   :  { %v10461_v49 = vpop.f32.mrb[8].mxu1  ;;  %v8851_v50 = vpack.c.bf16 %v509_v45, %v508_v47 }
 0x108   :  { %v511_v51 = vmul.f32 %v10461_v49, %v10461_v49  ;;  %v10465_v52 = vpop.f32.mrb[9].mxu1 }
 0x109   :  { %v510_v53 = vmul.f32 %v10465_v52, %v10465_v52  ;;  %v8857_v54 = vpack.c.bf16 %v10461_v49, %v10465_v52  ;;  %8852 = vmatprep.subr.bf16.mxu1 %v8851_v50 }
 0x10a   :  { %8854 = vmatpush1.bf16.msra.mxu1 %v8853_v48 }
 0x10b   :  { %v10471_v55 = vpop.f32.mrb[10].mxu1  ;;  %v8855_v56 = vpack.c.bf16 %v511_v51, %v510_v53 }
 0x10c   :  { %v513_v57 = vmul.f32 %v10471_v55, %v10471_v55  ;;  %v10475_v58 = vpop.f32.mrb[11].mxu1 }
 0x10d   :  { %v512_v59 = vmul.f32 %v10475_v58, %v10475_v58  ;;  %v8861_v60 = vpack.c.bf16 %v10471_v55, %v10475_v58  ;;  %8856 = vmatprep.subr.bf16.mxu1 %v8855_v56 }
 0x10e   :  { %8858 = vmatpush1.bf16.msra.mxu1 %v8857_v54 }
 0x10f   :  { %v10481_v61 = vpop.f32.mrb[12].mxu1  ;;  %v8859_v62 = vpack.c.bf16 %v513_v57, %v512_v59 }
 0x110   :  { %v515_v63 = vmul.f32 %v10481_v61, %v10481_v61  ;;  %v10485_v0 = vpop.f32.mrb[13].mxu1 }
 0x111   :  { %v514_v1 = vmul.f32 %v10485_v0, %v10485_v0  ;;  %v8865_v2 = vpack.c.bf16 %v10481_v61, %v10485_v0  ;;  %8860 = vmatprep.subr.bf16.mxu1 %v8859_v62 }
 0x112   :  { %8862 = vmatpush1.bf16.msra.mxu1 %v8861_v60 }
 0x113   :  { %v10491_v3 = vpop.f32.mrb[14].mxu1  ;;  %v8863_v4 = vpack.c.bf16 %v515_v63, %v514_v1 }
 0x114   :  { %v517_v5 = vmul.f32 %v10491_v3, %v10491_v3  ;;  %v10495_v6 = vpop.f32.mrb[15].mxu1 }
 0x115   :  { %v516_v7 = vmul.f32 %v10495_v6, %v10495_v6  ;;  %v8869_v8 = vpack.c.bf16 %v10491_v3, %v10495_v6  ;;  %8864 = vmatprep.subr.bf16.mxu1 %v8863_v4 }
 0x116   :  { %8866 = vmatpush1.bf16.msra.mxu1 %v8865_v2 }
 0x117   :  { %v10501_v9 = vpop.f32.mrb[16].mxu1  ;;  %v8867_v10 = vpack.c.bf16 %v517_v5, %v516_v7 }
 0x118   :  { %v519_v11 = vmul.f32 %v10501_v9, %v10501_v9  ;;  %v10505_v12 = vpop.f32.mrb[17].mxu1 }
 0x119   :  { %v518_v13 = vmul.f32 %v10505_v12, %v10505_v12  ;;  %v8873_v14 = vpack.c.bf16 %v10501_v9, %v10505_v12  ;;  %8868 = vmatprep.subr.bf16.mxu1 %v8867_v10 }
 0x11a   :  { %8870 = vmatpush1.bf16.msra.mxu1 %v8869_v8 }
 0x11b   :  { %v10511_v15 = vpop.f32.mrb[18].mxu1  ;;  %v8871_v16 = vpack.c.bf16 %v519_v11, %v518_v13 }
 0x11c   :  { %v521_v17 = vmul.f32 %v10511_v15, %v10511_v15  ;;  %v10515_v18 = vpop.f32.mrb[19].mxu1 }
 0x11d   :  { %v520_v19 = vmul.f32 %v10515_v18, %v10515_v18  ;;  %v8877_v20 = vpack.c.bf16 %v10511_v15, %v10515_v18  ;;  %8872 = vmatprep.subr.bf16.mxu1 %v8871_v16 }
 0x11e   :  { %8874 = vmatpush1.bf16.msra.mxu1 %v8873_v14 }
 0x11f   :  { %v10521_v21 = vpop.f32.mrb[20].mxu1  ;;  %v8875_v22 = vpack.c.bf16 %v521_v17, %v520_v19 }
 0x120   :  { %v523_v23 = vmul.f32 %v10521_v21, %v10521_v21  ;;  %v10525_v24 = vpop.f32.mrb[21].mxu1 }
 0x121   :  { %v522_v27 = vmul.f32 %v10525_v24, %v10525_v24  ;;  %v8881_v29 = vpack.c.bf16 %v10521_v21, %v10525_v24  ;;  %8876 = vmatprep.subr.bf16.mxu1 %v8875_v22 }
 0x122   :  { %8878 = vmatpush1.bf16.msra.mxu1 %v8877_v20 }
 0x123   :  { %v10531_v30 = vpop.f32.mrb[22].mxu1  ;;  %v8879_v32 = vpack.c.bf16 %v523_v23, %v522_v27 }
 0x124   :  { %v525_v33 = vmul.f32 %v10531_v30, %v10531_v30  ;;  %v10535_v35 = vpop.f32.mrb[23].mxu1 }
 0x125   :  { %v524_v36 = vmul.f32 %v10535_v35, %v10535_v35  ;;  %v8885_v38 = vpack.c.bf16 %v10531_v30, %v10535_v35  ;;  %8880 = vmatprep.subr.bf16.mxu1 %v8879_v32 }
 0x126   :  { %8882 = vmatpush1.bf16.msra.mxu1 %v8881_v29 }
 0x127   :  { %v10541_v39 = vpop.f32.mrb[24].mxu1  ;;  %v8883_v41 = vpack.c.bf16 %v525_v33, %v524_v36 }
 0x128   :  { %v527_v42 = vmul.f32 %v10541_v39, %v10541_v39  ;;  %v10545_v44 = vpop.f32.mrb[25].mxu1 }
 0x129   :  { %v526_v45 = vmul.f32 %v10545_v44, %v10545_v44  ;;  %v8889_v47 = vpack.c.bf16 %v10541_v39, %v10545_v44  ;;  %8884 = vmatprep.subr.bf16.mxu1 %v8883_v41 }
 0x12a   :  { %8886 = vmatpush1.bf16.msra.mxu1 %v8885_v38 }
 0x12b   :  { %v10551_v48 = vpop.f32.mrb[26].mxu1  ;;  %v8887_v50 = vpack.c.bf16 %v527_v42, %v526_v45 }
 0x12c   :  { %v529_v51 = vmul.f32 %v10551_v48, %v10551_v48  ;;  %v10555_v53 = vpop.f32.mrb[27].mxu1 }
 0x12d   :  { %v528_v54 = vmul.f32 %v10555_v53, %v10555_v53  ;;  %v8893_v56 = vpack.c.bf16 %v10551_v48, %v10555_v53  ;;  %8888 = vmatprep.subr.bf16.mxu1 %v8887_v50 }
 0x12e   :  { %8890 = vmatpush1.bf16.msra.mxu1 %v8889_v47 }
 0x12f   :  { %v10561_v57 = vpop.f32.mrb[28].mxu1  ;;  %v8891_v59 = vpack.c.bf16 %v529_v51, %v528_v54 }
 0x130   :  { %v531_v60 = vmul.f32 %v10561_v57, %v10561_v57  ;;  %v10565_v62 = vpop.f32.mrb[29].mxu1 }
 0x131   :  { %v530_v63 = vmul.f32 %v10565_v62, %v10565_v62  ;;  %v8897_v1 = vpack.c.bf16 %v10561_v57, %v10565_v62  ;;  %8892 = vmatprep.subr.bf16.mxu1 %v8891_v59 }
 0x132   :  { %8894 = vmatpush1.bf16.msra.mxu1 %v8893_v56 }
 0x133   :  { %v10571_v2 = vpop.f32.mrb[30].mxu1  ;;  %v8895_v4 = vpack.c.bf16 %v531_v60, %v530_v63 }
 0x134   :  { %v533_v5 = vmul.f32 %v10571_v2, %v10571_v2  ;;  %v10575_v7 = vpop.f32.mrb[31].mxu1 }
 0x135   :  { %v532_v8 = vmul.f32 %v10575_v7, %v10575_v7  ;;  %v8901_v10 = vpack.c.bf16 %v10571_v2, %v10575_v7  ;;  %8896 = vmatprep.subr.bf16.mxu1 %v8895_v4 }
 0x136   :  { %8898 = vmatpush1.bf16.msra.mxu1 %v8897_v1 }
 0x137   :  { %v10581_v11 = vpop.f32.mrb[32].mxu1  ;;  %v8899_v13 = vpack.c.bf16 %v533_v5, %v532_v8 }
 0x138   :  { %v535_v14 = vmul.f32 %v10581_v11, %v10581_v11  ;;  %v10585_v16 = vpop.f32.mrb[33].mxu1 }
 0x139   :  { %v534_v17 = vmul.f32 %v10585_v16, %v10585_v16  ;;  %v8905_v19 = vpack.c.bf16 %v10581_v11, %v10585_v16  ;;  %8900 = vmatprep.subr.bf16.mxu1 %v8899_v13 }
 0x13a   :  { %8902 = vmatpush1.bf16.msra.mxu1 %v8901_v10 }
 0x13b   :  { %v10591_v20 = vpop.f32.mrb[34].mxu1  ;;  %v8903_v22 = vpack.c.bf16 %v535_v14, %v534_v17 }
 0x13c   :  { %v537_v23 = vmul.f32 %v10591_v20, %v10591_v20  ;;  %v10595_v27 = vpop.f32.mrb[35].mxu1 }
 0x13d   :  { %v536_v29 = vmul.f32 %v10595_v27, %v10595_v27  ;;  %v8909_v32 = vpack.c.bf16 %v10591_v20, %v10595_v27  ;;  %8904 = vmatprep.subr.bf16.mxu1 %v8903_v22  ;;  %631 = vmatmul.mubr.f32.vlgmr.msra.gmra.mrb[64].mxu1 %v14178_v25 }
 0x13e   :  { %8906 = vmatpush1.bf16.msra.mxu1 %v8905_v19  ;;  %701 = vmatprep.mubr.f32.mxu1 %v14178_v25 }
 0x13f   :  { %v10603_v33 = vpop.f32.mrb[36].mxu1  ;;  %v8907_v36 = vpack.c.bf16 %v537_v23, %v536_v29 }
 0x140   :  { %v539_v38 = vmul.f32 %v10603_v33, %v10603_v33  ;;  %v10607_v41 = vpop.f32.mrb[37].mxu1 }
 0x141   :  { %v538_v42 = vmul.f32 %v10607_v41, %v10607_v41  ;;  %v8913_v45 = vpack.c.bf16 %v10603_v33, %v10607_v41  ;;  %8908 = vmatprep.subr.bf16.mxu1 %v8907_v36 }
 0x142   :  { %8910 = vmatpush1.bf16.msra.mxu1 %v8909_v32 }
 0x143   :  { %v10613_v47 = vpop.f32.mrb[38].mxu1  ;;  %v8911_v50 = vpack.c.bf16 %v539_v38, %v538_v42 }
 0x144   :  { %v541_v51 = vmul.f32 %v10613_v47, %v10613_v47  ;;  %v10617_v54 = vpop.f32.mrb[39].mxu1 }
 0x145   :  { %v540_v56 = vmul.f32 %v10617_v54, %v10617_v54  ;;  %v8917_v59 = vpack.c.bf16 %v10613_v47, %v10617_v54  ;;  %8912 = vmatprep.subr.bf16.mxu1 %v8911_v50 }
 0x146   :  { %8914 = vmatpush1.bf16.msra.mxu1 %v8913_v45 }
 0x147   :  { %v10623_v60 = vpop.f32.mrb[40].mxu1  ;;  %v8915_v63 = vpack.c.bf16 %v541_v51, %v540_v56 }
 0x148   :  { %v543_v1 = vmul.f32 %v10623_v60, %v10623_v60  ;;  %v10627_v4 = vpop.f32.mrb[41].mxu1 }
 0x149   :  { %v542_v5 = vmul.f32 %v10627_v4, %v10627_v4  ;;  %v8921_v8 = vpack.c.bf16 %v10623_v60, %v10627_v4  ;;  %8916 = vmatprep.subr.bf16.mxu1 %v8915_v63 }
 0x14a   :  { %8918 = vmatpush1.bf16.msra.mxu1 %v8917_v59 }
 0x14b   :  { %v10633_v10 = vpop.f32.mrb[42].mxu1  ;;  %v8919_v13 = vpack.c.bf16 %v543_v1, %v542_v5 }
 0x14c   :  { %v545_v14 = vmul.f32 %v10633_v10, %v10633_v10  ;;  %v10637_v17 = vpop.f32.mrb[43].mxu1 }
 0x14d   :  { %v544_v19 = vmul.f32 %v10637_v17, %v10637_v17  ;;  %v8925_v22 = vpack.c.bf16 %v10633_v10, %v10637_v17  ;;  %8920 = vmatprep.subr.bf16.mxu1 %v8919_v13 }
 0x14e   :  { %8922 = vmatpush1.bf16.msra.mxu1 %v8921_v8 }
 0x14f   :  { %v10643_v23 = vpop.f32.mrb[44].mxu1  ;;  %v8923_v29 = vpack.c.bf16 %v545_v14, %v544_v19 }
 0x150   :  { %v547_v32 = vmul.f32 %v10643_v23, %v10643_v23  ;;  %v10647_v36 = vpop.f32.mrb[45].mxu1 }
 0x151   :  { %v546_v38 = vmul.f32 %v10647_v36, %v10647_v36  ;;  %v8929_v42 = vpack.c.bf16 %v10643_v23, %v10647_v36  ;;  %8924 = vmatprep.subr.bf16.mxu1 %v8923_v29 }
 0x152   :  { %8926 = vmatpush1.bf16.msra.mxu1 %v8925_v22 }
 0x153   :  { %v10653_v45 = vpop.f32.mrb[46].mxu1  ;;  %v8927_v50 = vpack.c.bf16 %v547_v32, %v546_v38 }
 0x154   :  { %v549_v51 = vmul.f32 %v10653_v45, %v10653_v45  ;;  %v10657_v56 = vpop.f32.mrb[47].mxu1 }
 0x155   :  { %v548_v59 = vmul.f32 %v10657_v56, %v10657_v56  ;;  %v8933_v63 = vpack.c.bf16 %v10653_v45, %v10657_v56  ;;  %8928 = vmatprep.subr.bf16.mxu1 %v8927_v50 }
 0x156   :  { %8930 = vmatpush1.bf16.msra.mxu1 %v8929_v42 }
 0x157   :  { %v10663_v1 = vpop.f32.mrb[48].mxu1  ;;  %v8931_v5 = vpack.c.bf16 %v549_v51, %v548_v59 }
 0x158   :  { %14345 = vst [vmem:[#allocation3_spill] sm:$0xff] %v10663_v1  ;;  %v551_v8 = vmul.f32 %v10663_v1, %v10663_v1  ;;  %v10667_v13 = vpop.f32.mrb[49].mxu1 }
 0x159   :  { %14346 = vst [vmem:[#allocation4_spill] sm:$0xff] %v10667_v13  ;;  %v550_v14 = vmul.f32 %v10667_v13, %v10667_v13  ;;  %v8937_v19 = vpack.c.bf16 %v10663_v1, %v10667_v13  ;;  %8932 = vmatprep.subr.bf16.mxu1 %v8931_v5 }
 0x15a   :  { %8934 = vmatpush1.bf16.msra.mxu1 %v8933_v63 }
 0x15b   :  { %v10673_v22 = vpop.f32.mrb[50].mxu1  ;;  %v8935_v29 = vpack.c.bf16 %v551_v8, %v550_v14 }
 0x15c   :  { %14347 = vst [vmem:[#allocation5_spill] sm:$0xff] %v10673_v22  ;;  %v553_v32 = vmul.f32 %v10673_v22, %v10673_v22  ;;  %v10677_v38 = vpop.f32.mrb[51].mxu1 }
 0x15d   :  { %14348 = vst [vmem:[#allocation6_spill] sm:$0xff] %v10677_v38  ;;  %v552_v42 = vmul.f32 %v10677_v38, %v10677_v38  ;;  %v8941_v50 = vpack.c.bf16 %v10673_v22, %v10677_v38  ;;  %8936 = vmatprep.subr.bf16.mxu1 %v8935_v29 }
 0x15e   :  { %8938 = vmatpush1.bf16.msra.mxu1 %v8937_v19 }
 0x15f   :  { %v10683_v51 = vpop.f32.mrb[52].mxu1  ;;  %v8939_v59 = vpack.c.bf16 %v553_v32, %v552_v42 }
 0x160   :  { %14349 = vst [vmem:[#allocation7_spill] sm:$0xff] %v10683_v51  ;;  %v555_v63 = vmul.f32 %v10683_v51, %v10683_v51  ;;  %v10687_v5 = vpop.f32.mrb[53].mxu1 }
 0x161   :  { %14350 = vst [vmem:[#allocation8_spill] sm:$0xff] %v10687_v5  ;;  %v554_v8 = vmul.f32 %v10687_v5, %v10687_v5  ;;  %v8945_v14 = vpack.c.bf16 %v10683_v51, %v10687_v5  ;;  %8940 = vmatprep.subr.bf16.mxu1 %v8939_v59 }
 0x162   :  { %8942 = vmatpush1.bf16.msra.mxu1 %v8941_v50 }
 0x163   :  { %v10693_v25 = vpop.f32.mrb[54].mxu1  ;;  %v8943_v29 = vpack.c.bf16 %v555_v63, %v554_v8 }
 0x164   :  { %14351 = vst [vmem:[#allocation9_spill] sm:$0xff] %v10693_v25  ;;  %v557_v19 = vmul.f32 %v10693_v25, %v10693_v25  ;;  %v10697_v32 = vpop.f32.mrb[55].mxu1 }
 0x165   :  { %14352 = vst [vmem:[#allocation10_spill] sm:$0xff] %v10697_v32  ;;  %v556_v42 = vmul.f32 %v10697_v32, %v10697_v32  ;;  %v8949_v22 = vpack.c.bf16 %v10693_v25, %v10697_v32  ;;  %8944 = vmatprep.subr.bf16.mxu1 %v8943_v29 }
 0x166   :  { %8946 = vmatpush1.bf16.msra.mxu1 %v8945_v14 }
 0x167   :  { %v10703_v38 = vpop.f32.mrb[56].mxu1  ;;  %v8947_v59 = vpack.c.bf16 %v557_v19, %v556_v42 }
 0x168   :  { %14353 = vst [vmem:[#allocation11_spill] sm:$0xff] %v10703_v38  ;;  %v559_v50 = vmul.f32 %v10703_v38, %v10703_v38  ;;  %v10707_v63 = vpop.f32.mrb[57].mxu1 }
 0x169   :  { %14354 = vst [vmem:[#allocation12_spill] sm:$0xff] %v10707_v63  ;;  %v558_v8 = vmul.f32 %v10707_v63, %v10707_v63  ;;  %v8953_v51 = vpack.c.bf16 %v10703_v38, %v10707_v63  ;;  %8948 = vmatprep.subr.bf16.mxu1 %v8947_v59 }
 0x16a   :  { %8950 = vmatpush1.bf16.msra.mxu1 %v8949_v22 }
 0x16b   :  { %v10713_v5 = vpop.f32.mrb[58].mxu1  ;;  %v8951_v29 = vpack.c.bf16 %v559_v50, %v558_v8 }
 0x16c   :  { %14355 = vst [vmem:[#allocation13_spill] sm:$0xff] %v10713_v5  ;;  %v561_v14 = vmul.f32 %v10713_v5, %v10713_v5  ;;  %v10717_v19 = vpop.f32.mrb[59].mxu1 }
 0x16d   :  { %14356 = vst [vmem:[#allocation14_spill] sm:$0xff] %v10717_v19  ;;  %v560_v42 = vmul.f32 %v10717_v19, %v10717_v19  ;;  %v8957_v25 = vpack.c.bf16 %v10713_v5, %v10717_v19  ;;  %8952 = vmatprep.subr.bf16.mxu1 %v8951_v29 }
 0x16e   :  { %8954 = vmatpush1.bf16.msra.mxu1 %v8953_v51 }
 0x16f   :  { %v10723_v32 = vpop.f32.mrb[60].mxu1  ;;  %v8955_v59 = vpack.c.bf16 %v561_v14, %v560_v42 }
 0x170   :  { %14357 = vst [vmem:[#allocation15_spill] sm:$0xff] %v10723_v32  ;;  %v563_v22 = vmul.f32 %v10723_v32, %v10723_v32  ;;  %v10727_v50 = vpop.f32.mrb[61].mxu1 }
 0x171   :  { %14358 = vst [vmem:[#allocation16_spill] sm:$0xff] %v10727_v50  ;;  %v562_v8 = vmul.f32 %v10727_v50, %v10727_v50  ;;  %v8961_v38 = vpack.c.bf16 %v10723_v32, %v10727_v50  ;;  %8956 = vmatprep.subr.bf16.mxu1 %v8955_v59  ;;  %v6391_v59 = vld [vmem:[%s14169_s3 + $0x180] sm:$0xff] }
 0x172   :  { %8958 = vmatpush1.bf16.msra.mxu1 %v8957_v25  ;;  %v14361_v25 = vmov 1.0  }
 0x173   :  { %v10733_v63 = vpop.f32.mrb[62].mxu1  ;;  %v8959_v29 = vpack.c.bf16 %v563_v22, %v562_v8  ;;  %v6392_v22 = vld [vmem:[%s14169_s3 + $0x188] sm:$0xff]  ;;  %v6407_v8 = vld [vmem:[%s14169_s3 + $0x300] sm:$0xff] }
 0x174   :  { %14359 = vst [vmem:[#allocation17_spill] sm:$0xff] %v10733_v63  ;;  %v565_v51 = vmul.f32 %v10733_v63, %v10733_v63  ;;  %v10737_v14 = vpop.f32.mrb[63].mxu1 }
 0x175   :  { %14360 = vst [vmem:[#allocation18_spill] sm:$0xff] %v10737_v14  ;;  %v564_v42 = vmul.f32 %v10737_v14, %v10737_v14  ;;  %v8965_v5 = vpack.c.bf16 %v10733_v63, %v10737_v14  ;;  %8960 = vmatprep.subr.bf16.mxu1 %v8959_v29  ;;  %v8967_v63 = vpack.c.bf16 %v6392_v22, %v6391_v59  ;;  %v6394_v29 = vld [vmem:[%s14169_s3 + $0x198] sm:$0xff]  ;;  %v6395_v22 = vld [vmem:[%s14169_s3 + $0x1a0] sm:$0xff] }
 0x176   :  { %8962 = vmatpush1.bf16.msra.mxu1 %v8961_v38  ;;  %v6408_v38 = vld [vmem:[%s14169_s3 + $0x308] sm:$0xff]  ;;  %v6410_v59 = vld [vmem:[%s14169_s3 + $0x318] sm:$0xff] }
 0x177   :  { %v8963_v19 = vpack.c.bf16 %v565_v51, %v564_v42  ;;  %v6409_v51 = vld [vmem:[%s14169_s3 + $0x310] sm:$0xff] }
 0x179   :  { %8964 = vmatprep.subr.bf16.mxu1 %v8963_v19  ;;  %v6393_v19 = vld [vmem:[%s14169_s3 + $0x190] sm:$0xff] }
 0x17a   :  { %8966 = vmatpush1.bf16.msra.mxu1 %v8965_v5  ;;  %v10756_v5 = vpack.c.bf16 %v6408_v38, %v6407_v8  ;;  %v8971_v42 = vpack.c.bf16 %v6394_v29, %v6393_v19  ;;  %v6396_v8 = vld [vmem:[%s14169_s3 + $0x1a8] sm:$0xff]  ;;  %v6411_v38 = vld [vmem:[%s14169_s3 + $0x320] sm:$0xff] }
 0x17b   :  { %8968 = vmatprep.subr.bf16.mxu1 %v8967_v63  ;;  %v8975_v19 = vpack.c.bf16 %v6396_v8, %v6395_v22  ;;  %v6412_v29 = vld [vmem:[%s14169_s3 + $0x328] sm:$0xff]  ;;  %v6413_v22 = vld [vmem:[%s14169_s3 + $0x330] sm:$0xff] }
 0x17c   :  { %14362 = vst [vmem:[#allocation19_spill] sm:$0xff] %v10756_v5  ;;  %9032 = vmatprep.subr.bf16.mxu0 %v10756_v5 }
 0x17d   :  { %702 = vmatmul.mubr.f32.vlgmr.msra.gmra.mrb[64].mxu1 %v14361_v25  ;;  %9034 = vmatpush3.bf16.msra.mxu0 %v10756_v5  ;;  %v6400_v25 = vld [vmem:[%s14169_s3 + $0x1c8] sm:$0xff] }
 0x17e   :  { %8970 = vmatpush3.bf16.msra.mxu1 %v8967_v63  ;;  %v10772_v63 = vpack.c.bf16 %v6410_v59, %v6409_v51  ;;  %v10788_v51 = vpack.c.bf16 %v6412_v29, %v6411_v38  ;;  %v6398_v59 = vld [vmem:[%s14169_s3 + $0x1b8] sm:$0xff]  ;;  %v6399_v29 = vld [vmem:[%s14169_s3 + $0x1c0] sm:$0xff] }
 0x17f   :  { %8972 = vmatprep.subr.bf16.mxu1 %v8971_v42  ;;  %v6414_v38 = vld [vmem:[%s14169_s3 + $0x338] sm:$0xff] }
 0x180   :  { %14363 = vst [vmem:[#allocation20_spill] sm:$0xff] %v10772_v63  ;;  %9036 = vmatprep.subr.bf16.mxu0 %v10772_v63  ;;  %14364 = vst [vmem:[#allocation21_spill] sm:$0xff] %v10788_v51 }
 0x181   :  { %9038 = vmatpush3.bf16.msra.mxu0 %v10772_v63  ;;  %v6421_v63 = vld [vmem:[%s14169_s3 + $0x370] sm:$0xff] }
 0x182   :  { %8974 = vmatpush3.bf16.msra.mxu1 %v8971_v42  ;;  %9040 = vmatprep.subr.bf16.mxu0 %v10788_v51  ;;  %v6397_v42 = vld [vmem:[%s14169_s3 + $0x1b0] sm:$0xff] }
 0x183   :  { %8976 = vmatprep.subr.bf16.mxu1 %v8975_v19  ;;  %v8979_v8 = vpack.c.bf16 %v6398_v59, %v6397_v42  ;;  %v6415_v42 = vld [vmem:[%s14169_s3 + $0x340] sm:$0xff]  ;;  %v8983_v59 = vpack.c.bf16 %v6400_v25, %v6399_v29  ;;  %v6417_v25 = vld [vmem:[%s14169_s3 + $0x350] sm:$0xff] }
 0x185   :  { %9042 = vmatpush3.bf16.msra.mxu0 %v10788_v51  ;;  %v6402_v51 = vld [vmem:[%s14169_s3 + $0x1d8] sm:$0xff] }
 0x186   :  { %8978 = vmatpush3.bf16.msra.mxu1 %v8975_v19  ;;  %v10804_v19 = vpack.c.bf16 %v6414_v38, %v6413_v22  ;;  %v6416_v22 = vld [vmem:[%s14169_s3 + $0x348] sm:$0xff]  ;;  %v6401_v38 = vld [vmem:[%s14169_s3 + $0x1d0] sm:$0xff] }
 0x187   :  { %8980 = vmatprep.subr.bf16.mxu1 %v8979_v8  ;;  %v8987_v29 = vpack.c.bf16 %v6402_v51, %v6401_v38  ;;  %v6419_v51 = vld [vmem:[%s14169_s3 + $0x360] sm:$0xff] }
 0x188   :  { %14365 = vst [vmem:[#allocation22_spill] sm:$0xff] %v10804_v19  ;;  %9044 = vmatprep.subr.bf16.mxu0 %v10804_v19 }
 0x189   :  { %9046 = vmatpush3.bf16.msra.mxu0 %v10804_v19  ;;  %v6404_v19 = vld [vmem:[%s14169_s3 + $0x1e8] sm:$0xff] }
 0x18a   :  { %8982 = vmatpush3.bf16.msra.mxu1 %v8979_v8  ;;  %v10820_v8 = vpack.c.bf16 %v6416_v22, %v6415_v42  ;;  %v6418_v42 = vld [vmem:[%s14169_s3 + $0x358] sm:$0xff]  ;;  %v6403_v22 = vld [vmem:[%s14169_s3 + $0x1e0] sm:$0xff] }
 0x18b   :  { %8984 = vmatprep.subr.bf16.mxu1 %v8983_v59  ;;  %v8991_v38 = vpack.c.bf16 %v6404_v19, %v6403_v22  ;;  %v6422_v22 = vld [vmem:[%s14169_s3 + $0x378] sm:$0xff] }
 0x18c   :  { %14366 = vst [vmem:[#allocation23_spill] sm:$0xff] %v10820_v8  ;;  %9048 = vmatprep.subr.bf16.mxu0 %v10820_v8 }
 0x18d   :  { %9050 = vmatpush3.bf16.msra.mxu0 %v10820_v8  ;;  %v6406_v8 = vld [vmem:[%s14169_s3 + $0x1f8] sm:$0xff] }
 0x18e   :  { %8986 = vmatpush3.bf16.msra.mxu1 %v8983_v59  ;;  %v10836_v59 = vpack.c.bf16 %v6418_v42, %v6417_v25  ;;  %v6420_v25 = vld [vmem:[%s14169_s3 + $0x368] sm:$0xff]  ;;  %v6405_v42 = vld [vmem:[%s14169_s3 + $0x1f0] sm:$0xff] }
 0x18f   :  { %8988 = vmatprep.subr.bf16.mxu1 %v8987_v29  ;;  %v8995_v19 = vpack.c.bf16 %v6406_v8, %v6405_v42 }
 0x190   :  { %14367 = vst [vmem:[#allocation24_spill] sm:$0xff] %v10836_v59  ;;  %9052 = vmatprep.subr.bf16.mxu0 %v10836_v59 }
 0x191   :  { %9054 = vmatpush3.bf16.msra.mxu0 %v10836_v59  ;;  %v10873_v59 = vpack.c.bf16 %v6422_v22, %v6421_v63  ;;  %v717_v22 = vlaneseq }
 0x192   :  { %8990 = vmatpush3.bf16.msra.mxu1 %v8987_v29  ;;  %v10852_v29 = vpack.c.bf16 %v6420_v25, %v6419_v51  ;;  %v6423_v51 = vld [vmem:[%s14169_s3 + $0x80] sm:$0xff]  ;;  %v6424_v25 = vld [vmem:[%s14169_s3 + $0x88] sm:$0xff] }
 0x193   :  { %8992 = vmatprep.subr.bf16.mxu1 %v8991_v38  ;;  %14369 = vst [vmem:[#allocation26_spill] sm:$0xff] %v10873_v59  ;;  %v10877_v8 = vpack.c.bf16 %v6424_v25, %v6423_v51  ;;  %v500_v51 = vld [vmem:[%s14170_s5] sm:$0x1] }
 0x194   :  { %14368 = vst [vmem:[#allocation25_spill] sm:$0xff] %v10852_v29  ;;  %9056 = vmatprep.subr.bf16.mxu0 %v10852_v29 }
 0x195   :  { %9058 = vmatpush3.bf16.msra.mxu0 %v10852_v29  ;;  %14370 = vst [vmem:[#allocation27_spill] sm:$0xff] %v10877_v8  ;;  %v718_v29 = vshrl.u32 %v717_v22, 7 }
 0x196   :  { %8994 = vmatpush3.bf16.msra.mxu1 %v8991_v38  ;;  %9060 = vmatprep.subr.bf16.mxu0 %v10873_v59 }
 0x197   :  { %8996 = vmatprep.subr.bf16.mxu1 %v8995_v19  ;;  %v10884_v25 = vsub.s32 0, %v718_v29  ;;  %v501_v29 = vld [vmem:[%s14171_s6] sm:$0x1] }
 0x199   :  { %9062 = vmatpush3.bf16.msra.mxu0 %v10873_v59  ;;  %14371 = vst [vmem:[#allocation28_spill] sm:$0xff] %v10884_v25  ;;  %v6425_v59 = vld [vmem:[%s14169_s3 + $0x90] sm:$0xff] }
 0x19a   :  { %8998 = vmatpush3.bf16.msra.mxu1 %v8995_v19  ;;  %9064 = vmatprep.subr.bf16.mxu0 %v10877_v8 }
 0x250   :  { %v703_v42 = vpop.f32.mrb[64].mxu1 }
 0x251   :  { %v708_v5 = vmul.f32 0.001953125, %v703_v42  ;;  %v705_v14 = vpop.f32.mrb[65].mxu1 }
 0x252   :  { %v709_v32 = vmul.f32 0.001953125, %v705_v14  ;;  %v6428_v14 = vld [vmem:[%s14169_s3 + $0xa8] sm:$0xff] }
 0x253   :  { %v710_v50 = vmul.f32 %v708_v5, %v708_v5 }
 0x255   :  { %v711_v38 = vsub.f32 %v709_v32, %v710_v50  ;;  %v6426_v32 = vld [vmem:[%s14169_s3 + $0x98] sm:$0xff]  ;;  %v6427_v50 = vld [vmem:[%s14169_s3 + $0xa0] sm:$0xff] }
 0x256   :  { %v10904_v22 = vpack.c.bf16 %v6426_v32, %v6425_v59  ;;  %v14374_v32 = vld [vmem:[#allocation4_spill] sm:$0xff] }
 0x257   :  { %v712_v63 = vadd.f32 1e-05, %v711_v38 }
 0x258   :  { %14372 = vst [vmem:[#allocation29_spill] sm:$0xff] %v10904_v22  ;;  %v14387_v22 = vld [vmem:[#allocation12_spill] sm:$0xff] }
 0x259   :  { %9949 = vrsqrt.f32 %v712_v63 }
 0x263   :  { %v9950_v19 = vpop.eup %9949 }
 0x264   :  { %v714_v42 = vmul.f32 %v9950_v19, %v500_v51  ;;  %v10906_v51 = vpack.c.bf16 %v6428_v14, %v6427_v50  ;;  %v14375_v50 = vld [vmem:[#allocation3_spill] sm:$0xff]  ;;  %v14376_v14 = vld [vmem:[#allocation6_spill] sm:$0xff] }
 0x266   :  { %v715_v38 = vmul.f32 %v714_v42, %v708_v5  ;;  %v10902_v63 = vrot.slane %v714_v42, %v10884_v25  ;;  %14373 = vst [vmem:[#allocation30_spill] sm:$0xff] %v10906_v51  ;;  %v14385_v51 = vld [vmem:[#allocation9_spill] sm:$0xff] }
 0x268   :  { %v716_v19 = vsub.f32 %v501_v29, %v715_v38  ;;  %v10910_v8 = vmul.f32 %v10902_v63, %v10425_v28  ;;  %v10914_v1 = vmul.f32 %v10421_v26, %v10902_v63  ;;  %v10918_v13 = vmul.f32 %v10902_v63, %v10435_v34  ;;  %v14377_v29 = vld [vmem:[#allocation5_spill] sm:$0xff]  ;;  %v14379_v38 = vld [vmem:[#allocation8_spill] sm:$0xff] }
 0x269   :  { %v10922_v5 = vmul.f32 %v10431_v31, %v10902_v63  ;;  %v10926_v59 = vmul.f32 %v10902_v63, %v10445_v40  ;;  %v10930_v28 = vmul.f32 %v10441_v37, %v10902_v63  ;;  %v10934_v26 = vmul.f32 %v10902_v63, %v10455_v46 }
 0x26a   :  { %v10937_v42 = vrot.slane %v716_v19, %v10884_v25  ;;  %v10941_v34 = vmul.f32 %v10451_v43, %v10902_v63  ;;  %v10945_v31 = vmul.f32 %v10902_v63, %v10465_v52  ;;  %v10949_v40 = vmul.f32 %v10461_v49, %v10902_v63  ;;  %v14381_v19 = vld [vmem:[#allocation7_spill] sm:$0xff]  ;;  %v14383_v25 = vld [vmem:[#allocation10_spill] sm:$0xff] }
 0x26b   :  { %v10953_v37 = vmul.f32 %v10902_v63, %v10475_v58  ;;  %v10957_v46 = vmul.f32 %v10471_v55, %v10902_v63  ;;  %v10961_v43 = vmul.f32 %v10902_v63, %v10485_v0  ;;  %v10965_v52 = vmul.f32 %v10481_v61, %v10902_v63 }
 0x26c   :  { %v10969_v49 = vmul.f32 %v10902_v63, %v10495_v6  ;;  %v10973_v58 = vmul.f32 %v10491_v3, %v10902_v63  ;;  %v10977_v55 = vmul.f32 %v10902_v63, %v10505_v12  ;;  %v10981_v0 = vmul.f32 %v10501_v9, %v10902_v63 }
 0x26d   :  { %v10985_v61 = vmul.f32 %v10902_v63, %v10515_v18  ;;  %v10989_v6 = vmul.f32 %v10511_v15, %v10902_v63  ;;  %v10993_v3 = vmul.f32 %v10902_v63, %v10525_v24  ;;  %v10997_v12 = vmul.f32 %v10521_v21, %v10902_v63 }
 0x26e   :  { %v11001_v9 = vmul.f32 %v10902_v63, %v10535_v35  ;;  %v11005_v18 = vmul.f32 %v10531_v30, %v10902_v63  ;;  %v11009_v15 = vmul.f32 %v10902_v63, %v10545_v44  ;;  %v11013_v24 = vmul.f32 %v10541_v39, %v10902_v63 }
 0x26f   :  { %v11017_v21 = vmul.f32 %v10902_v63, %v10555_v53  ;;  %v11021_v35 = vmul.f32 %v10551_v48, %v10902_v63  ;;  %v11025_v30 = vmul.f32 %v10902_v63, %v10565_v62  ;;  %v11029_v44 = vmul.f32 %v10561_v57, %v10902_v63 }
 0x270   :  { %v11033_v39 = vmul.f32 %v10902_v63, %v10575_v7  ;;  %v11037_v53 = vmul.f32 %v10571_v2, %v10902_v63  ;;  %v11041_v48 = vmul.f32 %v10902_v63, %v10585_v16  ;;  %v11045_v62 = vmul.f32 %v10581_v11, %v10902_v63 }
 0x271   :  { %v11049_v57 = vmul.f32 %v10902_v63, %v10595_v27  ;;  %v11053_v7 = vmul.f32 %v10591_v20, %v10902_v63  ;;  %v11057_v2 = vmul.f32 %v10902_v63, %v10607_v41  ;;  %v11061_v16 = vmul.f32 %v10603_v33, %v10902_v63 }
 0x272   :  { %v11065_v11 = vmul.f32 %v10902_v63, %v10617_v54  ;;  %v11069_v27 = vmul.f32 %v10613_v47, %v10902_v63  ;;  %v11073_v20 = vmul.f32 %v10902_v63, %v10627_v4  ;;  %v11077_v41 = vmul.f32 %v10623_v60, %v10902_v63 }
 0x273   :  { %v11081_v33 = vmul.f32 %v10902_v63, %v10637_v17  ;;  %v11085_v54 = vmul.f32 %v10633_v10, %v10902_v63  ;;  %v11089_v47 = vmul.f32 %v10902_v63, %v10647_v36  ;;  %v11093_v4 = vmul.f32 %v10643_v23, %v10902_v63 }
 0x274   :  { %v11097_v60 = vmul.f32 %v10902_v63, %v10657_v56  ;;  %v11101_v17 = vmul.f32 %v10653_v45, %v10902_v63  ;;  %v11105_v10 = vmul.f32 %v10902_v63, %v14374_v32  ;;  %v11109_v36 = vmul.f32 %v14375_v50, %v10902_v63 }
 0x275   :  { %v11113_v23 = vmul.f32 %v10902_v63, %v14376_v14  ;;  %v11117_v56 = vmul.f32 %v14377_v29, %v10902_v63  ;;  %v11121_v45 = vmul.f32 %v10902_v63, %v14379_v38  ;;  %v11125_v32 = vmul.f32 %v14381_v19, %v10902_v63 }
 0x276   :  { %v11129_v50 = vmul.f32 %v10902_v63, %v14383_v25  ;;  %v11133_v14 = vmul.f32 %v14385_v51, %v10902_v63  ;;  %v11137_v29 = vmul.f32 %v10902_v63, %v14387_v22 }
 0x277   :  { %14378 = vst [vmem:[#allocation4_spill] sm:$0xff] %v11117_v56  ;;  %14380 = vst [vmem:[#allocation3_spill] sm:$0xff] %v11121_v45  ;;  %v14389_v56 = vld [vmem:[#allocation11_spill] sm:$0xff]  ;;  %v14391_v45 = vld [vmem:[#allocation14_spill] sm:$0xff] }
 0x278   :  { %14382 = vst [vmem:[#allocation6_spill] sm:$0xff] %v11125_v32  ;;  %14384 = vst [vmem:[#allocation5_spill] sm:$0xff] %v11129_v50  ;;  %v11141_v38 = vmul.f32 %v14389_v56, %v10902_v63  ;;  %v11145_v19 = vmul.f32 %v10902_v63, %v14391_v45  ;;  %v14392_v32 = vld [vmem:[#allocation13_spill] sm:$0xff]  ;;  %v14393_v50 = vld [vmem:[#allocation16_spill] sm:$0xff] }
 0x279   :  { %14386 = vst [vmem:[#allocation8_spill] sm:$0xff] %v11133_v14  ;;  %14388 = vst [vmem:[#allocation7_spill] sm:$0xff] %v11137_v29  ;;  %v11149_v25 = vmul.f32 %v14392_v32, %v10902_v63  ;;  %v11153_v51 = vmul.f32 %v10902_v63, %v14393_v50  ;;  %v14394_v14 = vld [vmem:[#allocation15_spill] sm:$0xff]  ;;  %v14395_v29 = vld [vmem:[#allocation18_spill] sm:$0xff]  ;;  %v11169_v32 = vadd.f32 %v10937_v42, %v10910_v8 }
 0x27a   :  { %14390 = vst [vmem:[#allocation10_spill] sm:$0xff] %v11141_v38  ;;  %v11157_v22 = vmul.f32 %v14394_v14, %v10902_v63  ;;  %v11161_v56 = vmul.f32 %v10902_v63, %v14395_v29  ;;  %v14396_v38 = vld [vmem:[#allocation17_spill] sm:$0xff]  ;;  %v11173_v50 = vadd.f32 %v10937_v42, %v10914_v1  ;;  %v11177_v14 = vadd.f32 %v10937_v42, %v10918_v13 }
 0x27b   :  { %v11165_v45 = vmul.f32 %v14396_v38, %v10902_v63  ;;  %v11181_v29 = vadd.f32 %v10937_v42, %v10922_v5  ;;  %v11185_v63 = vadd.f32 %v10937_v42, %v10926_v59  ;;  %v11189_v8 = vadd.f32 %v10937_v42, %v10930_v28 }
 0x27c   :  { %v11193_v1 = vadd.f32 %v10937_v42, %v10934_v26  ;;  %v11197_v13 = vadd.f32 %v10937_v42, %v10941_v34  ;;  %v11201_v5 = vadd.f32 %v10937_v42, %v10945_v31  ;;  %v11205_v59 = vadd.f32 %v10937_v42, %v10949_v40 }
 0x27d   :  { %v11209_v28 = vadd.f32 %v10937_v42, %v10953_v37  ;;  %v11213_v26 = vadd.f32 %v10937_v42, %v10957_v46  ;;  %v11217_v34 = vadd.f32 %v10937_v42, %v10961_v43  ;;  %v11221_v31 = vadd.f32 %v10937_v42, %v10965_v52 }
 0x27e   :  { %v11225_v40 = vadd.f32 %v10937_v42, %v10969_v49  ;;  %v11229_v37 = vadd.f32 %v10937_v42, %v10973_v58  ;;  %v11233_v46 = vadd.f32 %v10937_v42, %v10977_v55  ;;  %v11237_v43 = vadd.f32 %v10937_v42, %v10981_v0  ;;  %v14404_v38 = vld [vmem:[#allocation4_spill] sm:$0xff] }
 0x27f   :  { %v11241_v52 = vadd.f32 %v10937_v42, %v10985_v61  ;;  %v11245_v49 = vadd.f32 %v10937_v42, %v10989_v6  ;;  %v11249_v58 = vadd.f32 %v10937_v42, %v10993_v3  ;;  %v11253_v55 = vadd.f32 %v10937_v42, %v10997_v12 }
 0x280   :  { %v11257_v0 = vadd.f32 %v10937_v42, %v11001_v9  ;;  %v11261_v61 = vadd.f32 %v10937_v42, %v11005_v18  ;;  %v11265_v6 = vadd.f32 %v10937_v42, %v11009_v15  ;;  %v11269_v3 = vadd.f32 %v10937_v42, %v11013_v24 }
 0x281   :  { %v11273_v12 = vadd.f32 %v10937_v42, %v11017_v21  ;;  %v11277_v9 = vadd.f32 %v10937_v42, %v11021_v35  ;;  %v11281_v18 = vadd.f32 %v10937_v42, %v11025_v30  ;;  %v11285_v15 = vadd.f32 %v10937_v42, %v11029_v44 }
 0x282   :  { %v11289_v24 = vadd.f32 %v10937_v42, %v11033_v39  ;;  %v11293_v21 = vadd.f32 %v10937_v42, %v11037_v53  ;;  %v11297_v35 = vadd.f32 %v10937_v42, %v11041_v48  ;;  %v11301_v30 = vadd.f32 %v10937_v42, %v11045_v62 }
 0x283   :  { %14397 = vst [vmem:[#allocation9_spill] sm:$0xff] %v11285_v15  ;;  %v11305_v44 = vadd.f32 %v10937_v42, %v11049_v57  ;;  %v11309_v39 = vadd.f32 %v10937_v42, %v11053_v7  ;;  %v11313_v53 = vadd.f32 %v10937_v42, %v11057_v2  ;;  %v11317_v48 = vadd.f32 %v10937_v42, %v11061_v16 }
 0x284   :  { %v11321_v62 = vadd.f32 %v10937_v42, %v11065_v11  ;;  %v11325_v57 = vadd.f32 %v10937_v42, %v11069_v27  ;;  %v11329_v7 = vadd.f32 %v10937_v42, %v11073_v20  ;;  %v11333_v2 = vadd.f32 %v10937_v42, %v11077_v41 }
 0x285   :  { %14398 = vst [vmem:[#allocation12_spill] sm:$0xff] %v11309_v39  ;;  %v11337_v16 = vadd.f32 %v10937_v42, %v11081_v33  ;;  %v11341_v11 = vadd.f32 %v10937_v42, %v11085_v54  ;;  %v11345_v27 = vadd.f32 %v10937_v42, %v11089_v47  ;;  %v11349_v20 = vadd.f32 %v10937_v42, %v11093_v4 }
 0x286   :  { %v11353_v41 = vadd.f32 %v10937_v42, %v11097_v60  ;;  %v11357_v33 = vadd.f32 %v10937_v42, %v11101_v17  ;;  %v11361_v54 = vadd.f32 %v10937_v42, %v11105_v10  ;;  %v11365_v47 = vadd.f32 %v10937_v42, %v11109_v36 }
 0x287   :  { %v11369_v4 = vadd.f32 %v10937_v42, %v11113_v23  ;;  %v11373_v60 = vadd.f32 %v10937_v42, %v14404_v38 }
 0x288   :  { %14399 = vst [vmem:[#allocation11_spill] sm:$0xff] %v11353_v41  ;;  %14400 = vst [vmem:[#allocation14_spill] sm:$0xff] %v11357_v33  ;;  %v14406_v41 = vld [vmem:[#allocation3_spill] sm:$0xff]  ;;  %v14407_v33 = vld [vmem:[#allocation6_spill] sm:$0xff] }
 0x289   :  { %14401 = vst [vmem:[#allocation13_spill] sm:$0xff] %v11361_v54  ;;  %14402 = vst [vmem:[#allocation16_spill] sm:$0xff] %v11365_v47  ;;  %v11377_v17 = vadd.f32 %v10937_v42, %v14406_v41  ;;  %v11381_v10 = vadd.f32 %v10937_v42, %v14407_v33  ;;  %v14408_v54 = vld [vmem:[#allocation5_spill] sm:$0xff]  ;;  %v14409_v47 = vld [vmem:[#allocation8_spill] sm:$0xff]  ;;  %v11401_v33 = vadd.f32 %v10937_v42, %v11145_v19 }
 0x28a   :  { %14403 = vst [vmem:[#allocation15_spill] sm:$0xff] %v11369_v4  ;;  %14405 = vst [vmem:[#allocation18_spill] sm:$0xff] %v11373_v60  ;;  %v11385_v36 = vadd.f32 %v10937_v42, %v14408_v54  ;;  %v11389_v23 = vadd.f32 %v10937_v42, %v14409_v47  ;;  %v14410_v4 = vld [vmem:[#allocation7_spill] sm:$0xff]  ;;  %v14411_v60 = vld [vmem:[#allocation10_spill] sm:$0xff]  ;;  %v11405_v54 = vadd.f32 %v10937_v42, %v11149_v25  ;;  %v11427_v25 = vmax.f32 %v11173_v50, 0.0 }
 0x28b   :  { %v11393_v38 = vadd.f32 %v10937_v42, %v14410_v4  ;;  %v11397_v41 = vadd.f32 %v10937_v42, %v14411_v60  ;;  %14412 = vst [vmem:[#allocation17_spill] sm:$0xff] %v11401_v33  ;;  %v11409_v47 = vadd.f32 %v10937_v42, %v11153_v51  ;;  %v11413_v4 = vadd.f32 %v10937_v42, %v11157_v22 }
 0x28c   :  { %v11417_v60 = vadd.f32 %v10937_v42, %v11161_v56  ;;  %v11421_v19 = vadd.f32 %v10937_v42, %v11165_v45  ;;  %v11424_v33 = vmax.f32 %v11169_v32, 0.0  ;;  %v11430_v51 = vmax.f32 %v11177_v14, 0.0  ;;  %1029 = vst [vmem:[#allocation2 + $0x21] sm:$0xff] %v11427_v25 }
 0x28d   :  { %14413 = vst [vmem:[#allocation4_spill] sm:$0xff] %v11413_v4  ;;  %v11433_v22 = vmax.f32 %v11181_v29, 0.0  ;;  %v11436_v4 = vmax.f32 %v11185_v63, 0.0  ;;  %v11439_v56 = vmax.f32 %v11189_v8, 0.0  ;;  %v11442_v42 = vmax.f32 %v11193_v1, 0.0 }
 0x28e   :  { %v11445_v45 = vmax.f32 %v11197_v13, 0.0  ;;  %v11448_v32 = vmax.f32 %v11201_v5, 0.0  ;;  %v11451_v50 = vmax.f32 %v11205_v59, 0.0  ;;  %1028 = vst [vmem:[#allocation2 + $0x19] sm:$0xff] %v11424_v33  ;;  %v11456_v14 = vmax.f32 %v11209_v28, 0.0  ;;  %1030 = vst [vmem:[#allocation2 + $0x31] sm:$0xff] %v11430_v51 }
 0x28f   :  { %v11459_v29 = vmax.f32 %v11213_v26, 0.0  ;;  %v11462_v63 = vmax.f32 %v11217_v34, 0.0  ;;  %v11465_v8 = vmax.f32 %v11221_v31, 0.0  ;;  %1031 = vst [vmem:[#allocation2 + $0x39] sm:$0xff] %v11433_v22  ;;  %1032 = vst [vmem:[#allocation2 + $0x49] sm:$0xff] %v11436_v4  ;;  %v11472_v1 = vmax.f32 %v11225_v40, 0.0 }
 0x290   :  { %1033 = vst [vmem:[#allocation2 + $0x51] sm:$0xff] %v11439_v56  ;;  %v11475_v13 = vmax.f32 %v11229_v37, 0.0  ;;  %v14217_v5 = vmax.f32 %v11233_v46, 0.0  ;;  %v14218_v59 = vmax.f32 %v11237_v43, 0.0  ;;  %1034 = vst [vmem:[#allocation2 + $0x61] sm:$0xff] %v11442_v42  ;;  %v11484_v28 = vmax.f32 %v11241_v52, 0.0 }
 0x291   :  { %1035 = vst [vmem:[#allocation2 + $0x69] sm:$0xff] %v11445_v45  ;;  %1036 = vst [vmem:[#allocation2 + $0x79] sm:$0xff] %v11448_v32  ;;  %v14219_v34 = vmax.f32 %v11249_v58, 0.0  ;;  %v11494_v40 = vmax.f32 %v11257_v0, 0.0  ;;  %v11506_v31 = vmax.f32 %v11273_v12, 0.0  ;;  %v14414_v26 = vmax.f32 %v11245_v49, 0.0 }
 0x292   :  { %1037 = vst [vmem:[#allocation2 + $0x81] sm:$0xff] %v11451_v50  ;;  %1038 = vst [vmem:[#allocation2 + $0x91] sm:$0xff] %v11456_v14  ;;  %v885_v12 = vmax.f32 %v11289_v24, 0.0  ;;  %v14416_v52 = vmax.f32 %v11261_v61, 0.0  ;;  %v14420_v0 = vmax.f32 %v11277_v9, 0.0  ;;  %v11547_v24 = vmax.f32 %v11321_v62, 0.0 }
 0x293   :  { %1039 = vst [vmem:[#allocation2 + $0x99] sm:$0xff] %v11459_v29  ;;  %1040 = vst [vmem:[#allocation2 + $0xa9] sm:$0xff] %v11462_v63  ;;  %v11550_v37 = vmax.f32 %v11325_v57, 0.0  ;;  %v11564_v57 = vmax.f32 %v11337_v16, 0.0  ;;  %v14433_v16 = vmax.f32 %v11317_v48, 0.0 }
 0x294   :  { %1041 = vst [vmem:[#allocation2 + $0xb1] sm:$0xff] %v11465_v8  ;;  %1042 = vst [vmem:[#allocation2 + $0xc1] sm:$0xff] %v11472_v1 }
 0x295   :  { %1043 = vst [vmem:[#allocation2 + $0xc9] sm:$0xff] %v11475_v13  ;;  %1044 = vst [vmem:[#allocation2 + $0xd9] sm:$0xff] %v14217_v5  ;;  %v14415_v5 = vmax.f32 %v11253_v55, 0.0 }
 0x296   :  { %1045 = vst [vmem:[#allocation2 + $0xe1] sm:$0xff] %v14218_v59  ;;  %1046 = vst [vmem:[#allocation2 + $0xf1] sm:$0xff] %v11484_v28  ;;  %v886_v59 = vmax.f32 %v11293_v21, 0.0  ;;  %v11561_v62 = vld [vmem:[#allocation2 + $0x38] sm:$0xff]  ;;  %v11567_v21 = vmax.f32 %v11341_v11, 0.0  ;;  %v14434_v11 = vld [vmem:[#allocation11_spill] sm:$0xff] }
 0x297   :  { %1047 = vst [vmem:[#allocation2 + $0xf9] sm:$0xff] %v14414_v26  ;;  %1048 = vst [vmem:[#allocation2 + $0x109] sm:$0xff] %v14219_v34  ;;  %v14417_v26 = vmax.f32 %v11265_v6, 0.0  ;;  %v14418_v34 = vmax.f32 %v11269_v3, 0.0 }
 0x298   :  { %1049 = vst [vmem:[#allocation2 + $0x111] sm:$0xff] %v14415_v5  ;;  %1050 = vst [vmem:[#allocation2 + $0x121] sm:$0xff] %v11494_v40  ;;  %v11530_v5 = vmax.f32 %v11305_v44, 0.0  ;;  %v11544_v44 = vld [vmem:[#allocation2 + $0x20] sm:$0xff] }
 0x299   :  { %1051 = vst [vmem:[#allocation2 + $0x129] sm:$0xff] %v14416_v52  ;;  %1052 = vst [vmem:[#allocation2 + $0x139] sm:$0xff] %v14417_v26  ;;  %v14421_v52 = vmax.f32 %v11281_v18, 0.0  ;;  %v14422_v26 = vmax.f32 %v11285_v15, 0.0  ;;  %v11559_v15 = vld [vmem:[#allocation2 + $0x30] sm:$0xff] }
 0x29a   :  { %1053 = vst [vmem:[#allocation2 + $0x141] sm:$0xff] %v14418_v34  ;;  %14419 = vst [vmem:[#allocation3_spill] sm:$0xff] %v11530_v5  ;;  %v11542_v34 = vld [vmem:[#allocation2 + $0x18] sm:$0xff]  ;;  %7815 = vmatprep.mubr.f32.mxu0 %v11559_v15 }
 0x29b   :  { %1054 = vst [vmem:[#allocation2 + $0x151] sm:$0xff] %v11506_v31  ;;  %1055 = vst [vmem:[#allocation2 + $0x159] sm:$0xff] %v14420_v0  ;;  %7559 = vmatprep.mubr.f32.mxu1 %v11542_v34  ;;  %7816 = vmatmul.mubr.f32.vlgmr.msra.gmra.mrb[0].mxu0 %v11561_v62 }
 0x29c   :  { %1056 = vst [vmem:[#allocation2 + $0x169] sm:$0xff] %v14421_v52  ;;  %1057 = vst [vmem:[#allocation2 + $0x171] sm:$0xff] %v14422_v26  ;;  %v14426_v52 = vmax.f32 %v11297_v35, 0.0  ;;  %v14427_v26 = vmax.f32 %v11301_v30, 0.0  ;;  %7560 = vmatmul.mubr.f32.vlgmr.msra.gmra.mrb[66].mxu1 %v11544_v44 }
 0x29d   :  { %14423 = vst [vmem:[#allocation6_spill] sm:$0xff] %v11542_v34  ;;  %14424 = vst [vmem:[#allocation5_spill] sm:$0xff] %v11544_v44  ;;  %v14438_v34 = vld [vmem:[#allocation13_spill] sm:$0xff]  ;;  %7562 = vmatprep.mubr.f32.mxu1 %v11559_v15 }
 0x29e   :  { %14425 = vst [vmem:[#allocation8_spill] sm:$0xff] %v11550_v37  ;;  %1058 = vst [vmem:[#allocation2 + $0x181] sm:$0xff] %v885_v12  ;;  %v11573_v12 = vmax.f32 %v11349_v20, 0.0  ;;  %v14436_v20 = vld [vmem:[#allocation14_spill] sm:$0xff] }
 0x29f   :  { %1059 = vst [vmem:[#allocation2 + $0x189] sm:$0xff] %v886_v59  ;;  %1060 = vst [vmem:[#allocation2 + $0x1c9] sm:$0xff] %v14426_v52  ;;  %v11570_v59 = vmax.f32 %v11345_v27, 0.0  ;;  %v14431_v52 = vmax.f32 %v11309_v39, 0.0  ;;  %v11585_v27 = vmax.f32 %v14434_v11, 0.0  ;;  %v11588_v0 = vmax.f32 %v14436_v20, 0.0 }
 0x2a0   :  { %1061 = vst [vmem:[#allocation2 + $0x1d1] sm:$0xff] %v14427_v26  ;;  %14428 = vst [vmem:[#allocation7_spill] sm:$0xff] %v11559_v15  ;;  %v14432_v26 = vmax.f32 %v11313_v53, 0.0  ;;  %v11604_v11 = vld [vmem:[#allocation2 + $0x48] sm:$0xff]  ;;  %v11637_v15 = vmax.f32 %v11393_v38, 0.0  ;;  %7563 = vmatmul.mubr.f32.gmra.mrb[68].mxu1 %v11561_v62 }
 0x2a1   :  { %14429 = vst [vmem:[#allocation10_spill] sm:$0xff] %v11570_v59  ;;  %14430 = vst [vmem:[#allocation31_spill] sm:$0xff] %v11573_v12  ;;  %7818 = vmatprep.mubr.f32.mxu0 %v11604_v11  ;;  %7565 = vmatprep.mubr.f32.mxu1 %v11604_v11 }
 0x2a2   :  { %1062 = vst [vmem:[#allocation2 + $0x1e1] sm:$0xff] %v11530_v5  ;;  %1063 = vst [vmem:[#allocation2 + $0x1e9] sm:$0xff] %v14431_v52  ;;  %v11591_v5 = vmax.f32 %v14438_v34, 0.0  ;;  %v14439_v52 = vld [vmem:[#allocation16_spill] sm:$0xff]  ;;  %v14442_v34 = vld [vmem:[#allocation15_spill] sm:$0xff] }
 0x2a3   :  { %1064 = vst [vmem:[#allocation2 + $0x1f9] sm:$0xff] %v14432_v26  ;;  %1065 = vst [vmem:[#allocation2 + $0x201] sm:$0xff] %v14433_v16  ;;  %v11594_v39 = vmax.f32 %v14439_v52, 0.0  ;;  %v14440_v26 = vmax.f32 %v11329_v7, 0.0  ;;  %v14441_v16 = vmax.f32 %v11333_v2, 0.0  ;;  %v11607_v20 = vmax.f32 %v14442_v34, 0.0 }
 0x2a4   :  { %14435 = vst [vmem:[#allocation11_spill] sm:$0xff] %v11585_v27  ;;  %14437 = vst [vmem:[#allocation14_spill] sm:$0xff] %v11588_v0  ;;  %v14443_v52 = vld [vmem:[#allocation18_spill] sm:$0xff]  ;;  %v11631_v34 = vmax.f32 %v11385_v36, 0.0  ;;  %v6429_v36 = vld [vmem:[%s14169_s3 + $0xb0] sm:$0xff] }
 0x2a5   :  { %1066 = vst [vmem:[#allocation2 + $0x211] sm:$0xff] %v11547_v24  ;;  %1067 = vst [vmem:[#allocation2 + $0x219] sm:$0xff] %v11550_v37  ;;  %v11610_v44 = vmax.f32 %v14443_v52, 0.0  ;;  %v11613_v37 = vmax.f32 %v11377_v17, 0.0  ;;  %v1164_v17 = vld [vmem:[%s14169_s3] sm:$0xff]  ;;  %v11634_v52 = vmax.f32 %v11389_v23, 0.0 }
 0x2a6   :  { %1068 = vst [vmem:[#allocation2 + $0x229] sm:$0xff] %v14440_v26  ;;  %1069 = vst [vmem:[#allocation2 + $0x231] sm:$0xff] %v14441_v16  ;;  %v11616_v26 = vmax.f32 %v11381_v10, 0.0  ;;  %v14446_v16 = vld [vmem:[#allocation27_spill] sm:$0xff]  ;;  %v1165_v10 = vld [vmem:[%s14169_s3 + $0x8] sm:$0xff] }
 0x2a7   :  { %14444 = vst [vmem:[#allocation13_spill] sm:$0xff] %v11613_v37  ;;  %1070 = vst [vmem:[#allocation2 + $0x241] sm:$0xff] %v11564_v57  ;;  %9066 = vmatpush3.bf16.msra.mxu0 %v14446_v16  ;;  %v14451_v16 = vld [vmem:[#allocation29_spill] sm:$0xff] }
 0x2a8   :  { %14445 = vst [vmem:[#allocation16_spill] sm:$0xff] %v11616_v26  ;;  %1071 = vst [vmem:[#allocation2 + $0x249] sm:$0xff] %v11567_v21  ;;  %9068 = vmatprep.subr.bf16.mxu0 %v14451_v16  ;;  %v14452_v23 = vld [vmem:[#allocation17_spill] sm:$0xff] }
 0x2a9   :  { %1072 = vst [vmem:[#allocation2 + $0x259] sm:$0xff] %v11570_v59  ;;  %1073 = vst [vmem:[#allocation2 + $0x261] sm:$0xff] %v11573_v12  ;;  %v11640_v12 = vmax.f32 %v11397_v41, 0.0  ;;  %v11651_v38 = vmax.f32 %v14452_v23, 0.0  ;;  %v11654_v41 = vmax.f32 %v11405_v54, 0.0  ;;  %v11667_v23 = vld [vmem:[#allocation2 + $0x50] sm:$0xff] }
 0x2aa   :  { %14447 = vst [vmem:[#allocation15_spill] sm:$0xff] %v11631_v34  ;;  %14448 = vst [vmem:[#allocation18_spill] sm:$0xff] %v11634_v52  ;;  %v6430_v54 = vld [vmem:[%s14169_s3 + $0xb8] sm:$0xff]  ;;  %7819 = vmatmul.mubr.f32.gmra.mrb[2].mxu0 %v11667_v23  ;;  %7566 = vmatmul.mubr.f32.gmra.mrb[70].mxu1 %v11667_v23 }
 0x2ab   :  { %14449 = vst [vmem:[#allocation27_spill] sm:$0xff] %v11637_v15  ;;  %14450 = vst [vmem:[#allocation32_spill] sm:$0xff] %v11640_v12  ;;  %9070 = vmatpush3.bf16.msra.mxu0 %v14451_v16  ;;  %v11706_v16 = vld [vmem:[#allocation2 + $0x78] sm:$0xff] }
 0x2ac   :  { %1074 = vst [vmem:[#allocation2 + $0x271] sm:$0xff] %v11585_v27  ;;  %1075 = vst [vmem:[#allocation2 + $0x279] sm:$0xff] %v11588_v0  ;;  %v11657_v27 = vmax.f32 %v11409_v47, 0.0  ;;  %v14456_v0 = vld [vmem:[#allocation4_spill] sm:$0xff]  ;;  %v917_v47 = vmax.f32 %v11417_v60, 0.0  ;;  %v1166_v60 = vld [vmem:[%s14169_s3 + $0x10] sm:$0xff] }
 0x2ad   :  { %1076 = vst [vmem:[#allocation2 + $0x289] sm:$0xff] %v11591_v5  ;;  %1077 = vst [vmem:[#allocation2 + $0x291] sm:$0xff] %v11594_v39  ;;  %v11660_v59 = vmax.f32 %v14456_v0, 0.0  ;;  %v918_v0 = vmax.f32 %v11421_v19, 0.0  ;;  %v1167_v19 = vld [vmem:[%s14169_s3 + $0x18] sm:$0xff] }
 0x2ae   :  { %14453 = vst [vmem:[#allocation29_spill] sm:$0xff] %v11651_v38  ;;  %14454 = vst [vmem:[#allocation17_spill] sm:$0xff] %v11654_v41 }
 0x2af   :  { %14455 = vst [vmem:[#allocation33_spill] sm:$0xff] %v11657_v27  ;;  %14457 = vst [vmem:[#allocation4_spill] sm:$0xff] %v11660_v59 }
 0x2b0   :  { %1078 = vst [vmem:[#allocation2 + $0x2a1] sm:$0xff] %v11607_v20  ;;  %1079 = vst [vmem:[#allocation2 + $0x2a9] sm:$0xff] %v11610_v44 }
 0x2b1   :  { %1080 = vst [vmem:[#allocation2 + $0x2b9] sm:$0xff] %v11613_v37  ;;  %1081 = vst [vmem:[#allocation2 + $0x2c1] sm:$0xff] %v11616_v26  ;;  %v11680_v26 = vld [vmem:[#allocation2 + $0x60] sm:$0xff]  ;;  %v8999_v37 = vpack.c.bf16 %v1165_v10, %v1164_v17  ;;  %v14458_v17 = vld [vmem:[#allocation30_spill] sm:$0xff]  ;;  %v9075_v10 = vpack.c.bf16 %v6430_v54, %v6429_v36 }
 0x2b2   :  { %1082 = vst [vmem:[#allocation2 + $0x2d1] sm:$0xff] %v11631_v34  ;;  %1083 = vst [vmem:[#allocation2 + $0x2d9] sm:$0xff] %v11634_v52  ;;  %7821 = vmatprep.mubr.f32.mxu0 %v11680_v26  ;;  %9072 = vmatprep.subr.bf16.mxu0 %v14458_v17  ;;  %v1168_v36 = vld [vmem:[%s14169_s3 + $0x20] sm:$0xff]  ;;  %v1169_v54 = vld [vmem:[%s14169_s3 + $0x28] sm:$0xff] }
 0x2b3   :  { %1084 = vst [vmem:[#allocation2 + $0x2e9] sm:$0xff] %v11637_v15  ;;  %1085 = vst [vmem:[#allocation2 + $0x2f1] sm:$0xff] %v11640_v12  ;;  %9000 = vmatprep.subr.bf16.mxu1 %v8999_v37  ;;  %v11696_v12 = vld [vmem:[#allocation2 + $0x68] sm:$0xff]  ;;  %7568 = vmatprep.mubr.f32.mxu1 %v11680_v26 }
 0x2b4   :  { %1086 = vst [vmem:[#allocation2 + $0x301] sm:$0xff] %v11651_v38  ;;  %1087 = vst [vmem:[#allocation2 + $0x309] sm:$0xff] %v11654_v41  ;;  %v9003_v41 = vpack.c.bf16 %v1167_v19, %v1166_v60  ;;  %7822 = vmatmul.mubr.f32.gmra.mrb[4].mxu0 %v11696_v12  ;;  %9002 = vmatpush3.bf16.msra.mxu1 %v8999_v37  ;;  %v6433_v60 = vld [vmem:[%s14169_s3 + $0xd0] sm:$0xff]  ;;  %v6434_v19 = vld [vmem:[%s14169_s3 + $0xd8] sm:$0xff]  ;;  %v9007_v38 = vpack.c.bf16 %v1169_v54, %v1168_v36 }
 0x2b5   :  { %1088 = vst [vmem:[#allocation2 + $0x319] sm:$0xff] %v11657_v27  ;;  %1089 = vst [vmem:[#allocation2 + $0x321] sm:$0xff] %v11660_v59  ;;  %v6431_v27 = vld [vmem:[%s14169_s3 + $0xc0] sm:$0xff]  ;;  %v6432_v59 = vld [vmem:[%s14169_s3 + $0xc8] sm:$0xff]  ;;  %7824 = vmatprep.mubr.f32.mxu0 %v11706_v16  ;;  %9074 = vmatpush3.bf16.msra.mxu0 %v14458_v17  ;;  %v9083_v17 = vpack.c.bf16 %v6434_v19, %v6433_v60 }
 0x2b6   :  { %1090 = vst [vmem:[#allocation2 + $0x331] sm:$0xff] %v917_v47  ;;  %1091 = vst [vmem:[#allocation2 + $0x339] sm:$0xff] %v918_v0  ;;  %9076 = vmatprep.subr.bf16.mxu0 %v9075_v10  ;;  %v9079_v47 = vpack.c.bf16 %v6432_v59, %v6431_v27  ;;  %7569 = vmatmul.mubr.f32.gmra.mrb[72].mxu1 %v11696_v12  ;;  %v11717_v0 = vld [vmem:[#allocation2 + $0x80] sm:$0xff]  ;;  %v11727_v59 = vld [vmem:[#allocation2 + $0x90] sm:$0xff] }
 0x2b7   :  { %14459 = vst [vmem:[#allocation30_spill] sm:$0xff] %v11706_v16  ;;  %14460 = vst [vmem:[#allocation34_spill] sm:$0xff] %v11717_v0  ;;  %9004 = vmatprep.subr.bf16.mxu1 %v9003_v41  ;;  %7571 = vmatprep.mubr.f32.mxu1 %v11706_v16  ;;  %v1170_v37 = vld [vmem:[%s14169_s3 + $0x30] sm:$0xff]  ;;  %v1171_v27 = vld [vmem:[%s14169_s3 + $0x38] sm:$0xff] }
 0x2b8   :  { %7825 = vmatmul.mubr.f32.gmra.mrb[6].mxu0 %v11717_v0  ;;  %14461 = vst [vmem:[#allocation35_spill] sm:$0xff] %v11727_v59  ;;  %9006 = vmatpush3.bf16.msra.mxu1 %v9003_v41  ;;  %v11737_v36 = vld [vmem:[#allocation2 + $0x98] sm:$0xff]  ;;  %v6435_v54 = vld [vmem:[%s14169_s3 + $0xe0] sm:$0xff]  ;;  %v6436_v15 = vld [vmem:[%s14169_s3 + $0xe8] sm:$0xff]  ;;  %v9011_v16 = vpack.c.bf16 %v1171_v27, %v1170_v37 }
 0x2b9   :  { %7827 = vmatprep.mubr.f32.mxu0 %v11727_v59  ;;  %9078 = vmatpush3.bf16.msra.mxu0 %v9075_v10  ;;  %14462 = vst [vmem:[#allocation36_spill] sm:$0xff] %v11737_v36  ;;  %v11747_v10 = vld [vmem:[#allocation2 + $0xa8] sm:$0xff]  ;;  %v1172_v41 = vld [vmem:[%s14169_s3 + $0x40] sm:$0xff]  ;;  %v9087_v19 = vpack.c.bf16 %v6436_v15, %v6435_v54  ;;  %v11757_v37 = vld [vmem:[#allocation2 + $0xb0] sm:$0xff] }
 0x2ba   :  { %9080 = vmatprep.subr.bf16.mxu0 %v9079_v47  ;;  %7572 = vmatmul.mubr.f32.gmra.mrb[74].mxu1 %v11717_v0  ;;  %14463 = vst [vmem:[#allocation37_spill] sm:$0xff] %v11747_v10  ;;  %v1173_v60 = vld [vmem:[%s14169_s3 + $0x48] sm:$0xff]  ;;  %14464 = vst [vmem:[#allocation38_spill] sm:$0xff] %v11757_v37  ;;  %v6437_v27 = vld [vmem:[%s14169_s3 + $0xf0] sm:$0xff] }
 0x2bb   :  { %9008 = vmatprep.subr.bf16.mxu1 %v9007_v38  ;;  %7574 = vmatprep.mubr.f32.mxu1 %v11727_v59  ;;  %v6438_v59 = vld [vmem:[%s14169_s3 + $0xf8] sm:$0xff]  ;;  %v9015_v0 = vpack.c.bf16 %v1173_v60, %v1172_v41  ;;  %v11767_v15 = vld [vmem:[#allocation2 + $0xc0] sm:$0xff]  ;;  %v11777_v41 = vld [vmem:[#allocation2 + $0xc8] sm:$0xff] }
 0x2bc   :  { %7828 = vmatmul.mubr.f32.gmra.mrb[8].mxu0 %v11737_v36  ;;  %9010 = vmatpush3.bf16.msra.mxu1 %v9007_v38  ;;  %14465 = vst [vmem:[#allocation39_spill] sm:$0xff] %v11767_v15  ;;  %v1174_v38 = vld [vmem:[%s14169_s3 + $0x50] sm:$0xff]  ;;  %v9091_v54 = vpack.c.bf16 %v6438_v59, %v6437_v27  ;;  %14466 = vst [vmem:[#allocation40_spill] sm:$0xff] %v11777_v41  ;;  %v6439_v60 = vld [vmem:[%s14169_s3 + $0x200] sm:$0xff] }
 0x2bd   :  { %7830 = vmatprep.mubr.f32.mxu0 %v11747_v10  ;;  %9082 = vmatpush3.bf16.msra.mxu0 %v9079_v47  ;;  %v1175_v47 = vld [vmem:[%s14169_s3 + $0x58] sm:$0xff]  ;;  %v2433_v27 = vld [vmem:[#allocation2 + $0x1] sm:$0xff] }
 0x2be   :  { %9084 = vmatprep.subr.bf16.mxu0 %v9083_v17  ;;  %7575 = vmatmul.mubr.f32.gmra.mrb[76].mxu1 %v11737_v36  ;;  %v9019_v36 = vpack.c.bf16 %v1175_v47, %v1174_v38  ;;  %v11787_v59 = vld [vmem:[#allocation2 + $0xd8] sm:$0xff]  ;;  %v11797_v47 = vld [vmem:[#allocation2 + $0xe0] sm:$0xff] }
 0x2bf   :  { %9012 = vmatprep.subr.bf16.mxu1 %v9011_v16  ;;  %7577 = vmatprep.mubr.f32.mxu1 %v11747_v10  ;;  %v6440_v10 = vld [vmem:[%s14169_s3 + $0x208] sm:$0xff]  ;;  %14467 = vst [vmem:[#allocation41_spill] sm:$0xff] %v11787_v59 }
 0x2c0   :  { %7831 = vmatmul.mubr.f32.gmra.mrb[10].mxu0 %v11757_v37  ;;  %9014 = vmatpush3.bf16.msra.mxu1 %v9011_v16  ;;  %v1176_v16 = vld [vmem:[%s14169_s3 + $0x60] sm:$0xff]  ;;  %v9095_v38 = vpack.c.bf16 %v6440_v10, %v6439_v60  ;;  %v1179_v10 = vld [vmem:[%s14169_s3 + $0x78] sm:$0xff] }
 0x2c1   :  { %7833 = vmatprep.mubr.f32.mxu0 %v11767_v15  ;;  %9086 = vmatpush3.bf16.msra.mxu0 %v9083_v17  ;;  %v1177_v17 = vld [vmem:[%s14169_s3 + $0x68] sm:$0xff] }
 0x2c2   :  { %9088 = vmatprep.subr.bf16.mxu0 %v9087_v19  ;;  %7578 = vmatmul.mubr.f32.gmra.mrb[78].mxu1 %v11757_v37  ;;  %v6442_v37 = vld [vmem:[%s14169_s3 + $0x218] sm:$0xff]  ;;  %v9023_v52 = vpack.c.bf16 %v1177_v17, %v1176_v16  ;;  %v11814_v16 = vld [vmem:[#allocation2 + $0xf0] sm:$0xff] }
 0x2c3   :  { %9016 = vmatprep.subr.bf16.mxu1 %v9015_v0  ;;  %7580 = vmatprep.mubr.f32.mxu1 %v11767_v15  ;;  %v6441_v15 = vld [vmem:[%s14169_s3 + $0x210] sm:$0xff] }
 0x2c4   :  { %7834 = vmatmul.mubr.f32.gmra.mrb[12].mxu0 %v11777_v41  ;;  %9018 = vmatpush3.bf16.msra.mxu1 %v9015_v0  ;;  %v1178_v0 = vld [vmem:[%s14169_s3 + $0x70] sm:$0xff]  ;;  %v9099_v60 = vpack.c.bf16 %v6442_v37, %v6441_v15  ;;  %v11827_v15 = vld [vmem:[#allocation2 + $0x108] sm:$0xff] }
 0x2c5   :  { %7836 = vmatprep.mubr.f32.mxu0 %v11787_v59  ;;  %9090 = vmatpush3.bf16.msra.mxu0 %v9087_v19  ;;  %v2434_v19 = vld [vmem:[#allocation2 + $0x9] sm:$0xff]  ;;  %v9027_v17 = vpack.c.bf16 %v1179_v10, %v1178_v0  ;;  %v14469_v10 = vld [vmem:[#allocation19_spill] sm:$0xff] }
 0x2c6   :  { %9092 = vmatprep.subr.bf16.mxu0 %v9091_v54  ;;  %7581 = vmatmul.mubr.f32.gmra.mrb[80].mxu1 %v11777_v41  ;;  %v6444_v41 = vld [vmem:[%s14169_s3 + $0x228] sm:$0xff] }
 0x2c7   :  { %9020 = vmatprep.subr.bf16.mxu1 %v9019_v36  ;;  %7583 = vmatprep.mubr.f32.mxu1 %v11787_v59  ;;  %v6443_v59 = vld [vmem:[%s14169_s3 + $0x220] sm:$0xff]  ;;  %v6448_v0 = vld [vmem:[%s14169_s3 + $0x248] sm:$0xff] }
 0x2c8   :  { %7837 = vmatmul.mubr.f32.gmra.mrb[14].mxu0 %v11797_v47  ;;  %9022 = vmatpush3.bf16.msra.mxu1 %v9019_v36  ;;  %v11824_v36 = vld [vmem:[#allocation2 + $0xf8] sm:$0xff]  ;;  %v9103_v37 = vpack.c.bf16 %v6444_v41, %v6443_v59  ;;  %v11841_v59 = vld [vmem:[#allocation2 + $0x120] sm:$0xff] }
 0x2c9   :  { %9094 = vmatpush3.bf16.msra.mxu0 %v9091_v54  ;;  %7943 = vmatprep.mubr.f32.mxu0 %v2433_v27  ;;  %v6445_v54 = vld [vmem:[%s14169_s3 + $0x230] sm:$0xff]  ;;  %v6446_v27 = vld [vmem:[%s14169_s3 + $0x238] sm:$0xff]  ;;  %14468 = vst [vmem:[#allocation42_spill] sm:$0xff] %v11841_v59 }
 0x2ca   :  { %9096 = vmatprep.subr.bf16.mxu0 %v9095_v38  ;;  %7584 = vmatmul.mubr.f32.gmra.mrb[82].mxu1 %v11797_v47  ;;  %v9107_v41 = vpack.c.bf16 %v6446_v27, %v6445_v54  ;;  %v6449_v54 = vld [vmem:[%s14169_s3 + $0x250] sm:$0xff]  ;;  %v6450_v27 = vld [vmem:[%s14169_s3 + $0x258] sm:$0xff] }
 0x2cb   :  { %9024 = vmatprep.subr.bf16.mxu1 %v9023_v52  ;;  %7586 = vmatprep.mubr.f32.mxu1 %v11814_v16 }
 0x2cc   :  { %7944 = vmatmul.mubr.f32.vlgmr.msra.gmra.mrb[0].mxu0 %v2434_v19  ;;  %9026 = vmatpush3.bf16.msra.mxu1 %v9023_v52  ;;  %v11838_v52 = vld [vmem:[#allocation2 + $0x110] sm:$0xff]  ;;  %v11853_v19 = vld [vmem:[#allocation2 + $0x128] sm:$0xff] }
 0x2cd   :  { %7946 = vmatprep.mubr.f32.mxu0 %v11424_v33  ;;  %9098 = vmatpush3.bf16.msra.mxu0 %v9095_v38  ;;  %v6447_v38 = vld [vmem:[%s14169_s3 + $0x240] sm:$0xff]  ;;  %14470 = vst [vmem:[#allocation19_spill] sm:$0xff] %v11853_v19 }
 0x2ce   :  { %9100 = vmatprep.subr.bf16.mxu0 %v9099_v60  ;;  %7587 = vmatmul.mubr.f32.gmra.mrb[84].mxu1 %v11824_v36 }
 0x2cf   :  { %9028 = vmatprep.subr.bf16.mxu1 %v9027_v17  ;;  %7589 = vmatprep.mubr.f32.mxu1 %v11827_v15 }
 0x2d0   :  { %7947 = vmatmul.mubr.f32.gmra.mrb[2].mxu0 %v11427_v25  ;;  %9030 = vmatpush3.bf16.msra.mxu1 %v9027_v17  ;;  %v11856_v17 = vld [vmem:[#allocation2 + $0x138] sm:$0xff] }
 0x2d1   :  { %7949 = vmatprep.mubr.f32.mxu0 %v11430_v51  ;;  %9102 = vmatpush3.bf16.msra.mxu0 %v9099_v60  ;;  %v9111_v60 = vpack.c.bf16 %v6448_v0, %v6447_v38  ;;  %14471 = vst [vmem:[#allocation43_spill] sm:$0xff] %v11856_v17  ;;  %v9115_v38 = vpack.c.bf16 %v6450_v27, %v6449_v54  ;;  %v11870_v0 = vld [vmem:[#allocation2 + $0x150] sm:$0xff]  ;;  %v11884_v27 = vld [vmem:[#allocation2 + $0x168] sm:$0xff] }
 0x2d2   :  { %9104 = vmatprep.subr.bf16.mxu0 %v9103_v37  ;;  %7590 = vmatmul.mubr.f32.gmra.mrb[86].mxu1 %v11838_v52 }
 0x2d3   :  { %9415 = vmatprep.subr.bf16.mxu1 %v14469_v10  ;;  %7592 = vmatprep.mubr.f32.mxu1 %v11841_v59  ;;  %v6452_v59 = vld [vmem:[%s14169_s3 + $0x268] sm:$0xff] }
 0x2d4   :  { %7950 = vmatmul.mubr.f32.gmra.mrb[4].mxu0 %v11433_v22 }
 0x2d5   :  { %7952 = vmatprep.mubr.f32.mxu0 %v11436_v4  ;;  %9106 = vmatpush3.bf16.msra.mxu0 %v9103_v37  ;;  %v11867_v37 = vld [vmem:[#allocation2 + $0x140] sm:$0xff] }
 0x2d6   :  { %9108 = vmatprep.subr.bf16.mxu0 %v9107_v41  ;;  %7593 = vmatmul.mubr.f32.gmra.mrb[88].mxu1 %v11853_v19  ;;  %14472 = vst [vmem:[#allocation44_spill] sm:$0xff] %v11867_v37  ;;  %v6451_v19 = vld [vmem:[%s14169_s3 + $0x260] sm:$0xff] }
 0x2d7   :  { %7595 = vmatprep.mubr.f32.mxu1 %v11856_v17  ;;  %v9119_v54 = vpack.c.bf16 %v6452_v59, %v6451_v19  ;;  %v6454_v17 = vld [vmem:[%s14169_s3 + $0x278] sm:$0xff]  ;;  %v11895_v59 = vld [vmem:[#allocation2 + $0x170] sm:$0xff] }
 0x2d8   :  { %7953 = vmatmul.mubr.f32.gmra.mrb[6].mxu0 %v11439_v56 }
 0x2d9   :  { %7955 = vmatprep.mubr.f32.mxu0 %v11442_v42  ;;  %9110 = vmatpush3.bf16.msra.mxu0 %v9107_v41  ;;  %v11881_v41 = vld [vmem:[#allocation2 + $0x158] sm:$0xff] }
 0x2da   :  { %9112 = vmatprep.subr.bf16.mxu0 %v9111_v60  ;;  %7596 = vmatmul.mubr.f32.gmra.mrb[90].mxu1 %v11867_v37  ;;  %14473 = vst [vmem:[#allocation45_spill] sm:$0xff] %v11881_v41  ;;  %v6453_v37 = vld [vmem:[%s14169_s3 + $0x270] sm:$0xff] }
 0x2db   :  { %7598 = vmatprep.mubr.f32.mxu1 %v11870_v0  ;;  %v9123_v19 = vpack.c.bf16 %v6454_v17, %v6453_v37  ;;  %v11911_v17 = vld [vmem:[#allocation2 + $0x1d0] sm:$0xff]  ;;  %v11914_v37 = vld [vmem:[#allocation2 + $0x1e0] sm:$0xff] }
 0x2dc   :  { %7956 = vmatmul.mubr.f32.gmra.mrb[8].mxu0 %v11445_v45  ;;  %14476 = vst [vmem:[#allocation48_spill] sm:$0xff] %v11911_v17  ;;  %14477 = vst [vmem:[#allocation49_spill] sm:$0xff] %v11914_v37 }
 0x2dd   :  { %7958 = vmatprep.mubr.f32.mxu0 %v11448_v32  ;;  %9114 = vmatpush3.bf16.msra.mxu0 %v9111_v60  ;;  %v11898_v60 = vld [vmem:[#allocation2 + $0x180] sm:$0xff] }
 0x2de   :  { %9116 = vmatprep.subr.bf16.mxu0 %v9115_v38  ;;  %7599 = vmatmul.mubr.f32.gmra.mrb[92].mxu1 %v11881_v41  ;;  %14474 = vst [vmem:[#allocation46_spill] sm:$0xff] %v11898_v60  ;;  %v11903_v41 = vld [vmem:[#allocation2 + $0x188] sm:$0xff] }
 0x2df   :  { %7601 = vmatprep.mubr.f32.mxu1 %v11884_v27  ;;  %14475 = vst [vmem:[#allocation47_spill] sm:$0xff] %v11903_v41 }
 0x2e0   :  { %7959 = vmatmul.mubr.f32.gmra.mrb[10].mxu0 %v11451_v50 }
 0x2e1   :  { %7961 = vmatprep.mubr.f32.mxu0 %v11456_v14  ;;  %9118 = vmatpush3.bf16.msra.mxu0 %v9115_v38  ;;  %v11906_v38 = vld [vmem:[#allocation2 + $0x1c8] sm:$0xff] }
 0x2e2   :  { %9120 = vmatprep.subr.bf16.mxu0 %v9119_v54  ;;  %7602 = vmatmul.mubr.f32.gmra.mrb[94].mxu1 %v11895_v59 }
 0x2e3   :  { %7604 = vmatprep.mubr.f32.mxu1 %v11898_v60  ;;  %v11923_v60 = vld [vmem:[#allocation2 + $0x1f8] sm:$0xff] }
 0x2e4   :  { %7962 = vmatmul.mubr.f32.gmra.mrb[12].mxu0 %v11459_v29  ;;  %14479 = vst [vmem:[#allocation50_spill] sm:$0xff] %v11923_v60 }
 0x2e5   :  { %7964 = vmatprep.mubr.f32.mxu0 %v11462_v63  ;;  %9122 = vmatpush3.bf16.msra.mxu0 %v9119_v54  ;;  %v14478_v54 = vmax.f32 %v11233_v46, 0.0  ;;  %v14481_v46 = vmax.f32 %v11245_v49, 0.0  ;;  %v11948_v49 = vld [vmem:[#allocation2 + $0x230] sm:$0xff] }
 0x2e6   :  { %9124 = vmatprep.subr.bf16.mxu0 %v9123_v19  ;;  %7605 = vmatmul.mubr.f32.gmra.mrb[96].mxu1 %v11903_v41  ;;  %v11920_v41 = vld [vmem:[#allocation2 + $0x1e8] sm:$0xff] }
 0x2e7   :  { %7607 = vmatprep.mubr.f32.mxu1 %v11906_v38 }
 0x2e8   :  { %7965 = vmatmul.mubr.f32.gmra.mrb[14].mxu0 %v11465_v8 }
 0x2e9   :  { %7967 = vmatprep.mubr.f32.mxu0 %v11472_v1  ;;  %9126 = vmatpush3.bf16.msra.mxu0 %v9123_v19  ;;  %v14480_v19 = vmax.f32 %v11237_v43, 0.0  ;;  %v11939_v43 = vld [vmem:[#allocation2 + $0x218] sm:$0xff] }
 0x2ea   :  { %7608 = vmatmul.mubr.f32.gmra.mrb[98].mxu1 %v11911_v17  ;;  %v11929_v17 = vld [vmem:[#allocation2 + $0x200] sm:$0xff] }
 0x2eb   :  { %7610 = vmatprep.mubr.f32.mxu1 %v11914_v37  ;;  %v11932_v37 = vld [vmem:[#allocation2 + $0x210] sm:$0xff] }
 0x2ec   :  { %7968 = vmatmul.mubr.f32.gmra.mrb[16].mxu0 %v11475_v13 }
 0x2ed   :  { %7970 = vmatprep.mubr.f32.mxu0 %v14478_v54  ;;  %v14482_v54 = vmax.f32 %v11249_v58, 0.0  ;;  %v14486_v58 = vmax.f32 %v11261_v61, 0.0  ;;  %v11967_v61 = vld [vmem:[#allocation2 + $0x260] sm:$0xff] }
 0x2ee   :  { %7611 = vmatmul.mubr.f32.gmra.mrb[100].mxu1 %v11920_v41 }
 0x2ef   :  { %7613 = vmatprep.mubr.f32.mxu1 %v11923_v60  ;;  %v14484_v60 = vmax.f32 %v11253_v55, 0.0  ;;  %v11958_v55 = vld [vmem:[#allocation2 + $0x248] sm:$0xff] }
 0x2f0   :  { %7971 = vmatmul.mubr.f32.gmra.mrb[18].mxu0 %v14480_v19  ;;  %v11942_v19 = vld [vmem:[#allocation2 + $0x228] sm:$0xff]  ;;  %14488 = vst [vmem:[#allocation53_spill] sm:$0xff] %v11958_v55 }
 0x2f1   :  { %7973 = vmatprep.mubr.f32.mxu0 %v11484_v28  ;;  %14483 = vst [vmem:[#allocation51_spill] sm:$0xff] %v11942_v19 }
 0x2f2   :  { %7614 = vmatmul.mubr.f32.gmra.mrb[102].mxu1 %v11929_v17 }
 0x2f3   :  { %7616 = vmatprep.mubr.f32.mxu1 %v11932_v37 }
 0x2f4   :  { %7974 = vmatmul.mubr.f32.gmra.mrb[20].mxu0 %v14481_v46  ;;  %v11951_v46 = vld [vmem:[#allocation2 + $0x240] sm:$0xff] }
 0x2f5   :  { %7976 = vmatprep.mubr.f32.mxu0 %v14482_v54  ;;  %14485 = vst [vmem:[#allocation52_spill] sm:$0xff] %v11951_v46  ;;  %v14487_v54 = vmax.f32 %v11265_v6, 0.0  ;;  %v14491_v6 = vmax.f32 %v11277_v9, 0.0  ;;  %v2470_v9 = vld [vmem:[#allocation2 + $0x1b9] sm:$0xff] }
 0x2f6   :  { %7617 = vmatmul.mubr.f32.gmra.mrb[104].mxu1 %v11939_v43 }
 0x2f7   :  { %7619 = vmatprep.mubr.f32.mxu1 %v11942_v19  ;;  %v14490_v19 = vmax.f32 %v11269_v3, 0.0  ;;  %v11977_v3 = vld [vmem:[#allocation2 + $0x278] sm:$0xff] }
 0x2f8   :  { %7977 = vmatmul.mubr.f32.gmra.mrb[22].mxu0 %v14484_v60  ;;  %v11961_v60 = vld [vmem:[#allocation2 + $0x258] sm:$0xff]  ;;  %14493 = vst [vmem:[#allocation55_spill] sm:$0xff] %v11977_v3 }
 0x2f9   :  { %7979 = vmatprep.mubr.f32.mxu0 %v11494_v40  ;;  %14489 = vst [vmem:[#allocation54_spill] sm:$0xff] %v11961_v60 }
 0x2fa   :  { %7620 = vmatmul.mubr.f32.gmra.mrb[106].mxu1 %v11948_v49 }
 0x2fb   :  { %7622 = vmatprep.mubr.f32.mxu1 %v11951_v46 }
 0x2fc   :  { %7980 = vmatmul.mubr.f32.gmra.mrb[24].mxu0 %v14486_v58  ;;  %v11970_v58 = vld [vmem:[#allocation2 + $0x270] sm:$0xff] }
 0x2fd   :  { %7982 = vmatprep.mubr.f32.mxu0 %v14487_v54  ;;  %v14492_v54 = vmax.f32 %v11281_v18, 0.0  ;;  %v6456_v18 = vld [vmem:[%s14169_s3 + $0x388] sm:$0xff] }
 0x2fe   :  { %7623 = vmatmul.mubr.f32.gmra.mrb[108].mxu1 %v11958_v55  ;;  %v14495_v55 = vld [vmem:[#allocation9_spill] sm:$0xff] }
 0x2ff   :  { %7625 = vmatprep.mubr.f32.mxu1 %v11961_v60  ;;  %v11980_v60 = vld [vmem:[#allocation2 + $0x288] sm:$0xff]  ;;  %v14496_v46 = vmax.f32 %v14495_v55, 0.0  ;;  %v11996_v55 = vld [vmem:[#allocation2 + $0x2a0] sm:$0xff] }
 0x300   :  { %7983 = vmatmul.mubr.f32.gmra.mrb[26].mxu0 %v14490_v19  ;;  %v2469_v19 = vld [vmem:[#allocation2 + $0x1b1] sm:$0xff]  ;;  %14494 = vst [vmem:[#allocation56_spill] sm:$0xff] %v11980_v60  ;;  %14497 = vst [vmem:[#allocation9_spill] sm:$0xff] %v11996_v55 }
 0x301   :  { %7985 = vmatprep.mubr.f32.mxu0 %v11506_v31 }
 0x302   :  { %7626 = vmatmul.mubr.f32.gmra.mrb[110].mxu1 %v11967_v61 }
 0x303   :  { %7628 = vmatprep.mubr.f32.mxu1 %v11970_v58 }
 0x304   :  { %7986 = vmatmul.mubr.f32.gmra.mrb[28].mxu0 %v14491_v6  ;;  %v6455_v6 = vld [vmem:[%s14169_s3 + $0x380] sm:$0xff] }
 0x305   :  { %7988 = vmatprep.mubr.f32.mxu0 %v14492_v54  ;;  %v11991_v54 = vld [vmem:[#allocation2 + $0x290] sm:$0xff] }
 0x306   :  { %7629 = vmatmul.mubr.f32.gmra.mrb[112].mxu1 %v11977_v3  ;;  %v11993_v3 = vpack.c.bf16 %v6456_v18, %v6455_v6  ;;  %v14501_v6 = vmax.f32 %v11301_v30, 0.0  ;;  %v14502_v18 = vld [vmem:[#allocation3_spill] sm:$0xff]  ;;  %v12021_v30 = vld [vmem:[#allocation2 + $0x2d8] sm:$0xff] }
 0x307   :  { %7631 = vmatprep.mubr.f32.mxu1 %v11980_v60  ;;  %v12005_v60 = vld [vmem:[#allocation2 + $0x2b8] sm:$0xff]  ;;  %14506 = vst [vmem:[#allocation3_spill] sm:$0xff] %v12021_v30 }
 0x308   :  { %7989 = vmatmul.mubr.f32.gmra.mrb[30].mxu0 %v14496_v46  ;;  %v14498_v46 = vmax.f32 %v11297_v35, 0.0  ;;  %9128 = vmatprep.subr.bf16.mxu0 %v11993_v3  ;;  %14500 = vst [vmem:[#allocation58_spill] sm:$0xff] %v12005_v60  ;;  %v12014_v35 = vld [vmem:[#allocation2 + $0x2d0] sm:$0xff] }
 0x309   :  { %7991 = vmatprep.mubr.f32.mxu0 %v2469_v19  ;;  %v12002_v19 = vld [vmem:[#allocation2 + $0x2a8] sm:$0xff] }
 0x30a   :  { %7632 = vmatmul.mubr.f32.gmra.mrb[114].mxu1 %v11991_v54  ;;  %14499 = vst [vmem:[#allocation57_spill] sm:$0xff] %v12002_v19 }
 0x30b   :  { %7634 = vmatprep.mubr.f32.mxu1 %v11996_v55 }
 0x30c   :  { %7992 = vmatmul.mubr.f32.gmra.mrb[32].mxu0 %v2470_v9  ;;  %v12011_v9 = vld [vmem:[#allocation2 + $0x2c0] sm:$0xff] }
 0x30d   :  { %7994 = vmatprep.mubr.f32.mxu0 %v14498_v46  ;;  %v14503_v46 = vld [vmem:[#allocation12_spill] sm:$0xff] }
 0x30e   :  { %7635 = vmatmul.mubr.f32.gmra.mrb[116].mxu1 %v12002_v19  ;;  %v14504_v55 = vmax.f32 %v14503_v46, 0.0  ;;  %v14505_v19 = vmax.f32 %v11313_v53, 0.0  ;;  %v12030_v46 = vld [vmem:[#allocation2 + $0x2f0] sm:$0xff]  ;;  %v14510_v53 = vld [vmem:[#allocation8_spill] sm:$0xff] }
 0x30f   :  { %7637 = vmatprep.mubr.f32.mxu1 %v12005_v60  ;;  %v14507_v60 = vmax.f32 %v11317_v48, 0.0  ;;  %14508 = vst [vmem:[#allocation12_spill] sm:$0xff] %v12030_v46  ;;  %v12042_v48 = vld [vmem:[#allocation2 + $0x318] sm:$0xff] }
 0x310   :  { %7995 = vmatmul.mubr.f32.gmra.mrb[34].mxu0 %v14501_v6  ;;  %v12024_v6 = vld [vmem:[#allocation2 + $0x2e8] sm:$0xff]  ;;  %14513 = vst [vmem:[#allocation60_spill] sm:$0xff] %v12042_v48 }
 0x311   :  { %7997 = vmatprep.mubr.f32.mxu0 %v14502_v18 }
 0x312   :  { %7638 = vmatmul.mubr.f32.gmra.mrb[118].mxu1 %v12011_v9 }
 0x313   :  { %7640 = vmatprep.mubr.f32.mxu1 %v12014_v35 }
 0x314   :  { %7998 = vmatmul.mubr.f32.gmra.mrb[36].mxu0 %v14504_v55  ;;  %v12033_v55 = vld [vmem:[#allocation2 + $0x300] sm:$0xff] }
 0x315   :  { %8000 = vmatprep.mubr.f32.mxu0 %v14505_v19  ;;  %14509 = vst [vmem:[#allocation59_spill] sm:$0xff] %v12033_v55  ;;  %v14511_v19 = vmax.f32 %v11329_v7, 0.0  ;;  %v14517_v7 = vld [vmem:[#allocation10_spill] sm:$0xff] }
 0x316   :  { %7641 = vmatmul.mubr.f32.gmra.mrb[120].mxu1 %v12021_v30  ;;  %v12039_v30 = vld [vmem:[#allocation2 + $0x308] sm:$0xff] }
 0x317   :  { %7643 = vmatprep.mubr.f32.mxu1 %v12024_v6  ;;  %14512 = vst [vmem:[#allocation8_spill] sm:$0xff] %v12039_v30 }
 0x318   :  { %8001 = vmatmul.mubr.f32.gmra.mrb[38].mxu0 %v14507_v60  ;;  %v14514_v60 = vmax.f32 %v11333_v2, 0.0  ;;  %v14519_v2 = vld [vmem:[#allocation31_spill] sm:$0xff] }
 0x319   :  { %8003 = vmatprep.mubr.f32.mxu0 %v11547_v24 }
 0x31a   :  { %7644 = vmatmul.mubr.f32.gmra.mrb[122].mxu1 %v12030_v46  ;;  %v12048_v46 = vld [vmem:[#allocation2 + $0x320] sm:$0xff] }
 0x31b   :  { %7646 = vmatprep.mubr.f32.mxu1 %v12033_v55  ;;  %14515 = vst [vmem:[#allocation61_spill] sm:$0xff] %v12048_v46  ;;  %v12051_v55 = vld [vmem:[#allocation2 + $0x330] sm:$0xff] }
 0x31c   :  { %8004 = vmatmul.mubr.f32.gmra.mrb[40].mxu0 %v14510_v53  ;;  %14516 = vst [vmem:[#allocation62_spill] sm:$0xff] %v12051_v55 }
 0x31d   :  { %8006 = vmatprep.mubr.f32.mxu0 %v14511_v19  ;;  %v12056_v19 = vld [vmem:[#allocation2 + $0x338] sm:$0xff] }
 0x31e   :  { %7647 = vmatmul.mubr.f32.gmra.mrb[124].mxu1 %v12039_v30  ;;  %14518 = vst [vmem:[#allocation10_spill] sm:$0xff] %v12056_v19  ;;  %v14522_v30 = vld [vmem:[#allocation6_spill] sm:$0xff] }
 0x31f   :  { %7649 = vmatprep.mubr.f32.mxu1 %v12042_v48  ;;  %v14520_v48 = vld [vmem:[#allocation11_spill] sm:$0xff] }
 0x320   :  { %8007 = vmatmul.mubr.f32.gmra.mrb[42].mxu0 %v14514_v60  ;;  %v12060_v60 = vld [vmem:[#allocation2] sm:$0xff] }
 0x321   :  { %8009 = vmatprep.mubr.f32.mxu0 %v11564_v57 }
 0x322   :  { %7650 = vmatmul.mubr.f32.gmra.mrb[126].mxu1 %v12048_v46  ;;  %v14521_v46 = vld [vmem:[#allocation14_spill] sm:$0xff] }
 0x323   :  { %7652 = vmatprep.mubr.f32.mxu1 %v12051_v55  ;;  %v14523_v55 = vld [vmem:[#allocation20_spill] sm:$0xff] }
 0x324   :  { %8010 = vmatmul.mubr.f32.gmra.mrb[44].mxu0 %v11567_v21 }
 0x325   :  { %8012 = vmatprep.mubr.f32.mxu0 %v14517_v7 }
 0x326   :  { %7653 = vmatmul.mubr.f32.gmra.mrb[128].mxu1 %v12056_v19  ;;  %v14524_v19 = vld [vmem:[#allocation5_spill] sm:$0xff] }
 0x327   :  { %7687 = vmatprep.mubr.f32.mxu1 %v12060_v60 }
 0x328   :  { %8013 = vmatmul.mubr.f32.gmra.mrb[46].mxu0 %v14519_v2  ;;  %v14525_v2 = vld [vmem:[#allocation7_spill] sm:$0xff] }
 0x329   :  { %8015 = vmatprep.mubr.f32.mxu0 %v14520_v48  ;;  %v14526_v48 = vld [vmem:[#allocation21_spill] sm:$0xff] }
 0x32a   :  { %7688 = vmatmul.mubr.f32.vlgmr.msra.gmra.mrb[66].mxu1 %v12060_v60 }
 0x32b   :  { %7690 = vmatprep.mubr.f32.mxu1 %v14522_v30  ;;  %9423 = vmatpush3.bf16.msra.mxu1 %v14469_v10  ;;  %v14527_v10 = vld [vmem:[#allocation13_spill] sm:$0xff]  ;;  %v14528_v30 = vld [vmem:[#allocation22_spill] sm:$0xff] }
 0x32c   :  { %8016 = vmatmul.mubr.f32.gmra.mrb[48].mxu0 %v14521_v46  ;;  %9416 = vmatprep.subr.bf16.mxu1 %v14523_v55 }
 0x32d   :  { %8018 = vmatprep.mubr.f32.mxu0 %v11591_v5 }
 0x32e   :  { %7691 = vmatmul.mubr.f32.gmra.mrb[68].mxu1 %v14524_v19  ;;  %v14529_v19 = vld [vmem:[#allocation16_spill] sm:$0xff] }
 0x32f   :  { %7693 = vmatprep.mubr.f32.mxu1 %v14525_v2  ;;  %9424 = vmatpush3.bf16.msra.mxu1 %v14523_v55  ;;  %v14532_v55 = vld [vmem:[#allocation30_spill] sm:$0xff] }
 0x330   :  { %8019 = vmatmul.mubr.f32.gmra.mrb[50].mxu0 %v11594_v39  ;;  %9417 = vmatprep.subr.bf16.mxu1 %v14526_v48  ;;  %v14535_v2 = vld [vmem:[#allocation34_spill] sm:$0xff] }
 0x331   :  { %8021 = vmatprep.mubr.f32.mxu0 %v11607_v20 }
 0x332   :  { %7694 = vmatmul.mubr.f32.gmra.mrb[70].mxu1 %v11561_v62  ;;  %v14530_v62 = vld [vmem:[#allocation23_spill] sm:$0xff] }
 0x333   :  { %7696 = vmatprep.mubr.f32.mxu1 %v11604_v11  ;;  %9425 = vmatpush3.bf16.msra.mxu1 %v14526_v48  ;;  %v14531_v11 = vld [vmem:[#allocation18_spill] sm:$0xff]  ;;  %v14533_v48 = vld [vmem:[#allocation27_spill] sm:$0xff] }
 0x334   :  { %8022 = vmatmul.mubr.f32.gmra.mrb[52].mxu0 %v11610_v44  ;;  %9418 = vmatprep.subr.bf16.mxu1 %v14528_v30 }
 0x335   :  { %8024 = vmatprep.mubr.f32.mxu0 %v14527_v10 }
 0x336   :  { %7697 = vmatmul.mubr.f32.gmra.mrb[72].mxu1 %v11667_v23  ;;  %v14534_v23 = vld [vmem:[#allocation24_spill] sm:$0xff] }
 0x337   :  { %7699 = vmatprep.mubr.f32.mxu1 %v11680_v26  ;;  %9426 = vmatpush3.bf16.msra.mxu1 %v14528_v30  ;;  %v14536_v26 = vld [vmem:[#allocation32_spill] sm:$0xff]  ;;  %v14538_v30 = vld [vmem:[#allocation29_spill] sm:$0xff] }
 0x338   :  { %8025 = vmatmul.mubr.f32.gmra.mrb[54].mxu0 %v14529_v19  ;;  %9419 = vmatprep.subr.bf16.mxu1 %v14530_v62 }
 0x339   :  { %8027 = vmatprep.mubr.f32.mxu0 %v11631_v34  ;;  %v14537_v34 = vld [vmem:[#allocation35_spill] sm:$0xff] }
 0x33a   :  { %7700 = vmatmul.mubr.f32.gmra.mrb[74].mxu1 %v11696_v12  ;;  %v14539_v12 = vld [vmem:[#allocation25_spill] sm:$0xff] }
 0x33b   :  { %7702 = vmatprep.mubr.f32.mxu1 %v14532_v55  ;;  %9427 = vmatpush3.bf16.msra.mxu1 %v14530_v62  ;;  %v14541_v55 = vld [vmem:[#allocation17_spill] sm:$0xff] }
 0x33c   :  { %8028 = vmatmul.mubr.f32.gmra.mrb[56].mxu0 %v14531_v11  ;;  %9420 = vmatprep.subr.bf16.mxu1 %v14534_v23  ;;  %v14540_v11 = vld [vmem:[#allocation36_spill] sm:$0xff]  ;;  %v14543_v62 = vld [vmem:[#allocation33_spill] sm:$0xff] }
 0x33d   :  { %8030 = vmatprep.mubr.f32.mxu0 %v14533_v48  ;;  %v14542_v48 = vld [vmem:[#allocation37_spill] sm:$0xff] }
 0x33e   :  { %7703 = vmatmul.mubr.f32.gmra.mrb[76].mxu1 %v14535_v2  ;;  %v14544_v2 = vld [vmem:[#allocation26_spill] sm:$0xff] }
 0x33f   :  { %7705 = vmatprep.mubr.f32.mxu1 %v14537_v34  ;;  %9428 = vmatpush3.bf16.msra.mxu1 %v14534_v23  ;;  %v6457_v34 = vld [vmem:[%s14169_s3 + $0x390] sm:$0xff]  ;;  %v14546_v23 = vld [vmem:[#allocation4_spill] sm:$0xff] }
 0x340   :  { %8031 = vmatmul.mubr.f32.gmra.mrb[58].mxu0 %v14536_v26  ;;  %9421 = vmatprep.subr.bf16.mxu1 %v14539_v12  ;;  %v14545_v26 = vld [vmem:[#allocation38_spill] sm:$0xff] }
 0x341   :  { %8033 = vmatprep.mubr.f32.mxu0 %v14538_v30 }
 0x342   :  { %7706 = vmatmul.mubr.f32.gmra.mrb[78].mxu1 %v14540_v11  ;;  %v6458_v11 = vld [vmem:[%s14169_s3 + $0x398] sm:$0xff] }
 0x343   :  { %7708 = vmatprep.mubr.f32.mxu1 %v14542_v48  ;;  %9429 = vmatpush3.bf16.msra.mxu1 %v14539_v12  ;;  %v9131_v48 = vpack.c.bf16 %v6458_v11, %v6457_v34  ;;  %v14548_v12 = vld [vmem:[#allocation40_spill] sm:$0xff]  ;;  %v6467_v34 = vld [vmem:[%s14169_s3 + $0x3e0] sm:$0xff] }
 0x344   :  { %8034 = vmatmul.mubr.f32.gmra.mrb[60].mxu0 %v14541_v55  ;;  %9422 = vmatprep.subr.bf16.mxu1 %v14544_v2  ;;  %v14547_v55 = vld [vmem:[#allocation39_spill] sm:$0xff]  ;;  %v6468_v11 = vld [vmem:[%s14169_s3 + $0x3e8] sm:$0xff] }
 0x345   :  { %8036 = vmatprep.mubr.f32.mxu0 %v14543_v62  ;;  %v6460_v62 = vld [vmem:[%s14169_s3 + $0x3a8] sm:$0xff] }
 0x346   :  { %7709 = vmatmul.mubr.f32.gmra.mrb[80].mxu1 %v14545_v26  ;;  %v6459_v26 = vld [vmem:[%s14169_s3 + $0x3a0] sm:$0xff] }
 0x347   :  { %7711 = vmatprep.mubr.f32.mxu1 %v14547_v55  ;;  %9430 = vmatpush3.bf16.msra.mxu1 %v14544_v2  ;;  %v6461_v55 = vld [vmem:[%s14169_s3 + $0x3b0] sm:$0xff]  ;;  %v6462_v2 = vld [vmem:[%s14169_s3 + $0x3b8] sm:$0xff] }
 0x348   :  { %8037 = vmatmul.mubr.f32.gmra.mrb[62].mxu0 %v14546_v23  ;;  %v14549_v23 = vld [vmem:[#allocation41_spill] sm:$0xff] }
 0x349   :  { %8071 = vmatprep.mubr.f32.mxu0 %v11424_v33  ;;  %v9135_v33 = vpack.c.bf16 %v6460_v62, %v6459_v26  ;;  %v14551_v62 = vld [vmem:[#allocation19_spill] sm:$0xff]  ;;  %v12199_v26 = vld [vmem:[#allocation2 + $0x109] sm:$0xff] }
 0x34a   :  { %7712 = vmatmul.mubr.f32.gmra.mrb[82].mxu1 %v14548_v12  ;;  %v6470_v12 = vld [vmem:[%s14169_s3 + $0x3f8] sm:$0xff] }
 0x34b   :  { %7714 = vmatprep.mubr.f32.mxu1 %v14549_v23  ;;  %v14553_v23 = vld [vmem:[#allocation44_spill] sm:$0xff] }
 0x34c   :  { %8072 = vmatmul.mubr.f32.vlgmr.msra.gmra.mrb[0].mxu0 %v11427_v25  ;;  %v9139_v25 = vpack.c.bf16 %v6462_v2, %v6461_v55  ;;  %v12213_v55 = vld [vmem:[#allocation2 + $0x139] sm:$0xff]  ;;  %v12217_v2 = vld [vmem:[#allocation2 + $0x141] sm:$0xff] }
 0x34d   :  { %8074 = vmatprep.mubr.f32.mxu0 %v11430_v51  ;;  %9130 = vmatpush3.bf16.msra.mxu0 %v11993_v3  ;;  %v6463_v51 = vld [vmem:[%s14169_s3 + $0x3c0] sm:$0xff]  ;;  %v6466_v3 = vld [vmem:[%s14169_s3 + $0x3d8] sm:$0xff] }
 0x34e   :  { %9132 = vmatprep.subr.bf16.mxu0 %v9131_v48  ;;  %7715 = vmatmul.mubr.f32.gmra.mrb[84].mxu1 %v11797_v47  ;;  %v6464_v47 = vld [vmem:[%s14169_s3 + $0x3c8] sm:$0xff] }
 0x34f   :  { %7717 = vmatprep.mubr.f32.mxu1 %v11814_v16 }
 0x350   :  { %8075 = vmatmul.mubr.f32.gmra.mrb[2].mxu0 %v11433_v22  ;;  %v6465_v22 = vld [vmem:[%s14169_s3 + $0x3d0] sm:$0xff] }
 0x351   :  { %8077 = vmatprep.mubr.f32.mxu0 %v11436_v4  ;;  %9134 = vmatpush3.bf16.msra.mxu0 %v9131_v48  ;;  %v9143_v4 = vpack.c.bf16 %v6464_v47, %v6463_v51  ;;  %v6469_v48 = vld [vmem:[%s14169_s3 + $0x3f0] sm:$0xff]  ;;  %v14559_v51 = vld [vmem:[#allocation52_spill] sm:$0xff] }
 0x352   :  { %9136 = vmatprep.subr.bf16.mxu0 %v9135_v33  ;;  %7718 = vmatmul.mubr.f32.gmra.mrb[86].mxu1 %v11824_v36  ;;  %v12227_v47 = vld [vmem:[#allocation2 + $0x169] sm:$0xff] }
 0x353   :  { %7720 = vmatprep.mubr.f32.mxu1 %v11827_v15  ;;  %14560 = vst [vmem:[#allocation14_spill] sm:$0xff] %v12227_v47 }
 0x354   :  { %8078 = vmatmul.mubr.f32.gmra.mrb[4].mxu0 %v11439_v56  ;;  %v14550_v56 = vld [vmem:[#allocation42_spill] sm:$0xff] }
 0x355   :  { %8080 = vmatprep.mubr.f32.mxu0 %v11442_v42  ;;  %9138 = vmatpush3.bf16.msra.mxu0 %v9135_v33  ;;  %v9147_v42 = vpack.c.bf16 %v6466_v3, %v6465_v22  ;;  %v12203_v33 = vld [vmem:[#allocation2 + $0x111] sm:$0xff] }
 0x356   :  { %9140 = vmatprep.subr.bf16.mxu0 %v9139_v25  ;;  %7721 = vmatmul.mubr.f32.gmra.mrb[88].mxu1 %v11838_v52  ;;  %v12231_v22 = vld [vmem:[#allocation2 + $0x171] sm:$0xff] }
 0x357   :  { %7723 = vmatprep.mubr.f32.mxu1 %v14550_v56  ;;  %14562 = vst [vmem:[#allocation6_spill] sm:$0xff] %v12231_v22  ;;  %v14563_v3 = vld [vmem:[#allocation54_spill] sm:$0xff] }
 0x358   :  { %8081 = vmatmul.mubr.f32.gmra.mrb[6].mxu0 %v11445_v45  ;;  %v14552_v45 = vld [vmem:[#allocation43_spill] sm:$0xff] }
 0x359   :  { %8083 = vmatprep.mubr.f32.mxu0 %v11448_v32  ;;  %9142 = vmatpush3.bf16.msra.mxu0 %v9139_v25  ;;  %v9151_v32 = vpack.c.bf16 %v6468_v11, %v6467_v34  ;;  %v14558_v25 = vld [vmem:[#allocation51_spill] sm:$0xff]  ;;  %v9965_v34 = vld [vmem:[#allocation2 + $0x1c9] sm:$0xff] }
 0x35a   :  { %9144 = vmatprep.subr.bf16.mxu0 %v9143_v4  ;;  %7724 = vmatmul.mubr.f32.gmra.mrb[90].mxu1 %v14551_v62  ;;  %v6471_v11 = vld [vmem:[%s14169_s3 + $0x100] sm:$0xff] }
 0x35b   :  { %7726 = vmatprep.mubr.f32.mxu1 %v14552_v45 }
 0x35c   :  { %8084 = vmatmul.mubr.f32.gmra.mrb[8].mxu0 %v11451_v50  ;;  %v9155_v50 = vpack.c.bf16 %v6470_v12, %v6469_v48  ;;  %v14566_v48 = vld [vmem:[#allocation55_spill] sm:$0xff] }
 0x35d   :  { %8086 = vmatprep.mubr.f32.mxu0 %v11456_v14  ;;  %9146 = vmatpush3.bf16.msra.mxu0 %v9143_v4  ;;  %v14554_v14 = vld [vmem:[#allocation45_spill] sm:$0xff] }
 0x35e   :  { %9148 = vmatprep.subr.bf16.mxu0 %v9147_v42  ;;  %7727 = vmatmul.mubr.f32.gmra.mrb[92].mxu1 %v14553_v23  ;;  %v14561_v4 = vld [vmem:[#allocation53_spill] sm:$0xff] }
 0x35f   :  { %7729 = vmatprep.mubr.f32.mxu1 %v11870_v0 }
 0x360   :  { %8087 = vmatmul.mubr.f32.gmra.mrb[10].mxu0 %v11459_v29  ;;  %v12185_v29 = vld [vmem:[#allocation2 + $0xd9] sm:$0xff] }
 0x361   :  { %8089 = vmatprep.mubr.f32.mxu0 %v11462_v63  ;;  %9150 = vmatpush3.bf16.msra.mxu0 %v9147_v42  ;;  %v12189_v63 = vld [vmem:[#allocation2 + $0xe1] sm:$0xff]  ;;  %v12239_v42 = vld [vmem:[#allocation2 + $0x189] sm:$0xff] }
 0x362   :  { %9152 = vmatprep.subr.bf16.mxu0 %v9151_v32  ;;  %7730 = vmatmul.mubr.f32.gmra.mrb[94].mxu1 %v14554_v14  ;;  %14565 = vst [vmem:[#allocation5_spill] sm:$0xff] %v12239_v42 }
 0x363   :  { %7732 = vmatprep.mubr.f32.mxu1 %v11884_v27 }
 0x364   :  { %8090 = vmatmul.mubr.f32.gmra.mrb[12].mxu0 %v11465_v8  ;;  %v14555_v8 = vld [vmem:[#allocation48_spill] sm:$0xff] }
 0x365   :  { %8092 = vmatprep.mubr.f32.mxu0 %v11472_v1  ;;  %9154 = vmatpush3.bf16.msra.mxu0 %v9151_v32  ;;  %v12195_v1 = vld [vmem:[#allocation2 + $0xf9] sm:$0xff]  ;;  %v6472_v32 = vld [vmem:[%s14169_s3 + $0x108] sm:$0xff] }
 0x366   :  { %9156 = vmatprep.subr.bf16.mxu0 %v9155_v50  ;;  %7733 = vmatmul.mubr.f32.gmra.mrb[96].mxu1 %v11895_v59  ;;  %v12250_v12 = vpack.c.bf16 %v6472_v32, %v6471_v11  ;;  %v14571_v11 = vld [vmem:[#allocation57_spill] sm:$0xff]  ;;  %v12264_v32 = vld [vmem:[#allocation2 + $0x201] sm:$0xff] }
 0x367   :  { %7735 = vmatprep.mubr.f32.mxu1 %v12060_v60  ;;  %14572 = vst [vmem:[#allocation13_spill] sm:$0xff] %v12264_v32 }
 0x368   :  { %8093 = vmatmul.mubr.f32.gmra.mrb[14].mxu0 %v11475_v13  ;;  %v14556_v13 = vld [vmem:[#allocation49_spill] sm:$0xff] }
 0x369   :  { %8095 = vmatprep.mubr.f32.mxu0 %v12185_v29  ;;  %9158 = vmatpush3.bf16.msra.mxu0 %v9155_v50  ;;  %v9966_v50 = vld [vmem:[#allocation2 + $0x1d1] sm:$0xff] }
 0x36a   :  { %7736 = vmatmul.mubr.f32.gmra.mrb[98].mxu1 %v12060_v60  ;;  %9160 = vmatprep.subr.bf16.mxu0 %v12250_v12 }
 0x36b   :  { %7738 = vmatprep.mubr.f32.mxu1 %v11906_v38  ;;  %v14557_v38 = vld [vmem:[#allocation50_spill] sm:$0xff] }
 0x36c   :  { %8096 = vmatmul.mubr.f32.gmra.mrb[16].mxu0 %v12189_v63 }
 0x36d   :  { %8098 = vmatprep.mubr.f32.mxu0 %v11484_v28  ;;  %v12209_v28 = vld [vmem:[#allocation2 + $0x129] sm:$0xff] }
 0x36e   :  { %7739 = vmatmul.mubr.f32.gmra.mrb[100].mxu1 %v14555_v8  ;;  %v14567_v8 = vld [vmem:[#allocation56_spill] sm:$0xff] }
 0x36f   :  { %7741 = vmatprep.mubr.f32.mxu1 %v14556_v13 }
 0x370   :  { %8099 = vmatmul.mubr.f32.gmra.mrb[18].mxu0 %v12195_v1 }
 0x371   :  { %8101 = vmatprep.mubr.f32.mxu0 %v12199_v26 }
 0x372   :  { %7742 = vmatmul.mubr.f32.gmra.mrb[102].mxu1 %v11920_v41 }
 0x373   :  { %7744 = vmatprep.mubr.f32.mxu1 %v14557_v38 }
 0x374   :  { %8102 = vmatmul.mubr.f32.gmra.mrb[20].mxu0 %v12203_v33 }
 0x375   :  { %8104 = vmatprep.mubr.f32.mxu0 %v11494_v40  ;;  %v12223_v40 = vld [vmem:[#allocation2 + $0x159] sm:$0xff] }
 0x376   :  { %7745 = vmatmul.mubr.f32.gmra.mrb[104].mxu1 %v11929_v17 }
 0x377   :  { %7747 = vmatprep.mubr.f32.mxu1 %v11932_v37 }
 0x378   :  { %8105 = vmatmul.mubr.f32.gmra.mrb[22].mxu0 %v12209_v28 }
 0x379   :  { %8107 = vmatprep.mubr.f32.mxu0 %v12213_v55 }
 0x37a   :  { %7748 = vmatmul.mubr.f32.gmra.mrb[106].mxu1 %v11939_v43 }
 0x37b   :  { %7750 = vmatprep.mubr.f32.mxu1 %v14558_v25 }
 0x37c   :  { %8108 = vmatmul.mubr.f32.gmra.mrb[24].mxu0 %v12217_v2 }
 0x37d   :  { %8110 = vmatprep.mubr.f32.mxu0 %v11506_v31  ;;  %v12235_v31 = vld [vmem:[#allocation2 + $0x181] sm:$0xff] }
 0x37e   :  { %7751 = vmatmul.mubr.f32.gmra.mrb[108].mxu1 %v11948_v49  ;;  %14564 = vst [vmem:[#allocation20_spill] sm:$0xff] %v12235_v31 }
 0x37f   :  { %7753 = vmatprep.mubr.f32.mxu1 %v14559_v51 }
 0x380   :  { %8111 = vmatmul.mubr.f32.gmra.mrb[26].mxu0 %v12223_v40 }
 0x381   :  { %8113 = vmatprep.mubr.f32.mxu0 %v12227_v47  ;;  %v14582_v47 = vld [vmem:[#allocation11_spill] sm:$0xff] }
 0x382   :  { %7754 = vmatmul.mubr.f32.gmra.mrb[110].mxu1 %v14561_v4 }
 0x383   :  { %7756 = vmatprep.mubr.f32.mxu1 %v14563_v3 }
 0x384   :  { %8114 = vmatmul.mubr.f32.gmra.mrb[28].mxu0 %v12231_v22  ;;  %v14581_v22 = vld [vmem:[#allocation60_spill] sm:$0xff] }
 0x385   :  { %8116 = vmatprep.mubr.f32.mxu0 %v12235_v31  ;;  %v12260_v31 = vld [vmem:[#allocation2 + $0x1f9] sm:$0xff] }
 0x386   :  { %7757 = vmatmul.mubr.f32.gmra.mrb[112].mxu1 %v11967_v61  ;;  %14570 = vst [vmem:[#allocation21_spill] sm:$0xff] %v12260_v31 }
 0x387   :  { %7759 = vmatprep.mubr.f32.mxu1 %v11970_v58 }
 0x388   :  { %8117 = vmatmul.mubr.f32.gmra.mrb[30].mxu0 %v12239_v42  ;;  %v14569_v42 = vld [vmem:[#allocation9_spill] sm:$0xff] }
 0x389   :  { %8119 = vmatprep.mubr.f32.mxu0 %v9965_v34  ;;  %v12256_v34 = vld [vmem:[#allocation2 + $0x1e9] sm:$0xff] }
 0x38a   :  { %7760 = vmatmul.mubr.f32.gmra.mrb[114].mxu1 %v14566_v48  ;;  %14568 = vst [vmem:[#allocation7_spill] sm:$0xff] %v12256_v34 }
 0x38b   :  { %7762 = vmatprep.mubr.f32.mxu1 %v14567_v8 }
 0x38c   :  { %8120 = vmatmul.mubr.f32.gmra.mrb[32].mxu0 %v9966_v50  ;;  %v12272_v50 = vld [vmem:[#allocation2 + $0x229] sm:$0xff] }
 0x38d   :  { %8122 = vmatprep.mubr.f32.mxu0 %v14502_v18  ;;  %v14573_v18 = vld [vmem:[#allocation58_spill] sm:$0xff]  ;;  %14574 = vst [vmem:[#allocation22_spill] sm:$0xff] %v12272_v50 }
 0x38e   :  { %7763 = vmatmul.mubr.f32.gmra.mrb[116].mxu1 %v11991_v54 }
 0x38f   :  { %7765 = vmatprep.mubr.f32.mxu1 %v14569_v42 }
 0x390   :  { %8123 = vmatmul.mubr.f32.gmra.mrb[34].mxu0 %v12256_v34  ;;  %v12276_v34 = vld [vmem:[#allocation2 + $0x231] sm:$0xff] }
 0x391   :  { %8125 = vmatprep.mubr.f32.mxu0 %v12260_v31  ;;  %v14575_v31 = vld [vmem:[#allocation3_spill] sm:$0xff]  ;;  %14576 = vst [vmem:[#allocation16_spill] sm:$0xff] %v12276_v34 }
 0x392   :  { %7766 = vmatmul.mubr.f32.gmra.mrb[118].mxu1 %v14571_v11 }
 0x393   :  { %7768 = vmatprep.mubr.f32.mxu1 %v14573_v18 }
 0x394   :  { %8126 = vmatmul.mubr.f32.gmra.mrb[36].mxu0 %v12264_v32  ;;  %v14579_v32 = vld [vmem:[#allocation8_spill] sm:$0xff] }
 0x395   :  { %8128 = vmatprep.mubr.f32.mxu0 %v11547_v24  ;;  %v14577_v24 = vld [vmem:[#allocation12_spill] sm:$0xff] }
 0x396   :  { %7769 = vmatmul.mubr.f32.gmra.mrb[120].mxu1 %v12011_v9 }
 0x397   :  { %7771 = vmatprep.mubr.f32.mxu1 %v12014_v35 }
 0x398   :  { %8129 = vmatmul.mubr.f32.gmra.mrb[38].mxu0 %v14510_v53  ;;  %v14578_v53 = vld [vmem:[#allocation59_spill] sm:$0xff] }
 0x399   :  { %8131 = vmatprep.mubr.f32.mxu0 %v12272_v50  ;;  %v14580_v50 = vld [vmem:[#allocation31_spill] sm:$0xff] }
 0x39a   :  { %7772 = vmatmul.mubr.f32.gmra.mrb[122].mxu1 %v14575_v31 }
 0x39b   :  { %7774 = vmatprep.mubr.f32.mxu1 %v12024_v6 }
 0x39c   :  { %8132 = vmatmul.mubr.f32.gmra.mrb[40].mxu0 %v12276_v34  ;;  %v14583_v34 = vld [vmem:[#allocation61_spill] sm:$0xff] }
 0x39d   :  { %8134 = vmatprep.mubr.f32.mxu0 %v11564_v57  ;;  %v14588_v57 = vld [vmem:[#allocation17_spill] sm:$0xff] }
 0x39e   :  { %7775 = vmatmul.mubr.f32.gmra.mrb[124].mxu1 %v14577_v24 }
 0x39f   :  { %7777 = vmatprep.mubr.f32.mxu1 %v14578_v53 }
 0x3a0   :  { %8135 = vmatmul.mubr.f32.gmra.mrb[42].mxu0 %v11567_v21  ;;  %v14586_v21 = vld [vmem:[#allocation27_spill] sm:$0xff] }
 0x3a1   :  { %8137 = vmatprep.mubr.f32.mxu0 %v14517_v7 }
 0x3a2   :  { %7778 = vmatmul.mubr.f32.gmra.mrb[126].mxu1 %v14579_v32 }
 0x3a3   :  { %7780 = vmatprep.mubr.f32.mxu1 %v14581_v22 }
 0x3a4   :  { %8138 = vmatmul.mubr.f32.gmra.mrb[44].mxu0 %v14580_v50  ;;  %v6482_v50 = vld [vmem:[%s14169_s3 + $0x158] sm:$0xff] }
 0x3a5   :  { %8140 = vmatprep.mubr.f32.mxu0 %v14582_v47  ;;  %v9977_v47 = vld [vmem:[#allocation2 + $0x69] sm:$0xff] }
 0x3a6   :  { %7781 = vmatmul.mubr.f32.gmra.mrb[128].mxu1 %v14583_v34 }
 0x3a7   :  { %7839 = vmatprep.mubr.f32.mxu1 %v11814_v16  ;;  %v14590_v16 = vld [vmem:[#allocation33_spill] sm:$0xff] }
 0x3a8   :  { %8141 = vmatmul.mubr.f32.gmra.mrb[46].mxu0 %v14521_v46  ;;  %v9972_v46 = vld [vmem:[#allocation2 + $0x31] sm:$0xff] }
 0x3a9   :  { %8143 = vmatprep.mubr.f32.mxu0 %v11591_v5  ;;  %v14584_v5 = vld [vmem:[#allocation15_spill] sm:$0xff] }
 0x3aa   :  { %7840 = vmatmul.mubr.f32.vlgmr.msra.gmra.mrb[82].mxu1 %v11824_v36  ;;  %v14591_v36 = vld [vmem:[#allocation47_spill] sm:$0xff] }
 0x3ab   :  { %7842 = vmatprep.mubr.f32.mxu1 %v11827_v15  ;;  %v14592_v15 = vld [vmem:[#allocation4_spill] sm:$0xff] }
 0x3ac   :  { %8144 = vmatmul.mubr.f32.gmra.mrb[48].mxu0 %v11594_v39  ;;  %v14585_v39 = vld [vmem:[#allocation18_spill] sm:$0xff] }
 0x3ad   :  { %8146 = vmatprep.mubr.f32.mxu0 %v11607_v20  ;;  %v14589_v20 = vld [vmem:[#allocation46_spill] sm:$0xff] }
 0x3ae   :  { %7843 = vmatmul.mubr.f32.gmra.mrb[84].mxu1 %v11838_v52  ;;  %v12319_v52 = vld [vmem:[#allocation2 + $0x331] sm:$0xff] }
 0x3af   :  { %7845 = vmatprep.mubr.f32.mxu1 %v14550_v56  ;;  %v9974_v56 = vld [vmem:[#allocation2 + $0x49] sm:$0xff] }
 0x3b0   :  { %8147 = vmatmul.mubr.f32.gmra.mrb[50].mxu0 %v11610_v44  ;;  %v14587_v44 = vld [vmem:[#allocation32_spill] sm:$0xff] }
 0x3b1   :  { %8149 = vmatprep.mubr.f32.mxu0 %v14527_v10  ;;  %v6475_v10 = vld [vmem:[%s14169_s3 + $0x120] sm:$0xff] }
 0x3b2   :  { %7846 = vmatmul.mubr.f32.gmra.mrb[86].mxu1 %v14551_v62 }
 0x3b3   :  { %7848 = vmatprep.mubr.f32.mxu1 %v14552_v45  ;;  %v6478_v45 = vld [vmem:[%s14169_s3 + $0x138] sm:$0xff] }
 0x3b4   :  { %8150 = vmatmul.mubr.f32.gmra.mrb[52].mxu0 %v14529_v19  ;;  %v6476_v19 = vld [vmem:[%s14169_s3 + $0x128] sm:$0xff] }
 0x3b5   :  { %8152 = vmatprep.mubr.f32.mxu0 %v14584_v5  ;;  %v9167_v62 = vpack.c.bf16 %v6476_v19, %v6475_v10  ;;  %v9979_v5 = vld [vmem:[#allocation2 + $0x81] sm:$0xff]  ;;  %v9991_v19 = vld [vmem:[#allocation2 + $0x219] sm:$0xff] }
 0x3b6   :  { %7849 = vmatmul.mubr.f32.gmra.mrb[88].mxu1 %v14553_v23  ;;  %v9975_v23 = vld [vmem:[#allocation2 + $0x51] sm:$0xff] }
 0x3b7   :  { %7851 = vmatprep.mubr.f32.mxu1 %v11870_v0  ;;  %v12324_v0 = vld [vmem:[#allocation2 + $0x339] sm:$0xff] }
 0x3b8   :  { %8153 = vmatmul.mubr.f32.gmra.mrb[54].mxu0 %v14585_v39 }
 0x3b9   :  { %8155 = vmatprep.mubr.f32.mxu0 %v14586_v21  ;;  %v6484_v21 = vld [vmem:[%s14169_s3 + $0x168] sm:$0xff] }
 0x3ba   :  { %7852 = vmatmul.mubr.f32.gmra.mrb[90].mxu1 %v14554_v14  ;;  %v9976_v14 = vld [vmem:[#allocation2 + $0x61] sm:$0xff] }
 0x3bb   :  { %7854 = vmatprep.mubr.f32.mxu1 %v11884_v27  ;;  %v6473_v27 = vld [vmem:[%s14169_s3 + $0x110] sm:$0xff] }
 0x3bc   :  { %8156 = vmatmul.mubr.f32.gmra.mrb[56].mxu0 %v14587_v44  ;;  %v9981_v44 = vld [vmem:[#allocation2 + $0x99] sm:$0xff] }
 0x3bd   :  { %8158 = vmatprep.mubr.f32.mxu0 %v14538_v30  ;;  %v9973_v30 = vld [vmem:[#allocation2 + $0x39] sm:$0xff] }
 0x3be   :  { %7855 = vmatmul.mubr.f32.gmra.mrb[92].mxu1 %v11895_v59  ;;  %v6474_v59 = vld [vmem:[%s14169_s3 + $0x118] sm:$0xff] }
 0x3bf   :  { %7857 = vmatprep.mubr.f32.mxu1 %v14589_v20  ;;  %v9163_v7 = vpack.c.bf16 %v6474_v59, %v6473_v27  ;;  %v6486_v20 = vld [vmem:[%s14169_s3 + $0x178] sm:$0xff]  ;;  %v14612_v59 = vld [vmem:[#allocation13_spill] sm:$0xff] }
 0x3c0   :  { %8159 = vmatmul.mubr.f32.gmra.mrb[58].mxu0 %v14588_v57 }
 0x3c1   :  { %8161 = vmatprep.mubr.f32.mxu0 %v14590_v16  ;;  %v9983_v16 = vld [vmem:[#allocation2 + $0xb1] sm:$0xff] }
 0x3c2   :  { %7858 = vmatmul.mubr.f32.gmra.mrb[94].mxu1 %v14591_v36 }
 0x3c3   :  { %7860 = vmatprep.mubr.f32.mxu1 %v12060_v60 }
 0x3c4   :  { %8162 = vmatmul.mubr.f32.gmra.mrb[60].mxu0 %v14592_v15 }
 0x3c5   :  { %8164 = vmatprep.mubr.f32.mxu0 %v12319_v52 }
 0x3c6   :  { %7861 = vmatmul.mubr.f32.gmra.mrb[96].mxu1 %v12060_v60 }
 0x3c7   :  { %7863 = vmatprep.mubr.f32.mxu1 %v14556_v13 }
 0x3c8   :  { %8165 = vmatmul.mubr.f32.gmra.mrb[62].mxu0 %v12324_v0 }
 0x3c9   :  { %8199 = vmatprep.mubr.f32.mxu0 %v9972_v46  ;;  %v9990_v46 = vld [vmem:[#allocation2 + $0x211] sm:$0xff] }
 0x3ca   :  { %7864 = vmatmul.mubr.f32.gmra.mrb[98].mxu1 %v11920_v41  ;;  %v6477_v41 = vld [vmem:[%s14169_s3 + $0x130] sm:$0xff] }
 0x3cb   :  { %7866 = vmatprep.mubr.f32.mxu1 %v14557_v38  ;;  %v9171_v13 = vpack.c.bf16 %v6478_v45, %v6477_v41  ;;  %v6480_v38 = vld [vmem:[%s14169_s3 + $0x148] sm:$0xff] }
 0x3cc   :  { %8200 = vmatmul.mubr.f32.vlgmr.msra.gmra.mrb[0].mxu0 %v9973_v30  ;;  %v14615_v30 = vld [vmem:[#allocation22_spill] sm:$0xff]  ;;  %v14618_v41 = vld [vmem:[#allocation16_spill] sm:$0xff] }
 0x3cd   :  { %8202 = vmatprep.mubr.f32.mxu0 %v9974_v56  ;;  %9162 = vmatpush3.bf16.msra.mxu0 %v12250_v12  ;;  %v9992_v45 = vld [vmem:[#allocation2 + $0x241] sm:$0xff] }
 0x3ce   :  { %9164 = vmatprep.subr.bf16.mxu0 %v9163_v7  ;;  %7867 = vmatmul.mubr.f32.gmra.mrb[100].mxu1 %v11929_v17  ;;  %v6479_v17 = vld [vmem:[%s14169_s3 + $0x140] sm:$0xff] }
 0x3cf   :  { %7869 = vmatprep.mubr.f32.mxu1 %v11932_v37  ;;  %v9978_v37 = vld [vmem:[#allocation2 + $0x79] sm:$0xff]  ;;  %v9175_v12 = vpack.c.bf16 %v6480_v38, %v6479_v17  ;;  %v9995_v38 = vld [vmem:[#allocation2 + $0x261] sm:$0xff] }
 0x3d0   :  { %8203 = vmatmul.mubr.f32.gmra.mrb[2].mxu0 %v9975_v23  ;;  %v9994_v17 = vld [vmem:[#allocation2 + $0x259] sm:$0xff] }
 0x3d1   :  { %8205 = vmatprep.mubr.f32.mxu0 %v9976_v14  ;;  %9166 = vmatpush3.bf16.msra.mxu0 %v9163_v7 }
 0x3d2   :  { %9168 = vmatprep.subr.bf16.mxu0 %v9167_v62  ;;  %7870 = vmatmul.mubr.f32.gmra.mrb[102].mxu1 %v11939_v43  ;;  %v6481_v43 = vld [vmem:[%s14169_s3 + $0x150] sm:$0xff] }
 0x3d3   :  { %7872 = vmatprep.mubr.f32.mxu1 %v14558_v25  ;;  %v9980_v25 = vld [vmem:[#allocation2 + $0x91] sm:$0xff]  ;;  %v9179_v39 = vpack.c.bf16 %v6482_v50, %v6481_v43  ;;  %v10000_v50 = vld [vmem:[#allocation2 + $0x2a1] sm:$0xff] }
 0x3d4   :  { %8206 = vmatmul.mubr.f32.gmra.mrb[4].mxu0 %v9977_v47  ;;  %v9996_v47 = vld [vmem:[#allocation2 + $0x271] sm:$0xff] }
 0x3d5   :  { %8208 = vmatprep.mubr.f32.mxu0 %v9978_v37  ;;  %9170 = vmatpush3.bf16.msra.mxu0 %v9167_v62  ;;  %v9997_v37 = vld [vmem:[#allocation2 + $0x279] sm:$0xff]  ;;  %v9999_v43 = vld [vmem:[#allocation2 + $0x291] sm:$0xff] }
 0x3d6   :  { %9172 = vmatprep.subr.bf16.mxu0 %v9171_v13  ;;  %7873 = vmatmul.mubr.f32.gmra.mrb[104].mxu1 %v11948_v49  ;;  %v6483_v49 = vld [vmem:[%s14169_s3 + $0x160] sm:$0xff] }
 0x3d7   :  { %7875 = vmatprep.mubr.f32.mxu1 %v14559_v51  ;;  %v9982_v51 = vld [vmem:[#allocation2 + $0xa9] sm:$0xff]  ;;  %v9183_v57 = vpack.c.bf16 %v6484_v21, %v6483_v49  ;;  %v10004_v49 = vld [vmem:[#allocation2 + $0x2d1] sm:$0xff]  ;;  %v10005_v21 = vld [vmem:[#allocation2 + $0x2d9] sm:$0xff] }
 0x3d8   :  { %8209 = vmatmul.mubr.f32.gmra.mrb[6].mxu0 %v9979_v5  ;;  %v10001_v5 = vld [vmem:[#allocation2 + $0x2a9] sm:$0xff] }
 0x3d9   :  { %8211 = vmatprep.mubr.f32.mxu0 %v9980_v25  ;;  %9174 = vmatpush3.bf16.msra.mxu0 %v9171_v13  ;;  %v9993_v13 = vld [vmem:[#allocation2 + $0x249] sm:$0xff]  ;;  %v10002_v25 = vld [vmem:[#allocation2 + $0x2b9] sm:$0xff] }
 0x3da   :  { %9176 = vmatprep.subr.bf16.mxu0 %v9175_v12  ;;  %7876 = vmatmul.mubr.f32.gmra.mrb[106].mxu1 %v14561_v4  ;;  %v6485_v4 = vld [vmem:[%s14169_s3 + $0x170] sm:$0xff] }
 0x3db   :  { %7878 = vmatprep.mubr.f32.mxu1 %v14563_v3  ;;  %v9984_v3 = vld [vmem:[#allocation2 + $0xc1] sm:$0xff]  ;;  %v9187_v36 = vpack.c.bf16 %v6486_v20, %v6485_v4  ;;  %v10009_v4 = vld [vmem:[#allocation2 + $0x309] sm:$0xff]  ;;  %v10010_v20 = vld [vmem:[#allocation2 + $0x319] sm:$0xff] }
 0x3dc   :  { %8212 = vmatmul.mubr.f32.gmra.mrb[8].mxu0 %v9981_v44  ;;  %v10006_v44 = vld [vmem:[#allocation2 + $0x2e9] sm:$0xff] }
 0x3dd   :  { %8214 = vmatprep.mubr.f32.mxu0 %v9982_v51  ;;  %9178 = vmatpush3.bf16.msra.mxu0 %v9175_v12  ;;  %v9998_v12 = vld [vmem:[#allocation2 + $0x289] sm:$0xff]  ;;  %v10007_v51 = vld [vmem:[#allocation2 + $0x2f1] sm:$0xff] }
 0x3de   :  { %9180 = vmatprep.subr.bf16.mxu0 %v9179_v39  ;;  %7879 = vmatmul.mubr.f32.gmra.mrb[108].mxu1 %v11967_v61  ;;  %v9985_v61 = vld [vmem:[#allocation2 + $0xc9] sm:$0xff] }
 0x3df   :  { %7881 = vmatprep.mubr.f32.mxu1 %v11970_v58  ;;  %v9986_v58 = vld [vmem:[#allocation2 + $0xf1] sm:$0xff] }
 0x3e0   :  { %8215 = vmatmul.mubr.f32.gmra.mrb[10].mxu0 %v9983_v16  ;;  %v10011_v16 = vld [vmem:[#allocation2 + $0x321] sm:$0xff] }
 0x3e1   :  { %8217 = vmatprep.mubr.f32.mxu0 %v9984_v3  ;;  %9182 = vmatpush3.bf16.msra.mxu0 %v9179_v39  ;;  %v10003_v39 = vld [vmem:[#allocation2 + $0x2c1] sm:$0xff]  ;;  %v2503_v3 = vld [vmem:[#allocation2 + $0x349] sm:$0xff] }
 0x3e2   :  { %9184 = vmatprep.subr.bf16.mxu0 %v9183_v57  ;;  %7882 = vmatmul.mubr.f32.gmra.mrb[110].mxu1 %v14566_v48  ;;  %v14605_v48 = vmov 1.0  }
 0x3e3   :  { %7884 = vmatprep.mubr.f32.mxu1 %v14567_v8  ;;  %v9989_v8 = vld [vmem:[#allocation2 + $0x1e1] sm:$0xff] }
 0x3e4   :  { %8218 = vmatmul.mubr.f32.gmra.mrb[12].mxu0 %v9985_v61  ;;  %v3903_v61 = vld [vmem:[#allocation2 + $0x2] sm:$0xff] }
 0x3e5   :  { %8220 = vmatprep.mubr.f32.mxu0 %v12185_v29  ;;  %9186 = vmatpush3.bf16.msra.mxu0 %v9183_v57  ;;  %v10008_v57 = vld [vmem:[#allocation2 + $0x301] sm:$0xff] }
 0x3e6   :  { %9188 = vmatprep.subr.bf16.mxu0 %v9187_v36  ;;  %7885 = vmatmul.mubr.f32.gmra.mrb[112].mxu1 %v11991_v54  ;;  %v9987_v54 = vld [vmem:[#allocation2 + $0x121] sm:$0xff] }
 0x3e7   :  { %7887 = vmatprep.mubr.f32.mxu1 %v14569_v42 }
 0x3e8   :  { %8221 = vmatmul.mubr.f32.gmra.mrb[14].mxu0 %v12189_v63  ;;  %v14596_v63 = vld [vmem:[#allocation6_spill] sm:$0xff] }
 0x3e9   :  { %8223 = vmatprep.mubr.f32.mxu0 %v9986_v58  ;;  %9190 = vmatpush3.bf16.msra.mxu0 %v9187_v36  ;;  %v2504_v36 = vld [vmem:[#allocation2 + $0x351] sm:$0xff] }
 0x3ea   :  { %7888 = vmatmul.mubr.f32.gmra.mrb[114].mxu1 %v14571_v11  ;;  %v6487_v11 = vld [vmem:[%s14169_s3 + $0x280] sm:$0xff]  ;;  %v6489_v58 = vld [vmem:[%s14169_s3 + $0x290] sm:$0xff] }
 0x3eb   :  { %7890 = vmatprep.mubr.f32.mxu1 %v14573_v18 }
 0x3ec   :  { %8224 = vmatmul.mubr.f32.gmra.mrb[16].mxu0 %v12195_v1  ;;  %v14597_v1 = vld [vmem:[#allocation62_spill] sm:$0xff] }
 0x3ed   :  { %8226 = vmatprep.mubr.f32.mxu0 %v12199_v26  ;;  %v14598_v26 = vld [vmem:[#allocation20_spill] sm:$0xff] }
 0x3ee   :  { %7891 = vmatmul.mubr.f32.gmra.mrb[116].mxu1 %v12011_v9  ;;  %v9988_v9 = vld [vmem:[#allocation2 + $0x151] sm:$0xff] }
 0x3ef   :  { %7893 = vmatprep.mubr.f32.mxu1 %v12014_v35  ;;  %v14593_v35 = vld [vmem:[#allocation14_spill] sm:$0xff] }
 0x3f0   :  { %8227 = vmatmul.mubr.f32.gmra.mrb[18].mxu0 %v12203_v33 }
 0x3f1   :  { %8229 = vmatprep.mubr.f32.mxu0 %v9987_v54  ;;  %v6490_v54 = vld [vmem:[%s14169_s3 + $0x298] sm:$0xff] }
 0x3f2   :  { %7894 = vmatmul.mubr.f32.gmra.mrb[118].mxu1 %v14575_v31 }
 0x3f3   :  { %7896 = vmatprep.mubr.f32.mxu1 %v12024_v6 }
 0x3f4   :  { %8230 = vmatmul.mubr.f32.gmra.mrb[20].mxu0 %v12209_v28  ;;  %v2467_v28 = vld [vmem:[#allocation2 + $0x199] sm:$0xff] }
 0x3f5   :  { %8232 = vmatprep.mubr.f32.mxu0 %v12213_v55 }
 0x3f6   :  { %7897 = vmatmul.mubr.f32.gmra.mrb[120].mxu1 %v14577_v24 }
 0x3f7   :  { %7899 = vmatprep.mubr.f32.mxu1 %v14578_v53  ;;  %v14609_v53 = vld [vmem:[#allocation21_spill] sm:$0xff] }
 0x3f8   :  { %8233 = vmatmul.mubr.f32.gmra.mrb[22].mxu0 %v12217_v2  ;;  %v14601_v2 = vld [vmem:[#allocation10_spill] sm:$0xff] }
 0x3f9   :  { %8235 = vmatprep.mubr.f32.mxu0 %v9988_v9  ;;  %v3904_v9 = vld [vmem:[#allocation2 + $0xa] sm:$0xff] }
 0x3fa   :  { %7900 = vmatmul.mubr.f32.gmra.mrb[122].mxu1 %v14579_v32  ;;  %v6488_v32 = vld [vmem:[%s14169_s3 + $0x288] sm:$0xff] }
 0x3fb   :  { %7902 = vmatprep.mubr.f32.mxu1 %v14581_v22  ;;  %v2468_v22 = vld [vmem:[#allocation2 + $0x1a1] sm:$0xff]  ;;  %v12438_v24 = vpack.c.bf16 %v6488_v32, %v6487_v11 }
 0x3fc   :  { %8236 = vmatmul.mubr.f32.gmra.mrb[24].mxu0 %v12223_v40  ;;  %v14602_v40 = vld [vmem:[#allocation5_spill] sm:$0xff]  ;;  %v6495_v11 = vld [vmem:[%s14169_s3 + $0x2c0] sm:$0xff]  ;;  %v6496_v32 = vld [vmem:[%s14169_s3 + $0x2c8] sm:$0xff] }
 0x3fd   :  { %8238 = vmatprep.mubr.f32.mxu0 %v14593_v35  ;;  %v12407_v29 = vpop.f32.mrb[66].mxu1  ;;  %9192 = vmatprep.subr.bf16.mxu0 %v12438_v24  ;;  %v9195_v35 = vpack.c.bf16 %v6490_v54, %v6489_v58 }
 0x3fe   :  { %14594 = vst [vmem:[#allocation23_spill] sm:$0xff] %v12407_v29  ;;  %v12409_v6 = vpop.f32.mrb[67].mxu1  ;;  %7903 = vmatmul.mubr.f32.gmra.mrb[124].mxu1 %v14583_v34  ;;  %v12762_v29 = vld [vmem:[#allocation2 + $0x31a] sm:$0xff] }
 0x3ff   :  { %14595 = vst [vmem:[#allocation30_spill] sm:$0xff] %v12409_v6  ;;  %7905 = vmatprep.mubr.f32.mxu1 %v14597_v1  ;;  %v12759_v6 = vld [vmem:[#allocation2 + $0x30a] sm:$0xff]  ;;  %14660 = vst [vmem:[#allocation21_spill] sm:$0xff] %v12762_v29 }
 0x400   :  { %8239 = vmatmul.mubr.f32.gmra.mrb[26].mxu0 %v14596_v63  ;;  %v12476_v63 = vld [vmem:[#allocation2 + $0x1a] sm:$0xff] }
 0x401   :  { %8241 = vmatprep.mubr.f32.mxu0 %v14598_v26  ;;  %v12415_v33 = vpop.f32.mrb[68].mxu1  ;;  %v12480_v26 = vld [vmem:[#allocation2 + $0x22] sm:$0xff] }
 0x402   :  { %14599 = vst [vmem:[#allocation24_spill] sm:$0xff] %v12415_v33  ;;  %v12417_v55 = vpop.f32.mrb[69].mxu1  ;;  %7906 = vmatmul.mubr.f32.gmra.mrb[126].mxu1 %v14601_v2  ;;  %v6494_v2 = vld [vmem:[%s14169_s3 + $0x2b8] sm:$0xff]  ;;  %v12752_v33 = vld [vmem:[#allocation2 + $0x302] sm:$0xff] }
 0x403   :  { %14600 = vst [vmem:[#allocation34_spill] sm:$0xff] %v12417_v55  ;;  %7908 = vmatprep.mubr.f32.mxu1 %v12060_v60  ;;  %v12749_v55 = vld [vmem:[#allocation2 + $0x2f2] sm:$0xff]  ;;  %14656 = vst [vmem:[#allocation20_spill] sm:$0xff] %v12752_v33 }
 0x404   :  { %8242 = vmatmul.mubr.f32.gmra.mrb[28].mxu0 %v14602_v40  ;;  %v12489_v40 = vld [vmem:[#allocation2 + $0x32] sm:$0xff]  ;;  %14655 = vst [vmem:[#allocation62_spill] sm:$0xff] %v12749_v55 }
 0x405   :  { %8244 = vmatprep.mubr.f32.mxu0 %v2467_v28  ;;  %v12422_v31 = vpop.f32.mrb[70].mxu1  ;;  %v6493_v28 = vld [vmem:[%s14169_s3 + $0x2b0] sm:$0xff] }
 0x406   :  { %14603 = vst [vmem:[#allocation35_spill] sm:$0xff] %v12422_v31  ;;  %v12424_v42 = vpop.f32.mrb[71].mxu1  ;;  %7909 = vmatmul.mubr.f32.gmra.mrb[128].mxu1 %v12060_v60  ;;  %v14608_v60 = vld [vmem:[#allocation7_spill] sm:$0xff]  ;;  %v12742_v31 = vld [vmem:[#allocation2 + $0x2ea] sm:$0xff] }
 0x407   :  { %14604 = vst [vmem:[#allocation29_spill] sm:$0xff] %v12424_v42  ;;  %5503 = vmatprep.mubr.f32.mxu1 %v14605_v48  ;;  %v12642_v48 = vld [vmem:[#allocation2 + $0x1fa] sm:$0xff]  ;;  %14659 = vst [vmem:[#allocation7_spill] sm:$0xff] %v12759_v6 }
 0x408   :  { %8245 = vmatmul.mubr.f32.gmra.mrb[30].mxu0 %v2468_v22  ;;  %v9203_v22 = vpack.c.bf16 %v6494_v2, %v6493_v28  ;;  %v12599_v28 = vld [vmem:[#allocation2 + $0x16a] sm:$0xff]  ;;  %v12739_v42 = vld [vmem:[#allocation2 + $0x2da] sm:$0xff] }
 0x409   :  { %8247 = vmatprep.mubr.f32.mxu0 %v9989_v8  ;;  %v12428_v34 = vpop.f32.mrb[72].mxu1  ;;  %v12492_v8 = vld [vmem:[#allocation2 + $0x3a] sm:$0xff] }
 0x40a   :  { %14606 = vst [vmem:[#allocation25_spill] sm:$0xff] %v12428_v34  ;;  %v12436_v18 = vpop.f32.mrb[73].mxu1  ;;  %v12732_v34 = vld [vmem:[#allocation2 + $0x2d2] sm:$0xff] }
 0x40b   :  { %14607 = vst [vmem:[#allocation36_spill] sm:$0xff] %v12436_v18  ;;  %v12729_v18 = vld [vmem:[#allocation2 + $0x2c2] sm:$0xff] }
 0x40c   :  { %8248 = vmatmul.mubr.f32.gmra.mrb[32].mxu0 %v14608_v60  ;;  %v9207_v60 = vpack.c.bf16 %v6496_v32, %v6495_v11  ;;  %v12606_v32 = vld [vmem:[#allocation2 + $0x172] sm:$0xff] }
 0x40d   :  { %8250 = vmatprep.mubr.f32.mxu0 %v14609_v53  ;;  %v12443_v15 = vpop.f32.mrb[74].mxu1  ;;  %v12504_v53 = vld [vmem:[#allocation2 + $0x52] sm:$0xff] }
 0x40e   :  { %14610 = vst [vmem:[#allocation37_spill] sm:$0xff] %v12443_v15  ;;  %v12445_v27 = vpop.f32.mrb[75].mxu1  ;;  %v12722_v15 = vld [vmem:[#allocation2 + $0x2ba] sm:$0xff] }
 0x40f   :  { %14611 = vst [vmem:[#allocation26_spill] sm:$0xff] %v12445_v27  ;;  %v12719_v27 = vld [vmem:[#allocation2 + $0x2aa] sm:$0xff] }
 0x410   :  { %8251 = vmatmul.mubr.f32.gmra.mrb[34].mxu0 %v14612_v59  ;;  %v6497_v59 = vld [vmem:[%s14169_s3 + $0x2d0] sm:$0xff] }
 0x411   :  { %8253 = vmatprep.mubr.f32.mxu0 %v9990_v46  ;;  %v12448_v7 = vpop.f32.mrb[76].mxu1  ;;  %v6498_v46 = vld [vmem:[%s14169_s3 + $0x2d8] sm:$0xff] }
 0x412   :  { %14613 = vst [vmem:[#allocation38_spill] sm:$0xff] %v12448_v7  ;;  %v12450_v10 = vpop.f32.mrb[77].mxu1  ;;  %v12712_v7 = vld [vmem:[#allocation2 + $0x2a2] sm:$0xff] }
 0x413   :  { %14614 = vst [vmem:[#allocation39_spill] sm:$0xff] %v12450_v10  ;;  %v12709_v10 = vld [vmem:[#allocation2 + $0x292] sm:$0xff] }
 0x414   :  { %8254 = vmatmul.mubr.f32.gmra.mrb[36].mxu0 %v9991_v19  ;;  %v12513_v19 = vld [vmem:[#allocation2 + $0x62] sm:$0xff] }
 0x415   :  { %8256 = vmatprep.mubr.f32.mxu0 %v14615_v30  ;;  %v12453_v56 = vpop.f32.mrb[78].mxu1  ;;  %v9211_v30 = vpack.c.bf16 %v6498_v46, %v6497_v59  ;;  %v6503_v59 = vld [vmem:[%s14169_s3 + $0x400] sm:$0xff]  ;;  %v6504_v46 = vld [vmem:[%s14169_s3 + $0x408] sm:$0xff] }
 0x416   :  { %14616 = vst [vmem:[#allocation40_spill] sm:$0xff] %v12453_v56  ;;  %v12455_v62 = vpop.f32.mrb[79].mxu1  ;;  %v12702_v56 = vld [vmem:[#allocation2 + $0x28a] sm:$0xff] }
 0x417   :  { %14617 = vst [vmem:[#allocation41_spill] sm:$0xff] %v12455_v62  ;;  %v12699_v62 = vld [vmem:[#allocation2 + $0x27a] sm:$0xff] }
 0x418   :  { %8257 = vmatmul.mubr.f32.gmra.mrb[38].mxu0 %v14618_v41  ;;  %v12516_v41 = vld [vmem:[#allocation2 + $0x6a] sm:$0xff] }
 0x419   :  { %8259 = vmatprep.mubr.f32.mxu0 %v9992_v45  ;;  %v12458_v23 = vpop.f32.mrb[80].mxu1  ;;  %v6499_v45 = vld [vmem:[%s14169_s3 + $0x2e0] sm:$0xff] }
 0x41a   :  { %14619 = vst [vmem:[#allocation42_spill] sm:$0xff] %v12458_v23  ;;  %v12460_v14 = vpop.f32.mrb[81].mxu1  ;;  %v12692_v23 = vld [vmem:[#allocation2 + $0x272] sm:$0xff] }
 0x41b   :  { %14620 = vst [vmem:[#allocation19_spill] sm:$0xff] %v12460_v14  ;;  %v12689_v14 = vld [vmem:[#allocation2 + $0x262] sm:$0xff] }
 0x41c   :  { %8260 = vmatmul.mubr.f32.gmra.mrb[40].mxu0 %v9993_v13  ;;  %v6500_v13 = vld [vmem:[%s14169_s3 + $0x2e8] sm:$0xff] }
 0x41d   :  { %8262 = vmatprep.mubr.f32.mxu0 %v9994_v17  ;;  %v12525_v17 = vld [vmem:[#allocation2 + $0x7a] sm:$0xff] }
 0x420   :  { %8263 = vmatmul.mubr.f32.gmra.mrb[42].mxu0 %v9995_v38  ;;  %v9215_v38 = vpack.c.bf16 %v6500_v13, %v6499_v45  ;;  %v12617_v45 = vpack.c.bf16 %v6504_v46, %v6503_v59  ;;  %v12639_v46 = vld [vmem:[#allocation2 + $0x1ea] sm:$0xff] }
 0x421   :  { %8265 = vmatprep.mubr.f32.mxu0 %v9996_v47  ;;  %v12528_v47 = vld [vmem:[#allocation2 + $0x82] sm:$0xff] }
 0x424   :  { %8266 = vmatmul.mubr.f32.gmra.mrb[44].mxu0 %v9997_v37  ;;  %v6501_v37 = vld [vmem:[%s14169_s3 + $0x2f0] sm:$0xff] }
 0x425   :  { %8268 = vmatprep.mubr.f32.mxu0 %v9998_v12  ;;  %v6502_v12 = vld [vmem:[%s14169_s3 + $0x2f8] sm:$0xff] }
 0x428   :  { %8269 = vmatmul.mubr.f32.gmra.mrb[46].mxu0 %v9999_v43  ;;  %v12537_v43 = vld [vmem:[#allocation2 + $0x92] sm:$0xff] }
 0x429   :  { %8271 = vmatprep.mubr.f32.mxu0 %v10000_v50  ;;  %v9219_v50 = vpack.c.bf16 %v6502_v12, %v6501_v37 }
 0x42c   :  { %8272 = vmatmul.mubr.f32.gmra.mrb[48].mxu0 %v10001_v5  ;;  %v12540_v5 = vld [vmem:[#allocation2 + $0x9a] sm:$0xff] }
 0x42d   :  { %8274 = vmatprep.mubr.f32.mxu0 %v10002_v25  ;;  %v12543_v25 = vld [vmem:[#allocation2 + $0xaa] sm:$0xff] }
 0x430   :  { %8275 = vmatmul.mubr.f32.gmra.mrb[50].mxu0 %v10003_v39  ;;  %v12546_v39 = vld [vmem:[#allocation2 + $0xb2] sm:$0xff] }
 0x431   :  { %8277 = vmatprep.mubr.f32.mxu0 %v10004_v49  ;;  %v12549_v49 = vld [vmem:[#allocation2 + $0xc2] sm:$0xff] }
 0x434   :  { %8278 = vmatmul.mubr.f32.gmra.mrb[52].mxu0 %v10005_v21  ;;  %v12552_v21 = vld [vmem:[#allocation2 + $0xca] sm:$0xff] }
 0x435   :  { %8280 = vmatprep.mubr.f32.mxu0 %v10006_v44  ;;  %v12555_v44 = vld [vmem:[#allocation2 + $0xda] sm:$0xff] }
 0x438   :  { %8281 = vmatmul.mubr.f32.gmra.mrb[54].mxu0 %v10007_v51  ;;  %v12558_v51 = vld [vmem:[#allocation2 + $0xe2] sm:$0xff] }
 0x439   :  { %8283 = vmatprep.mubr.f32.mxu0 %v10008_v57  ;;  %v12561_v57 = vld [vmem:[#allocation2 + $0xf2] sm:$0xff] }
 0x43c   :  { %8284 = vmatmul.mubr.f32.gmra.mrb[56].mxu0 %v10009_v4  ;;  %v12564_v4 = vld [vmem:[#allocation2 + $0xfa] sm:$0xff] }
 0x43d   :  { %8286 = vmatprep.mubr.f32.mxu0 %v10010_v20  ;;  %v12567_v20 = vld [vmem:[#allocation2 + $0x10a] sm:$0xff] }
 0x440   :  { %8287 = vmatmul.mubr.f32.gmra.mrb[58].mxu0 %v10011_v16  ;;  %v12570_v16 = vld [vmem:[#allocation2 + $0x112] sm:$0xff] }
 0x441   :  { %8289 = vmatprep.mubr.f32.mxu0 %v12319_v52  ;;  %v6491_v52 = vld [vmem:[%s14169_s3 + $0x2a0] sm:$0xff] }
 0x444   :  { %8290 = vmatmul.mubr.f32.gmra.mrb[60].mxu0 %v12324_v0  ;;  %v6492_v0 = vld [vmem:[%s14169_s3 + $0x2a8] sm:$0xff] }
 0x445   :  { %8292 = vmatprep.mubr.f32.mxu0 %v2503_v3  ;;  %v9199_v1 = vpack.c.bf16 %v6492_v0, %v6491_v52  ;;  %v12573_v3 = vld [vmem:[#allocation2 + $0x122] sm:$0xff] }
 0x448   :  { %8293 = vmatmul.mubr.f32.gmra.mrb[62].mxu0 %v2504_v36  ;;  %v12576_v36 = vld [vmem:[#allocation2 + $0x12a] sm:$0xff] }
 0x449   :  { %8327 = vmatprep.mubr.f32.mxu0 %v3903_v61  ;;  %v12579_v61 = vld [vmem:[#allocation2 + $0x13a] sm:$0xff] }
 0x44c   :  { %8328 = vmatmul.mubr.f32.vlgmr.msra.gmra.mrb[0].mxu0 %v3904_v9  ;;  %v12586_v9 = vld [vmem:[#allocation2 + $0x142] sm:$0xff] }
 0x44d   :  { %8330 = vmatprep.mubr.f32.mxu0 %v12476_v63  ;;  %9194 = vmatpush3.bf16.msra.mxu0 %v12438_v24  ;;  %v12501_v24 = vld [vmem:[#allocation2 + $0x4a] sm:$0xff] }
 0x44e   :  { %9196 = vmatprep.subr.bf16.mxu0 %v9195_v35 }
 0x450   :  { %8331 = vmatmul.mubr.f32.gmra.mrb[2].mxu0 %v12480_v26 }
 0x451   :  { %8333 = vmatprep.mubr.f32.mxu0 %v12489_v40  ;;  %9198 = vmatpush3.bf16.msra.mxu0 %v9195_v35  ;;  %v12589_v35 = vld [vmem:[#allocation2 + $0x152] sm:$0xff] }
 0x452   :  { %9200 = vmatprep.subr.bf16.mxu0 %v9199_v1 }
 0x454   :  { %8334 = vmatmul.mubr.f32.gmra.mrb[4].mxu0 %v12492_v8 }
 0x455   :  { %8336 = vmatprep.mubr.f32.mxu0 %v12501_v24  ;;  %9202 = vmatpush3.bf16.msra.mxu0 %v9199_v1  ;;  %v12596_v1 = vld [vmem:[#allocation2 + $0x15a] sm:$0xff] }
 0x456   :  { %9204 = vmatprep.subr.bf16.mxu0 %v9203_v22 }
 0x458   :  { %8337 = vmatmul.mubr.f32.gmra.mrb[6].mxu0 %v12504_v53 }
 0x459   :  { %8339 = vmatprep.mubr.f32.mxu0 %v12513_v19  ;;  %9206 = vmatpush3.bf16.msra.mxu0 %v9203_v22  ;;  %v3939_v22 = vld [vmem:[#allocation2 + $0x1b2] sm:$0xff] }
 0x45a   :  { %9208 = vmatprep.subr.bf16.mxu0 %v9207_v60 }
 0x45c   :  { %8340 = vmatmul.mubr.f32.gmra.mrb[8].mxu0 %v12516_v41 }
 0x45d   :  { %8342 = vmatprep.mubr.f32.mxu0 %v12525_v17  ;;  %9210 = vmatpush3.bf16.msra.mxu0 %v9207_v60  ;;  %v3940_v60 = vld [vmem:[#allocation2 + $0x1ba] sm:$0xff] }
 0x45e   :  { %9212 = vmatprep.subr.bf16.mxu0 %v9211_v30 }
 0x460   :  { %8343 = vmatmul.mubr.f32.gmra.mrb[10].mxu0 %v12528_v47 }
 0x461   :  { %8345 = vmatprep.mubr.f32.mxu0 %v12537_v43  ;;  %9214 = vmatpush3.bf16.msra.mxu0 %v9211_v30 }
 0x462   :  { %9216 = vmatprep.subr.bf16.mxu0 %v9215_v38 }
 0x464   :  { %8346 = vmatmul.mubr.f32.gmra.mrb[12].mxu0 %v12540_v5 }
 0x465   :  { %8348 = vmatprep.mubr.f32.mxu0 %v12543_v25  ;;  %9218 = vmatpush3.bf16.msra.mxu0 %v9215_v38  ;;  %v12621_v38 = vld [vmem:[#allocation2 + $0x1ca] sm:$0xff] }
 0x466   :  { %9220 = vmatprep.subr.bf16.mxu0 %v9219_v50 }
 0x468   :  { %8349 = vmatmul.mubr.f32.gmra.mrb[14].mxu0 %v12546_v39 }
 0x469   :  { %8351 = vmatprep.mubr.f32.mxu0 %v12549_v49  ;;  %9222 = vmatpush3.bf16.msra.mxu0 %v9219_v50  ;;  %v12629_v50 = vld [vmem:[#allocation2 + $0x1d2] sm:$0xff] }
 0x46a   :  { %9224 = vmatprep.subr.bf16.mxu0 %v12617_v45 }
 0x46c   :  { %8352 = vmatmul.mubr.f32.gmra.mrb[16].mxu0 %v12552_v21 }
 0x46d   :  { %8354 = vmatprep.mubr.f32.mxu0 %v12555_v44 }
 0x470   :  { %8355 = vmatmul.mubr.f32.gmra.mrb[18].mxu0 %v12558_v51 }
 0x471   :  { %8357 = vmatprep.mubr.f32.mxu0 %v12561_v57 }
 0x474   :  { %8358 = vmatmul.mubr.f32.gmra.mrb[20].mxu0 %v12564_v4 }
 0x475   :  { %8360 = vmatprep.mubr.f32.mxu0 %v12567_v20 }
 0x478   :  { %8361 = vmatmul.mubr.f32.gmra.mrb[22].mxu0 %v12570_v16 }
 0x479   :  { %8363 = vmatprep.mubr.f32.mxu0 %v12573_v3 }
 0x47c   :  { %8364 = vmatmul.mubr.f32.gmra.mrb[24].mxu0 %v12576_v36 }
 0x47d   :  { %8366 = vmatprep.mubr.f32.mxu0 %v12579_v61  ;;  %v12582_v58 = vpop.f32.mrb[82].mxu1 }
 0x47e   :  { %14621 = vst [vmem:[#allocation43_spill] sm:$0xff] %v12582_v58  ;;  %v12584_v54 = vpop.f32.mrb[83].mxu1  ;;  %v12682_v58 = vld [vmem:[#allocation2 + $0x25a] sm:$0xff] }
 0x47f   :  { %14622 = vst [vmem:[#allocation44_spill] sm:$0xff] %v12584_v54  ;;  %v12679_v54 = vld [vmem:[#allocation2 + $0x24a] sm:$0xff] }
 0x480   :  { %8367 = vmatmul.mubr.f32.gmra.mrb[26].mxu0 %v12586_v9 }
 0x481   :  { %8369 = vmatprep.mubr.f32.mxu0 %v12589_v35  ;;  %v12592_v52 = vpop.f32.mrb[84].mxu1 }
 0x482   :  { %14623 = vst [vmem:[#allocation45_spill] sm:$0xff] %v12592_v52  ;;  %v12594_v0 = vpop.f32.mrb[85].mxu1  ;;  %v12672_v52 = vld [vmem:[#allocation2 + $0x242] sm:$0xff] }
 0x483   :  { %14624 = vst [vmem:[#allocation48_spill] sm:$0xff] %v12594_v0  ;;  %v12669_v0 = vld [vmem:[#allocation2 + $0x232] sm:$0xff] }
 0x484   :  { %8370 = vmatmul.mubr.f32.gmra.mrb[28].mxu0 %v12596_v1 }
 0x485   :  { %8372 = vmatprep.mubr.f32.mxu0 %v12599_v28  ;;  %v12602_v2 = vpop.f32.mrb[86].mxu1 }
 0x486   :  { %14625 = vst [vmem:[#allocation49_spill] sm:$0xff] %v12602_v2  ;;  %v12604_v11 = vpop.f32.mrb[87].mxu1  ;;  %v12662_v2 = vld [vmem:[#allocation2 + $0x22a] sm:$0xff] }
 0x487   :  { %14626 = vst [vmem:[#allocation50_spill] sm:$0xff] %v12604_v11  ;;  %v12659_v11 = vld [vmem:[#allocation2 + $0x21a] sm:$0xff] }
 0x488   :  { %8373 = vmatmul.mubr.f32.gmra.mrb[30].mxu0 %v12606_v32 }
 0x489   :  { %8375 = vmatprep.mubr.f32.mxu0 %v3939_v22  ;;  %v12615_v30 = vpop.f32.mrb[88].mxu1  ;;  %v12632_v22 = vld [vmem:[#allocation2 + $0x1e2] sm:$0xff] }
 0x48a   :  { %14627 = vst [vmem:[#allocation51_spill] sm:$0xff] %v12615_v30  ;;  %v12619_v13 = vpop.f32.mrb[89].mxu1  ;;  %v12652_v30 = vld [vmem:[#allocation2 + $0x212] sm:$0xff] }
 0x48b   :  { %14628 = vst [vmem:[#allocation52_spill] sm:$0xff] %v12619_v13  ;;  %v12649_v13 = vld [vmem:[#allocation2 + $0x202] sm:$0xff] }
 0x48c   :  { %8376 = vmatmul.mubr.f32.gmra.mrb[32].mxu0 %v3940_v60 }
 0x48d   :  { %8378 = vmatprep.mubr.f32.mxu0 %v12621_v38  ;;  %v12625_v37 = vpop.f32.mrb[90].mxu1 }
 0x48e   :  { %14629 = vst [vmem:[#allocation53_spill] sm:$0xff] %v12625_v37  ;;  %v12627_v12 = vpop.f32.mrb[91].mxu1 }
 0x48f   :  { %14630 = vst [vmem:[#allocation54_spill] sm:$0xff] %v12627_v12 }
 0x490   :  { %8379 = vmatmul.mubr.f32.gmra.mrb[34].mxu0 %v12629_v50 }
 0x491   :  { %8381 = vmatprep.mubr.f32.mxu0 %v12632_v22  ;;  %v12635_v59 = vpop.f32.mrb[92].mxu1 }
 0x492   :  { %14631 = vst [vmem:[#allocation55_spill] sm:$0xff] %v12635_v59  ;;  %v12637_v60 = vpop.f32.mrb[93].mxu1 }
 0x493   :  { %14632 = vst [vmem:[#allocation56_spill] sm:$0xff] %v12637_v60 }
 0x494   :  { %8382 = vmatmul.mubr.f32.gmra.mrb[36].mxu0 %v12639_v46 }
 0x495   :  { %8384 = vmatprep.mubr.f32.mxu0 %v12642_v48  ;;  %v12645_v12 = vpop.f32.mrb[94].mxu1 }
 0x496   :  { %14633 = vst [vmem:[#allocation9_spill] sm:$0xff] %v12645_v12  ;;  %v12647_v37 = vpop.f32.mrb[95].mxu1 }
 0x497   :  { %14634 = vst [vmem:[#allocation57_spill] sm:$0xff] %v12647_v37 }
 0x498   :  { %8385 = vmatmul.mubr.f32.gmra.mrb[38].mxu0 %v12649_v13 }
 0x499   :  { %8387 = vmatprep.mubr.f32.mxu0 %v12652_v30  ;;  %v12655_v60 = vpop.f32.mrb[96].mxu1 }
 0x49a   :  { %14635 = vst [vmem:[#allocation58_spill] sm:$0xff] %v12655_v60  ;;  %v12657_v59 = vpop.f32.mrb[97].mxu1 }
 0x49b   :  { %14636 = vst [vmem:[#allocation3_spill] sm:$0xff] %v12657_v59 }
 0x49c   :  { %8388 = vmatmul.mubr.f32.gmra.mrb[40].mxu0 %v12659_v11 }
 0x49d   :  { %8390 = vmatprep.mubr.f32.mxu0 %v12662_v2  ;;  %v12665_v37 = vpop.f32.mrb[98].mxu1 }
 0x49e   :  { %14637 = vst [vmem:[#allocation12_spill] sm:$0xff] %v12665_v37  ;;  %v12667_v12 = vpop.f32.mrb[99].mxu1 }
 0x49f   :  { %14638 = vst [vmem:[#allocation59_spill] sm:$0xff] %v12667_v12 }
 0x4a0   :  { %8391 = vmatmul.mubr.f32.gmra.mrb[42].mxu0 %v12669_v0 }
 0x4a1   :  { %8393 = vmatprep.mubr.f32.mxu0 %v12672_v52  ;;  %v12675_v59 = vpop.f32.mrb[100].mxu1 }
 0x4a2   :  { %14639 = vst [vmem:[#allocation8_spill] sm:$0xff] %v12675_v59  ;;  %v12677_v60 = vpop.f32.mrb[101].mxu1 }
 0x4a3   :  { %14640 = vst [vmem:[#allocation31_spill] sm:$0xff] %v12677_v60 }
 0x4a4   :  { %8394 = vmatmul.mubr.f32.gmra.mrb[44].mxu0 %v12679_v54 }
 0x4a5   :  { %8396 = vmatprep.mubr.f32.mxu0 %v12682_v58  ;;  %v12685_v12 = vpop.f32.mrb[102].mxu1 }
 0x4a6   :  { %14641 = vst [vmem:[#allocation60_spill] sm:$0xff] %v12685_v12  ;;  %v12687_v37 = vpop.f32.mrb[103].mxu1 }
 0x4a7   :  { %14642 = vst [vmem:[#allocation11_spill] sm:$0xff] %v12687_v37 }
 0x4a8   :  { %8397 = vmatmul.mubr.f32.gmra.mrb[46].mxu0 %v12689_v14 }
 0x4a9   :  { %8399 = vmatprep.mubr.f32.mxu0 %v12692_v23  ;;  %v12695_v60 = vpop.f32.mrb[104].mxu1 }
 0x4aa   :  { %14643 = vst [vmem:[#allocation61_spill] sm:$0xff] %v12695_v60  ;;  %v12697_v59 = vpop.f32.mrb[105].mxu1 }
 0x4ab   :  { %14644 = vst [vmem:[#allocation15_spill] sm:$0xff] %v12697_v59 }
 0x4ac   :  { %8400 = vmatmul.mubr.f32.gmra.mrb[48].mxu0 %v12699_v62 }
 0x4ad   :  { %8402 = vmatprep.mubr.f32.mxu0 %v12702_v56  ;;  %v12705_v37 = vpop.f32.mrb[106].mxu1 }
 0x4ae   :  { %14645 = vst [vmem:[#allocation18_spill] sm:$0xff] %v12705_v37  ;;  %v12707_v12 = vpop.f32.mrb[107].mxu1 }
 0x4af   :  { %14646 = vst [vmem:[#allocation27_spill] sm:$0xff] %v12707_v12 }
 0x4b0   :  { %8403 = vmatmul.mubr.f32.gmra.mrb[50].mxu0 %v12709_v10 }
 0x4b1   :  { %8405 = vmatprep.mubr.f32.mxu0 %v12712_v7  ;;  %v12715_v59 = vpop.f32.mrb[108].mxu1 }
 0x4b2   :  { %14647 = vst [vmem:[#allocation32_spill] sm:$0xff] %v12715_v59  ;;  %v12717_v60 = vpop.f32.mrb[109].mxu1 }
 0x4b3   :  { %14648 = vst [vmem:[#allocation17_spill] sm:$0xff] %v12717_v60 }
 0x4b4   :  { %8406 = vmatmul.mubr.f32.gmra.mrb[52].mxu0 %v12719_v27 }
 0x4b5   :  { %8408 = vmatprep.mubr.f32.mxu0 %v12722_v15  ;;  %v12725_v12 = vpop.f32.mrb[110].mxu1 }
 0x4b6   :  { %14649 = vst [vmem:[#allocation46_spill] sm:$0xff] %v12725_v12  ;;  %v12727_v37 = vpop.f32.mrb[111].mxu1 }
 0x4b7   :  { %14650 = vst [vmem:[#allocation33_spill] sm:$0xff] %v12727_v37 }
 0x4b8   :  { %8409 = vmatmul.mubr.f32.gmra.mrb[54].mxu0 %v12729_v18 }
 0x4b9   :  { %8411 = vmatprep.mubr.f32.mxu0 %v12732_v34  ;;  %v12735_v60 = vpop.f32.mrb[112].mxu1 }
 0x4ba   :  { %14651 = vst [vmem:[#allocation47_spill] sm:$0xff] %v12735_v60  ;;  %v12737_v59 = vpop.f32.mrb[113].mxu1 }
 0x4bb   :  { %14652 = vst [vmem:[#allocation4_spill] sm:$0xff] %v12737_v59 }
 0x4bc   :  { %8412 = vmatmul.mubr.f32.gmra.mrb[56].mxu0 %v12739_v42 }
 0x4bd   :  { %8414 = vmatprep.mubr.f32.mxu0 %v12742_v31  ;;  %v12745_v37 = vpop.f32.mrb[114].mxu1 }
 0x4be   :  { %14653 = vst [vmem:[#allocation14_spill] sm:$0xff] %v12745_v37  ;;  %v12747_v12 = vpop.f32.mrb[115].mxu1 }
 0x4bf   :  { %14654 = vst [vmem:[#allocation6_spill] sm:$0xff] %v12747_v12 }
 0x4c0   :  { %8415 = vmatmul.mubr.f32.gmra.mrb[58].mxu0 %v12749_v55  ;;  %v12769_v55 = vld [vmem:[#allocation2 + $0x322] sm:$0xff] }
 0x4c1   :  { %8417 = vmatprep.mubr.f32.mxu0 %v12752_v33  ;;  %v12755_v59 = vpop.f32.mrb[116].mxu1  ;;  %v6508_v33 = vld [vmem:[%s14169_s3 + $0x428] sm:$0xff] }
 0x4c2   :  { %14657 = vst [vmem:[#allocation10_spill] sm:$0xff] %v12755_v59  ;;  %v12757_v60 = vpop.f32.mrb[117].mxu1  ;;  %v6505_v59 = vld [vmem:[%s14169_s3 + $0x410] sm:$0xff] }
 0x4c3   :  { %14658 = vst [vmem:[#allocation5_spill] sm:$0xff] %v12757_v60  ;;  %v6506_v60 = vld [vmem:[%s14169_s3 + $0x418] sm:$0xff] }
 0x4c4   :  { %8418 = vmatmul.mubr.f32.gmra.mrb[60].mxu0 %v12759_v6 }
 0x4c5   :  { %8420 = vmatprep.mubr.f32.mxu0 %v12762_v29  ;;  %v12765_v12 = vpop.f32.mrb[118].mxu1  ;;  %v9227_v29 = vpack.c.bf16 %v6506_v60, %v6505_v59 }
 0x4c6   :  { %14661 = vst [vmem:[#allocation13_spill] sm:$0xff] %v12765_v12  ;;  %v12767_v37 = vpop.f32.mrb[119].mxu1 }
 0x4c7   :  { %14662 = vst [vmem:[#allocation22_spill] sm:$0xff] %v12767_v37  ;;  %v6507_v37 = vld [vmem:[%s14169_s3 + $0x420] sm:$0xff] }
 0x4c8   :  { %8421 = vmatmul.mubr.f32.gmra.mrb[62].mxu0 %v12769_v55  ;;  %v9231_v59 = vpack.c.bf16 %v6508_v33, %v6507_v37  ;;  %v6511_v37 = vld [vmem:[%s14169_s3 + $0x440] sm:$0xff] }
 0x4c9   :  { %8455 = vmatprep.mubr.f32.mxu0 %v12476_v63  ;;  %v12779_v6 = vpop.f32.mrb[120].mxu1 }
 0x4ca   :  { %14663 = vst [vmem:[#allocation16_spill] sm:$0xff] %v12779_v6  ;;  %v12781_v12 = vpop.f32.mrb[121].mxu1  ;;  %v6510_v6 = vld [vmem:[%s14169_s3 + $0x438] sm:$0xff] }
 0x4cb   :  { %14664 = vst [vmem:[#allocation63_spill] sm:$0xff] %v12781_v12  ;;  %v6509_v12 = vld [vmem:[%s14169_s3 + $0x430] sm:$0xff] }
 0x4cc   :  { %8456 = vmatmul.mubr.f32.vlgmr.msra.gmra.mrb[0].mxu0 %v12480_v26 }
 0x4cd   :  { %8458 = vmatprep.mubr.f32.mxu0 %v12489_v40  ;;  %9226 = vmatpush3.bf16.msra.mxu0 %v12617_v45  ;;  %v12792_v63 = vpop.f32.mrb[122].mxu1  ;;  %v9235_v45 = vpack.c.bf16 %v6510_v6, %v6509_v12  ;;  %v6513_v12 = vld [vmem:[%s14169_s3 + $0x450] sm:$0xff] }
 0x4ce   :  { %9228 = vmatprep.subr.bf16.mxu0 %v9227_v29  ;;  %v12794_v60 = vpop.f32.mrb[123].mxu1 }
 0x4cf   :  { %14665 = vst [vmem:[#allocation64_spill] sm:$0xff] %v12794_v60  ;;  %v6512_v60 = vld [vmem:[%s14169_s3 + $0x448] sm:$0xff] }
 0x4d0   :  { %8459 = vmatmul.mubr.f32.gmra.mrb[2].mxu0 %v12492_v8 }
 0x4d1   :  { %8461 = vmatprep.mubr.f32.mxu0 %v12501_v24  ;;  %9230 = vmatpush3.bf16.msra.mxu0 %v9227_v29  ;;  %v12804_v26 = vpop.f32.mrb[124].mxu1 }
 0x4d2   :  { %14666 = vst [vmem:[#allocation65_spill] sm:$0xff] %v12804_v26  ;;  %9232 = vmatprep.subr.bf16.mxu0 %v9231_v59  ;;  %v12806_v33 = vpop.f32.mrb[125].mxu1  ;;  %v9239_v26 = vpack.c.bf16 %v6512_v60, %v6511_v37  ;;  %v6515_v37 = vld [vmem:[%s14169_s3 + $0x460] sm:$0xff] }
 0x4d3   :  { %14667 = vst [vmem:[#allocation66_spill] sm:$0xff] %v12806_v33  ;;  %v6514_v33 = vld [vmem:[%s14169_s3 + $0x458] sm:$0xff] }
 0x4d4   :  { %8462 = vmatmul.mubr.f32.gmra.mrb[4].mxu0 %v12504_v53 }
 0x4d5   :  { %8464 = vmatprep.mubr.f32.mxu0 %v12513_v19  ;;  %9234 = vmatpush3.bf16.msra.mxu0 %v9231_v59  ;;  %v12816_v29 = vpop.f32.mrb[126].mxu1 }
 0x4d6   :  { %14668 = vst [vmem:[#allocation67_spill] sm:$0xff] %v12816_v29  ;;  %9236 = vmatprep.subr.bf16.mxu0 %v9235_v45  ;;  %v12818_v6 = vpop.f32.mrb[127].mxu1  ;;  %v9243_v29 = vpack.c.bf16 %v6514_v33, %v6513_v12  ;;  %v6517_v33 = vld [vmem:[%s14169_s3 + $0x470] sm:$0xff]  ;;  %v6518_v12 = vld [vmem:[%s14169_s3 + $0x478] sm:$0xff] }
 0x4d7   :  { %14669 = vst [vmem:[#allocation68_spill] sm:$0xff] %v12818_v6  ;;  %v6516_v6 = vld [vmem:[%s14169_s3 + $0x468] sm:$0xff] }
 0x4d8   :  { %8465 = vmatmul.mubr.f32.gmra.mrb[6].mxu0 %v12516_v41 }
 0x4d9   :  { %8467 = vmatprep.mubr.f32.mxu0 %v12525_v17  ;;  %9238 = vmatpush3.bf16.msra.mxu0 %v9235_v45  ;;  %v12828_v59 = vpop.f32.mrb[128].mxu1  ;;  %v9247_v45 = vpack.c.bf16 %v6516_v6, %v6515_v37  ;;  %v14673_v6 = vld [vmem:[#allocation7_spill] sm:$0xff]  ;;  %v12901_v37 = vld [vmem:[#allocation2 + $0x332] sm:$0xff] }
 0x4da   :  { %9240 = vmatprep.subr.bf16.mxu0 %v9239_v26  ;;  %v12830_v60 = vpop.f32.mrb[129].mxu1 }
 0x4db   :  { %14670 = vst [vmem:[#allocation69_spill] sm:$0xff] %v12830_v60  ;;  %v9251_v60 = vpack.c.bf16 %v6518_v12, %v6517_v33  ;;  %v14685_v12 = vld [vmem:[#allocation38_spill] sm:$0xff] }
 0x4dc   :  { %8468 = vmatmul.mubr.f32.gmra.mrb[8].mxu0 %v12528_v47 }
 0x4dd   :  { %8470 = vmatprep.mubr.f32.mxu0 %v12537_v43  ;;  %9242 = vmatpush3.bf16.msra.mxu0 %v9239_v26  ;;  %v12865_v26 = vld [vmem:[#allocation2 + $0x182] sm:$0xff] }
 0x4de   :  { %9244 = vmatprep.subr.bf16.mxu0 %v9243_v29 }
 0x4e0   :  { %8471 = vmatmul.mubr.f32.gmra.mrb[10].mxu0 %v12540_v5 }
 0x4e1   :  { %8473 = vmatprep.mubr.f32.mxu0 %v12543_v25  ;;  %9246 = vmatpush3.bf16.msra.mxu0 %v9243_v29  ;;  %v12868_v29 = vld [vmem:[#allocation2 + $0x18a] sm:$0xff] }
 0x4e2   :  { %9248 = vmatprep.subr.bf16.mxu0 %v9247_v45 }
 0x4e4   :  { %8474 = vmatmul.mubr.f32.gmra.mrb[12].mxu0 %v12546_v39 }
 0x4e5   :  { %8476 = vmatprep.mubr.f32.mxu0 %v12549_v49  ;;  %9250 = vmatpush3.bf16.msra.mxu0 %v9247_v45  ;;  %v12904_v45 = vld [vmem:[#allocation2 + $0x33a] sm:$0xff] }
 0x4e6   :  { %9252 = vmatprep.subr.bf16.mxu0 %v9251_v60 }
 0x4e8   :  { %8477 = vmatmul.mubr.f32.gmra.mrb[14].mxu0 %v12552_v21 }
 0x4e9   :  { %8479 = vmatprep.mubr.f32.mxu0 %v12555_v44  ;;  %9254 = vmatpush3.bf16.msra.mxu0 %v9251_v60  ;;  %v14674_v60 = vld [vmem:[#allocation21_spill] sm:$0xff] }
 0x4ec   :  { %8480 = vmatmul.mubr.f32.gmra.mrb[16].mxu0 %v12558_v51 }
 0x4ed   :  { %8482 = vmatprep.mubr.f32.mxu0 %v12561_v57 }
 0x4f0   :  { %8483 = vmatmul.mubr.f32.gmra.mrb[18].mxu0 %v12564_v4 }
 0x4f1   :  { %8485 = vmatprep.mubr.f32.mxu0 %v12567_v20 }
 0x4f4   :  { %8486 = vmatmul.mubr.f32.gmra.mrb[20].mxu0 %v12570_v16 }
 0x4f5   :  { %8488 = vmatprep.mubr.f32.mxu0 %v12573_v3 }
 0x4f8   :  { %8489 = vmatmul.mubr.f32.gmra.mrb[22].mxu0 %v12576_v36 }
 0x4f9   :  { %8491 = vmatprep.mubr.f32.mxu0 %v12579_v61 }
 0x4fc   :  { %8492 = vmatmul.mubr.f32.gmra.mrb[24].mxu0 %v12586_v9 }
 0x4fd   :  { %8494 = vmatprep.mubr.f32.mxu0 %v12589_v35 }
 0x500   :  { %8495 = vmatmul.mubr.f32.gmra.mrb[26].mxu0 %v12596_v1 }
 0x501   :  { %8497 = vmatprep.mubr.f32.mxu0 %v12599_v28 }
 0x504   :  { %8498 = vmatmul.mubr.f32.gmra.mrb[28].mxu0 %v12606_v32 }
 0x505   :  { %8500 = vmatprep.mubr.f32.mxu0 %v12865_v26 }
 0x508   :  { %8501 = vmatmul.mubr.f32.gmra.mrb[30].mxu0 %v12868_v29 }
 0x509   :  { %8503 = vmatprep.mubr.f32.mxu0 %v12621_v38  ;;  %v14671_v38 = vld [vmem:[#allocation62_spill] sm:$0xff] }
 0x50c   :  { %8504 = vmatmul.mubr.f32.gmra.mrb[32].mxu0 %v12629_v50  ;;  %v14672_v50 = vld [vmem:[#allocation20_spill] sm:$0xff] }
 0x50d   :  { %8506 = vmatprep.mubr.f32.mxu0 %v12632_v22 }
 0x510   :  { %8507 = vmatmul.mubr.f32.gmra.mrb[34].mxu0 %v12639_v46 }
 0x511   :  { %8509 = vmatprep.mubr.f32.mxu0 %v12642_v48 }
 0x514   :  { %8510 = vmatmul.mubr.f32.gmra.mrb[36].mxu0 %v12649_v13 }
 0x515   :  { %8512 = vmatprep.mubr.f32.mxu0 %v12652_v30 }
 0x518   :  { %8513 = vmatmul.mubr.f32.gmra.mrb[38].mxu0 %v12659_v11 }
 0x519   :  { %8515 = vmatprep.mubr.f32.mxu0 %v12662_v2 }
 0x51c   :  { %8516 = vmatmul.mubr.f32.gmra.mrb[40].mxu0 %v12669_v0 }
 0x51d   :  { %8518 = vmatprep.mubr.f32.mxu0 %v12672_v52 }
 0x520   :  { %8519 = vmatmul.mubr.f32.gmra.mrb[42].mxu0 %v12679_v54 }
 0x521   :  { %8521 = vmatprep.mubr.f32.mxu0 %v12682_v58 }
 0x524   :  { %8522 = vmatmul.mubr.f32.gmra.mrb[44].mxu0 %v12689_v14 }
 0x525   :  { %8524 = vmatprep.mubr.f32.mxu0 %v12692_v23 }
 0x528   :  { %8525 = vmatmul.mubr.f32.gmra.mrb[46].mxu0 %v12699_v62 }
 0x529   :  { %8527 = vmatprep.mubr.f32.mxu0 %v12702_v56 }
 0x52c   :  { %8528 = vmatmul.mubr.f32.gmra.mrb[48].mxu0 %v12709_v10 }
 0x52d   :  { %8530 = vmatprep.mubr.f32.mxu0 %v12712_v7 }
 0x530   :  { %8531 = vmatmul.mubr.f32.gmra.mrb[50].mxu0 %v12719_v27 }
 0x531   :  { %8533 = vmatprep.mubr.f32.mxu0 %v12722_v15 }
 0x534   :  { %8534 = vmatmul.mubr.f32.gmra.mrb[52].mxu0 %v12729_v18 }
 0x535   :  { %8536 = vmatprep.mubr.f32.mxu0 %v12732_v34 }
 0x538   :  { %8537 = vmatmul.mubr.f32.gmra.mrb[54].mxu0 %v12739_v42 }
 0x539   :  { %8539 = vmatprep.mubr.f32.mxu0 %v12742_v31 }
 0x53c   :  { %8540 = vmatmul.mubr.f32.gmra.mrb[56].mxu0 %v14671_v38 }
 0x53d   :  { %8542 = vmatprep.mubr.f32.mxu0 %v14672_v50 }
 0x540   :  { %8543 = vmatmul.mubr.f32.gmra.mrb[58].mxu0 %v14673_v6 }
 0x541   :  { %8545 = vmatprep.mubr.f32.mxu0 %v14674_v60 }
 0x544   :  { %8546 = vmatmul.mubr.f32.gmra.mrb[60].mxu0 %v12769_v55 }
 0x545   :  { %8548 = vmatprep.mubr.f32.mxu0 %v12901_v37 }
 0x548   :  { %8549 = vmatmul.mubr.f32.gmra.mrb[62].mxu0 %v12904_v45 }
 0x549   :  { %8583 = vmatprep.mubr.f32.mxu0 %v12489_v40  ;;  %v3937_v40 = vld [vmem:[#allocation2 + $0x19a] sm:$0xff] }
 0x54c   :  { %8584 = vmatmul.mubr.f32.vlgmr.msra.gmra.mrb[0].mxu0 %v12492_v8  ;;  %v3938_v8 = vld [vmem:[#allocation2 + $0x1a2] sm:$0xff] }
 0x54d   :  { %8586 = vmatprep.mubr.f32.mxu0 %v12501_v24  ;;  %v14678_v24 = vld [vmem:[#allocation34_spill] sm:$0xff] }
 0x550   :  { %8587 = vmatmul.mubr.f32.gmra.mrb[2].mxu0 %v12504_v53 }
 0x551   :  { %8589 = vmatprep.mubr.f32.mxu0 %v12513_v19 }
 0x554   :  { %8590 = vmatmul.mubr.f32.gmra.mrb[4].mxu0 %v12516_v41 }
 0x555   :  { %8592 = vmatprep.mubr.f32.mxu0 %v12525_v17 }
 0x558   :  { %8593 = vmatmul.mubr.f32.gmra.mrb[6].mxu0 %v12528_v47 }
 0x559   :  { %8595 = vmatprep.mubr.f32.mxu0 %v12537_v43 }
 0x55c   :  { %8596 = vmatmul.mubr.f32.gmra.mrb[8].mxu0 %v12540_v5  ;;  %v14679_v5 = vld [vmem:[#allocation35_spill] sm:$0xff] }
 0x55d   :  { %8598 = vmatprep.mubr.f32.mxu0 %v12543_v25 }
 0x560   :  { %8599 = vmatmul.mubr.f32.gmra.mrb[10].mxu0 %v12546_v39 }
 0x561   :  { %8601 = vmatprep.mubr.f32.mxu0 %v12549_v49  ;;  %v14680_v49 = vld [vmem:[#allocation29_spill] sm:$0xff] }
 0x564   :  { %8602 = vmatmul.mubr.f32.gmra.mrb[12].mxu0 %v12552_v21 }
 0x565   :  { %8604 = vmatprep.mubr.f32.mxu0 %v12555_v44 }
 0x568   :  { %8605 = vmatmul.mubr.f32.gmra.mrb[14].mxu0 %v12558_v51 }
 0x569   :  { %8607 = vmatprep.mubr.f32.mxu0 %v12561_v57 }
 0x56c   :  { %8608 = vmatmul.mubr.f32.gmra.mrb[16].mxu0 %v12564_v4 }
 0x56d   :  { %8610 = vmatprep.mubr.f32.mxu0 %v12567_v20 }
 0x570   :  { %8611 = vmatmul.mubr.f32.gmra.mrb[18].mxu0 %v12570_v16  ;;  %v14681_v16 = vld [vmem:[#allocation25_spill] sm:$0xff] }
 0x571   :  { %8613 = vmatprep.mubr.f32.mxu0 %v12573_v3 }
 0x574   :  { %8614 = vmatmul.mubr.f32.gmra.mrb[20].mxu0 %v12576_v36 }
 0x575   :  { %8616 = vmatprep.mubr.f32.mxu0 %v12579_v61  ;;  %v14682_v61 = vld [vmem:[#allocation36_spill] sm:$0xff] }
 0x578   :  { %8617 = vmatmul.mubr.f32.gmra.mrb[22].mxu0 %v12586_v9 }
 0x579   :  { %8619 = vmatprep.mubr.f32.mxu0 %v12589_v35 }
 0x57c   :  { %8620 = vmatmul.mubr.f32.gmra.mrb[24].mxu0 %v12596_v1  ;;  %v14683_v1 = vld [vmem:[#allocation37_spill] sm:$0xff] }
 0x57d   :  { %8622 = vmatprep.mubr.f32.mxu0 %v12599_v28 }
 0x580   :  { %8623 = vmatmul.mubr.f32.gmra.mrb[26].mxu0 %v12606_v32 }
 0x581   :  { %8625 = vmatprep.mubr.f32.mxu0 %v12865_v26 }
 0x584   :  { %8626 = vmatmul.mubr.f32.gmra.mrb[28].mxu0 %v12868_v29 }
 0x585   :  { %8628 = vmatprep.mubr.f32.mxu0 %v3937_v40 }
 0x588   :  { %8629 = vmatmul.mubr.f32.gmra.mrb[30].mxu0 %v3938_v8  ;;  %v14687_v8 = vld [vmem:[#allocation40_spill] sm:$0xff] }
 0x589   :  { %8631 = vmatprep.mubr.f32.mxu0 %v12632_v22 }
 0x58c   :  { %8632 = vmatmul.mubr.f32.gmra.mrb[32].mxu0 %v12639_v46 }
 0x58d   :  { %8634 = vmatprep.mubr.f32.mxu0 %v12642_v48  ;;  %v3973_v48 = vld [vmem:[#allocation2 + $0x34a] sm:$0xff] }
 0x590   :  { %8635 = vmatmul.mubr.f32.gmra.mrb[34].mxu0 %v12649_v13 }
 0x591   :  { %8637 = vmatprep.mubr.f32.mxu0 %v12652_v30 }
 0x594   :  { %8638 = vmatmul.mubr.f32.gmra.mrb[36].mxu0 %v12659_v11  ;;  %v14684_v11 = vld [vmem:[#allocation26_spill] sm:$0xff] }
 0x595   :  { %8640 = vmatprep.mubr.f32.mxu0 %v12662_v2 }
 0x598   :  { %8641 = vmatmul.mubr.f32.gmra.mrb[38].mxu0 %v12669_v0 }
 0x599   :  { %8643 = vmatprep.mubr.f32.mxu0 %v12672_v52 }
 0x59c   :  { %8644 = vmatmul.mubr.f32.gmra.mrb[40].mxu0 %v12679_v54 }
 0x59d   :  { %8646 = vmatprep.mubr.f32.mxu0 %v12682_v58 }
 0x5a0   :  { %8647 = vmatmul.mubr.f32.gmra.mrb[42].mxu0 %v12689_v14 }
 0x5a1   :  { %8649 = vmatprep.mubr.f32.mxu0 %v12692_v23 }
 0x5a4   :  { %8650 = vmatmul.mubr.f32.gmra.mrb[44].mxu0 %v12699_v62  ;;  %v14677_v62 = vld [vmem:[#allocation24_spill] sm:$0xff] }
 0x5a5   :  { %8652 = vmatprep.mubr.f32.mxu0 %v12702_v56 }
 0x5a8   :  { %8653 = vmatmul.mubr.f32.gmra.mrb[46].mxu0 %v12709_v10 }
 0x5a9   :  { %8655 = vmatprep.mubr.f32.mxu0 %v12712_v7 }
 0x5ac   :  { %8656 = vmatmul.mubr.f32.gmra.mrb[48].mxu0 %v12719_v27  ;;  %v14676_v27 = vld [vmem:[#allocation30_spill] sm:$0xff] }
 0x5ad   :  { %8658 = vmatprep.mubr.f32.mxu0 %v12722_v15 }
 0x5b0   :  { %8659 = vmatmul.mubr.f32.gmra.mrb[50].mxu0 %v12729_v18 }
 0x5b1   :  { %8661 = vmatprep.mubr.f32.mxu0 %v12732_v34  ;;  %v3974_v34 = vld [vmem:[#allocation2 + $0x352] sm:$0xff] }
 0x5b4   :  { %8662 = vmatmul.mubr.f32.gmra.mrb[52].mxu0 %v12739_v42 }
 0x5b5   :  { %8664 = vmatprep.mubr.f32.mxu0 %v12742_v31  ;;  %v14675_v31 = vld [vmem:[#allocation23_spill] sm:$0xff] }
 0x5b8   :  { %8665 = vmatmul.mubr.f32.gmra.mrb[54].mxu0 %v14671_v38  ;;  %v14686_v38 = vld [vmem:[#allocation39_spill] sm:$0xff] }
 0x5b9   :  { %8667 = vmatprep.mubr.f32.mxu0 %v14672_v50 }
 0x5bc   :  { %8668 = vmatmul.mubr.f32.gmra.mrb[56].mxu0 %v14673_v6 }
 0x5bd   :  { %8670 = vmatprep.mubr.f32.mxu0 %v14674_v60 }
 0x5c0   :  { %8671 = vmatmul.mubr.f32.gmra.mrb[58].mxu0 %v12769_v55 }
 0x5c1   :  { %8673 = vmatprep.mubr.f32.mxu0 %v12901_v37 }
 0x5c4   :  { %8674 = vmatmul.mubr.f32.gmra.mrb[60].mxu0 %v12904_v45 }
 0x5c5   :  { %8676 = vmatprep.mubr.f32.mxu0 %v3973_v48 }
 0x5c8   :  { %8677 = vmatmul.mubr.f32.gmra.mrb[62].mxu0 %v3974_v34 }
 0x61f   :  { %v8585_v42 = vpop.f32.mrb[0].mxu0 }
 0x620   :  { %v12968_v18 = vadd.f32 %v8585_v42, %v14675_v31  ;;  %v4990_v15 = vpop.f32.mrb[1].mxu0  ;;  %v14688_v42 = vld [vmem:[#allocation41_spill] sm:$0xff] }
 0x621   :  { %v12971_v7 = vadd.f32 %v4990_v15, %v14676_v27 }
 0x622   :  { %v5376_v10 = vmul.f32 %v12968_v18, %v12968_v18 }
 0x623   :  { %v5375_v55 = vmul.f32 %v12971_v7, %v12971_v7  ;;  %v8588_v56 = vpop.f32.mrb[2].mxu0  ;;  %v9257_v41 = vpack.c.bf16 %v12968_v18, %v12971_v7 }
 0x624   :  { %v12978_v23 = vadd.f32 %v8588_v56, %v14677_v62  ;;  %v5000_v14 = vpop.f32.mrb[3].mxu0  ;;  %v14689_v62 = vld [vmem:[#allocation42_spill] sm:$0xff] }
 0x625   :  { %v12981_v53 = vadd.f32 %v5000_v14, %v14678_v24  ;;  %v9255_v19 = vpack.c.bf16 %v5376_v10, %v5375_v55 }
 0x626   :  { %v5378_v17 = vmul.f32 %v12978_v23, %v12978_v23 }
 0x627   :  { %v5377_v47 = vmul.f32 %v12981_v53, %v12981_v53  ;;  %v8591_v43 = vpop.f32.mrb[4].mxu0  ;;  %9256 = vmatprep.subr.bf16.mxu1 %v9255_v19  ;;  %v9261_v51 = vpack.c.bf16 %v12978_v23, %v12981_v53  ;;  %v14690_v19 = vld [vmem:[#allocation19_spill] sm:$0xff] }
 0x628   :  { %v12990_v25 = vadd.f32 %v8591_v43, %v14679_v5  ;;  %v5010_v39 = vpop.f32.mrb[5].mxu0  ;;  %9258 = vmatpush1.bf16.msra.mxu1 %v9257_v41 }
 0x629   :  { %v12993_v21 = vadd.f32 %v5010_v39, %v14680_v49  ;;  %v9259_v44 = vpack.c.bf16 %v5378_v17, %v5377_v47  ;;  %v14691_v49 = vld [vmem:[#allocation43_spill] sm:$0xff] }
 0x62a   :  { %v5380_v57 = vmul.f32 %v12990_v25, %v12990_v25 }
 0x62b   :  { %v5379_v4 = vmul.f32 %v12993_v21, %v12993_v21  ;;  %v8594_v20 = vpop.f32.mrb[6].mxu0  ;;  %9260 = vmatprep.subr.bf16.mxu1 %v9259_v44  ;;  %v9265_v9 = vpack.c.bf16 %v12990_v25, %v12993_v21 }
 0x62c   :  { %v13002_v3 = vadd.f32 %v8594_v20, %v14681_v16  ;;  %v5020_v36 = vpop.f32.mrb[7].mxu0  ;;  %9262 = vmatpush1.bf16.msra.mxu1 %v9261_v51 }
 0x62d   :  { %v13005_v58 = vadd.f32 %v5020_v36, %v14682_v61  ;;  %v9263_v54 = vpack.c.bf16 %v5380_v57, %v5379_v4  ;;  %v14692_v57 = vld [vmem:[#allocation44_spill] sm:$0xff] }
 0x62e   :  { %v5382_v35 = vmul.f32 %v13002_v3, %v13002_v3 }
 0x62f   :  { %v5381_v52 = vmul.f32 %v13005_v58, %v13005_v58  ;;  %v8597_v0 = vpop.f32.mrb[8].mxu0  ;;  %9264 = vmatprep.subr.bf16.mxu1 %v9263_v54  ;;  %v9269_v13 = vpack.c.bf16 %v13002_v3, %v13005_v58 }
 0x630   :  { %v13014_v28 = vadd.f32 %v8597_v0, %v14683_v1  ;;  %v5030_v2 = vpop.f32.mrb[9].mxu0  ;;  %9266 = vmatpush1.bf16.msra.mxu1 %v9265_v9  ;;  %v14693_v9 = vld [vmem:[#allocation45_spill] sm:$0xff]  ;;  %v14694_v0 = vld [vmem:[#allocation48_spill] sm:$0xff] }
 0x631   :  { %v13017_v32 = vadd.f32 %v5030_v2, %v14684_v11  ;;  %v9267_v30 = vpack.c.bf16 %v5382_v35, %v5381_v52 }
 0x632   :  { %v5384_v22 = vmul.f32 %v13014_v28, %v13014_v28 }
 0x633   :  { %v5383_v46 = vmul.f32 %v13017_v32, %v13017_v32  ;;  %v8600_v33 = vpop.f32.mrb[10].mxu0  ;;  %9268 = vmatprep.subr.bf16.mxu1 %v9267_v30  ;;  %v9273_v60 = vpack.c.bf16 %v13014_v28, %v13017_v32 }
 0x634   :  { %v13026_v26 = vadd.f32 %v8600_v33, %v14685_v12  ;;  %v5040_v29 = vpop.f32.mrb[11].mxu0  ;;  %9270 = vmatpush1.bf16.msra.mxu1 %v9269_v13 }
 0x635   :  { %v13029_v50 = vadd.f32 %v5040_v29, %v14686_v38  ;;  %v9271_v6 = vpack.c.bf16 %v5384_v22, %v5383_v46  ;;  %v14695_v46 = vld [vmem:[#allocation49_spill] sm:$0xff]  ;;  %v14696_v29 = vld [vmem:[#allocation50_spill] sm:$0xff] }
 0x636   :  { %v5386_v37 = vmul.f32 %v13026_v26, %v13026_v26 }
 0x637   :  { %v5385_v45 = vmul.f32 %v13029_v50, %v13029_v50  ;;  %v8603_v40 = vpop.f32.mrb[12].mxu0  ;;  %9272 = vmatprep.subr.bf16.mxu1 %v9271_v6  ;;  %v9277_v27 = vpack.c.bf16 %v13026_v26, %v13029_v50 }
 0x638   :  { %v13038_v48 = vadd.f32 %v8603_v40, %v14687_v8  ;;  %v5050_v34 = vpop.f32.mrb[13].mxu0  ;;  %9274 = vmatpush1.bf16.msra.mxu1 %v9273_v60  ;;  %v14697_v8 = vld [vmem:[#allocation51_spill] sm:$0xff] }
 0x639   :  { %v13041_v31 = vadd.f32 %v5050_v34, %v14688_v42  ;;  %v9275_v15 = vpack.c.bf16 %v5386_v37, %v5385_v45 }
 0x63a   :  { %v5388_v10 = vmul.f32 %v13038_v48, %v13038_v48 }
 0x63b   :  { %v5387_v55 = vmul.f32 %v13041_v31, %v13041_v31  ;;  %v8606_v56 = vpop.f32.mrb[14].mxu0  ;;  %9276 = vmatprep.subr.bf16.mxu1 %v9275_v15  ;;  %v9281_v47 = vpack.c.bf16 %v13038_v48, %v13041_v31  ;;  %v14698_v15 = vld [vmem:[#allocation52_spill] sm:$0xff] }
 0x63c   :  { %v13050_v14 = vadd.f32 %v8606_v56, %v14689_v62  ;;  %v5060_v24 = vpop.f32.mrb[15].mxu0  ;;  %9278 = vmatpush1.bf16.msra.mxu1 %v9277_v27 }
 0x63d   :  { %v13053_v41 = vadd.f32 %v5060_v24, %v14690_v19  ;;  %v9279_v17 = vpack.c.bf16 %v5388_v10, %v5387_v55  ;;  %v14699_v19 = vld [vmem:[#allocation53_spill] sm:$0xff] }
 0x63e   :  { %v5390_v43 = vmul.f32 %v13050_v14, %v13050_v14 }
 0x63f   :  { %v5389_v5 = vmul.f32 %v13053_v41, %v13053_v41  ;;  %v8609_v39 = vpop.f32.mrb[16].mxu0  ;;  %9280 = vmatprep.subr.bf16.mxu1 %v9279_v17  ;;  %v9285_v16 = vpack.c.bf16 %v13050_v14, %v13053_v41 }
 0x640   :  { %v13062_v44 = vadd.f32 %v8609_v39, %v14691_v49  ;;  %v5070_v51 = vpop.f32.mrb[17].mxu0  ;;  %9282 = vmatpush1.bf16.msra.mxu1 %v9281_v47 }
 0x641   :  { %v13065_v4 = vadd.f32 %v5070_v51, %v14692_v57  ;;  %v9283_v20 = vpack.c.bf16 %v5390_v43, %v5389_v5  ;;  %v14700_v43 = vld [vmem:[#allocation54_spill] sm:$0xff] }
 0x642   :  { %v5392_v36 = vmul.f32 %v13062_v44, %v13062_v44 }
 0x643   :  { %v5391_v61 = vmul.f32 %v13065_v4, %v13065_v4  ;;  %v8612_v54 = vpop.f32.mrb[18].mxu0  ;;  %9284 = vmatprep.subr.bf16.mxu1 %v9283_v20  ;;  %v9289_v11 = vpack.c.bf16 %v13062_v44, %v13065_v4 }
 0x644   :  { %v13074_v35 = vadd.f32 %v8612_v54, %v14693_v9  ;;  %v5080_v52 = vpop.f32.mrb[19].mxu0  ;;  %9286 = vmatpush1.bf16.msra.mxu1 %v9285_v16  ;;  %v14701_v16 = vld [vmem:[#allocation55_spill] sm:$0xff]  ;;  %v14702_v54 = vld [vmem:[#allocation56_spill] sm:$0xff] }
 0x645   :  { %v13077_v1 = vadd.f32 %v5080_v52, %v14694_v0  ;;  %v9287_v2 = vpack.c.bf16 %v5392_v36, %v5391_v61 }
 0x646   :  { %v5394_v30 = vmul.f32 %v13074_v35, %v13074_v35 }
 0x647   :  { %v5393_v13 = vmul.f32 %v13077_v1, %v13077_v1  ;;  %v8615_v22 = vpop.f32.mrb[20].mxu0  ;;  %9288 = vmatprep.subr.bf16.mxu1 %v9287_v2  ;;  %v9293_v60 = vpack.c.bf16 %v13074_v35, %v13077_v1 }
 0x648   :  { %v13086_v33 = vadd.f32 %v8615_v22, %v14695_v46  ;;  %v5090_v12 = vpop.f32.mrb[21].mxu0  ;;  %9290 = vmatpush1.bf16.msra.mxu1 %v9289_v11 }
 0x649   :  { %v13089_v38 = vadd.f32 %v5090_v12, %v14696_v29  ;;  %v9291_v6 = vpack.c.bf16 %v5394_v30, %v5393_v13  ;;  %v14703_v13 = vld [vmem:[#allocation9_spill] sm:$0xff] }
 0x64a   :  { %v5396_v37 = vmul.f32 %v13086_v33, %v13086_v33  ;;  %v14704_v12 = vld [vmem:[#allocation57_spill] sm:$0xff] }
 0x64b   :  { %v5395_v45 = vmul.f32 %v13089_v38, %v13089_v38  ;;  %v8618_v40 = vpop.f32.mrb[22].mxu0  ;;  %9292 = vmatprep.subr.bf16.mxu1 %v9291_v6  ;;  %v9297_v55 = vpack.c.bf16 %v13086_v33, %v13089_v38 }
 0x64c   :  { %v13098_v34 = vadd.f32 %v8618_v40, %v14697_v8  ;;  %v5100_v42 = vpop.f32.mrb[23].mxu0  ;;  %9294 = vmatpush1.bf16.msra.mxu1 %v9293_v60  ;;  %v14705_v8 = vld [vmem:[#allocation58_spill] sm:$0xff] }
 0x64d   :  { %v13101_v27 = vadd.f32 %v5100_v42, %v14698_v15  ;;  %v9295_v10 = vpack.c.bf16 %v5396_v37, %v5395_v45 }
 0x64e   :  { %v5398_v56 = vmul.f32 %v13098_v34, %v13098_v34 }
 0x64f   :  { %v5397_v62 = vmul.f32 %v13101_v27, %v13101_v27  ;;  %v8621_v24 = vpop.f32.mrb[24].mxu0  ;;  %9296 = vmatprep.subr.bf16.mxu1 %v9295_v10  ;;  %v9301_v49 = vpack.c.bf16 %v13098_v34, %v13101_v27  ;;  %v14706_v10 = vld [vmem:[#allocation3_spill] sm:$0xff] }
 0x650   :  { %v13110_v17 = vadd.f32 %v8621_v24, %v14699_v19  ;;  %v5110_v47 = vpop.f32.mrb[25].mxu0  ;;  %9298 = vmatpush1.bf16.msra.mxu1 %v9297_v55 }
 0x651   :  { %v13113_v5 = vadd.f32 %v5110_v47, %v14700_v43  ;;  %v9299_v39 = vpack.c.bf16 %v5398_v56, %v5397_v62  ;;  %v14707_v43 = vld [vmem:[#allocation12_spill] sm:$0xff] }
 0x652   :  { %v5400_v51 = vmul.f32 %v13110_v17, %v13110_v17 }
 0x653   :  { %v5399_v57 = vmul.f32 %v13113_v5, %v13113_v5  ;;  %v8624_v20 = vpop.f32.mrb[26].mxu0  ;;  %9300 = vmatprep.subr.bf16.mxu1 %v9299_v39  ;;  %v9305_v0 = vpack.c.bf16 %v13110_v17, %v13113_v5 }
 0x654   :  { %v13122_v36 = vadd.f32 %v8624_v20, %v14701_v16  ;;  %v5120_v61 = vpop.f32.mrb[27].mxu0  ;;  %9302 = vmatpush1.bf16.msra.mxu1 %v9301_v49 }
 0x655   :  { %v13125_v9 = vadd.f32 %v5120_v61, %v14702_v54  ;;  %v9303_v52 = vpack.c.bf16 %v5400_v51, %v5399_v57  ;;  %v14708_v51 = vld [vmem:[#allocation59_spill] sm:$0xff] }
 0x656   :  { %v5402_v2 = vmul.f32 %v13122_v36, %v13122_v36 }
 0x657   :  { %v5401_v11 = vmul.f32 %v13125_v9, %v13125_v9  ;;  %v8627_v30 = vpop.f32.mrb[28].mxu0  ;;  %9304 = vmatprep.subr.bf16.mxu1 %v9303_v52  ;;  %v9309_v60 = vpack.c.bf16 %v13122_v36, %v13125_v9 }
 0x658   :  { %v13134_v22 = vadd.f32 %v8627_v30, %v14703_v13  ;;  %v5130_v46 = vpop.f32.mrb[29].mxu0  ;;  %9306 = vmatpush1.bf16.msra.mxu1 %v9305_v0  ;;  %v14709_v0 = vld [vmem:[#allocation8_spill] sm:$0xff]  ;;  %v14710_v30 = vld [vmem:[#allocation31_spill] sm:$0xff] }
 0x659   :  { %v13137_v29 = vadd.f32 %v5130_v46, %v14704_v12  ;;  %v9307_v6 = vpack.c.bf16 %v5402_v2, %v5401_v11 }
 0x65a   :  { %v5404_v37 = vmul.f32 %v13134_v22, %v13134_v22 }
 0x65b   :  { %v5403_v45 = vmul.f32 %v13137_v29, %v13137_v29  ;;  %v8630_v40 = vpop.f32.mrb[30].mxu0  ;;  %9308 = vmatprep.subr.bf16.mxu1 %v9307_v6  ;;  %v9313_v62 = vpack.c.bf16 %v13134_v22, %v13137_v29 }
 0x65c   :  { %v13146_v42 = vadd.f32 %v8630_v40, %v14705_v8  ;;  %v5140_v15 = vpop.f32.mrb[31].mxu0  ;;  %9310 = vmatpush1.bf16.msra.mxu1 %v9309_v60  ;;  %v14712_v40 = vld [vmem:[#allocation60_spill] sm:$0xff] }
 0x65d   :  { %v13149_v55 = vadd.f32 %v5140_v15, %v14706_v10  ;;  %v9311_v56 = vpack.c.bf16 %v5404_v37, %v5403_v45  ;;  %v14711_v45 = vmov 1.0   ;;  %v14713_v10 = vld [vmem:[#allocation11_spill] sm:$0xff] }
 0x65e   :  { %v5406_v24 = vmul.f32 %v13146_v42, %v13146_v42 }
 0x65f   :  { %v5405_v19 = vmul.f32 %v13149_v55, %v13149_v55  ;;  %v8633_v47 = vpop.f32.mrb[32].mxu0  ;;  %9312 = vmatprep.subr.bf16.mxu1 %v9311_v56  ;;  %v9317_v16 = vpack.c.bf16 %v13146_v42, %v13149_v55 }
 0x660   :  { %v13158_v39 = vadd.f32 %v8633_v47, %v14707_v43  ;;  %v5150_v49 = vpop.f32.mrb[33].mxu0  ;;  %9314 = vmatpush1.bf16.msra.mxu1 %v9313_v62 }
 0x661   :  { %v13161_v57 = vadd.f32 %v5150_v49, %v14708_v51  ;;  %v9315_v20 = vpack.c.bf16 %v5406_v24, %v5405_v19  ;;  %v14714_v49 = vld [vmem:[#allocation61_spill] sm:$0xff] }
 0x662   :  { %v5408_v61 = vmul.f32 %v13158_v39, %v13158_v39 }
 0x663   :  { %v5407_v54 = vmul.f32 %v13161_v57, %v13161_v57  ;;  %v8636_v52 = vpop.f32.mrb[34].mxu0  ;;  %9316 = vmatprep.subr.bf16.mxu1 %v9315_v20  ;;  %v9321_v12 = vpack.c.bf16 %v13158_v39, %v13161_v57 }
 0x664   :  { %v13170_v2 = vadd.f32 %v8636_v52, %v14709_v0  ;;  %v5160_v11 = vpop.f32.mrb[35].mxu0  ;;  %9318 = vmatpush1.bf16.msra.mxu1 %v9317_v16  ;;  %v14715_v16 = vld [vmem:[#allocation15_spill] sm:$0xff] }
 0x665   :  { %v13173_v13 = vadd.f32 %v5160_v11, %v14710_v30  ;;  %v9319_v46 = vpack.c.bf16 %v5408_v61, %v5407_v54 }
 0x666   :  { %v5410_v6 = vmul.f32 %v13170_v2, %v13170_v2 }
 0x667   :  { %v5409_v60 = vmul.f32 %v13173_v13, %v13173_v13  ;;  %v8639_v37 = vpop.f32.mrb[36].mxu0  ;;  %9320 = vmatprep.subr.bf16.mxu1 %v9319_v46  ;;  %5504 = vmatmul.mubr.f32.vlgmr.msra.gmra.mrb[130].mxu1 %v14711_v45  ;;  %v9325_v24 = vpack.c.bf16 %v13170_v2, %v13173_v13  ;;  %v14716_v46 = vld [vmem:[#allocation18_spill] sm:$0xff] }
 0x668   :  { %v13183_v8 = vadd.f32 %v8639_v37, %v14712_v40  ;;  %v5170_v15 = vpop.f32.mrb[37].mxu0  ;;  %9322 = vmatpush1.bf16.msra.mxu1 %v9321_v12  ;;  %5574 = vmatprep.mubr.f32.mxu1 %v14711_v45 }
 0x669   :  { %v13187_v56 = vadd.f32 %v5170_v15, %v14713_v10  ;;  %v9323_v62 = vpack.c.bf16 %v5410_v6, %v5409_v60  ;;  %v14717_v60 = vld [vmem:[#allocation27_spill] sm:$0xff] }
 0x66a   :  { %v5412_v19 = vmul.f32 %v13183_v8, %v13183_v8 }
 0x66b   :  { %v5411_v47 = vmul.f32 %v13187_v56, %v13187_v56  ;;  %v8642_v43 = vpop.f32.mrb[38].mxu0  ;;  %9324 = vmatprep.subr.bf16.mxu1 %v9323_v62  ;;  %v9329_v52 = vpack.c.bf16 %v13183_v8, %v13187_v56 }
 0x66c   :  { %v13196_v51 = vadd.f32 %v8642_v43, %v14714_v49  ;;  %v5180_v20 = vpop.f32.mrb[39].mxu0  ;;  %9326 = vmatpush1.bf16.msra.mxu1 %v9325_v24  ;;  %v14719_v49 = vld [vmem:[#allocation17_spill] sm:$0xff] }
 0x66d   :  { %v13199_v61 = vadd.f32 %v5180_v20, %v14715_v16  ;;  %v9327_v54 = vpack.c.bf16 %v5412_v19, %v5411_v47  ;;  %v14718_v19 = vld [vmem:[#allocation32_spill] sm:$0xff] }
 0x66e   :  { %v5414_v0 = vmul.f32 %v13196_v51, %v13196_v51 }
 0x66f   :  { %v5413_v11 = vmul.f32 %v13199_v61, %v13199_v61  ;;  %v8645_v30 = vpop.f32.mrb[40].mxu0  ;;  %9328 = vmatprep.subr.bf16.mxu1 %v9327_v54  ;;  %v9333_v15 = vpack.c.bf16 %v13196_v51, %v13199_v61 }
 0x670   :  { %v13208_v12 = vadd.f32 %v8645_v30, %v14716_v46  ;;  %v5190_v6 = vpop.f32.mrb[41].mxu0  ;;  %9330 = vmatpush1.bf16.msra.mxu1 %v9329_v52  ;;  %v14720_v30 = vld [vmem:[#allocation46_spill] sm:$0xff] }
 0x671   :  { %v13211_v37 = vadd.f32 %v5190_v6, %v14717_v60  ;;  %v9331_v40 = vpack.c.bf16 %v5414_v0, %v5413_v11  ;;  %v14722_v60 = vld [vmem:[#allocation33_spill] sm:$0xff] }
 0x672   :  { %v5416_v10 = vmul.f32 %v13208_v12, %v13208_v12 }
 0x673   :  { %v5415_v62 = vmul.f32 %v13211_v37, %v13211_v37  ;;  %v8648_v24 = vpop.f32.mrb[42].mxu0  ;;  %9332 = vmatprep.subr.bf16.mxu1 %v9331_v40  ;;  %v9337_v54 = vpack.c.bf16 %v13208_v12, %v13211_v37 }
 0x674   :  { %v13220_v47 = vadd.f32 %v8648_v24, %v14718_v19  ;;  %v5200_v43 = vpop.f32.mrb[43].mxu0  ;;  %9334 = vmatpush1.bf16.msra.mxu1 %v9333_v15 }
 0x675   :  { %v13223_v20 = vadd.f32 %v5200_v43, %v14719_v49  ;;  %v9335_v16 = vpack.c.bf16 %v5416_v10, %v5415_v62  ;;  %v14724_v43 = vld [vmem:[#allocation47_spill] sm:$0xff] }
 0x676   :  { %v5418_v52 = vmul.f32 %v13220_v47, %v13220_v47 }
 0x677   :  { %v5417_v0 = vmul.f32 %v13223_v20, %v13223_v20  ;;  %v8651_v11 = vpop.f32.mrb[44].mxu0  ;;  %9336 = vmatprep.subr.bf16.mxu1 %v9335_v16  ;;  %v9341_v10 = vpack.c.bf16 %v13220_v47, %v13223_v20 }
 0x678   :  { %v13232_v46 = vadd.f32 %v8651_v11, %v14720_v30  ;;  %v5210_v6 = vpop.f32.mrb[45].mxu0  ;;  %9338 = vmatpush1.bf16.msra.mxu1 %v9337_v54  ;;  %v14726_v54 = vld [vmem:[#allocation4_spill] sm:$0xff] }
 0x679   :  { %v13235_v40 = vadd.f32 %v5210_v6, %v14722_v60  ;;  %v9339_v15 = vpack.c.bf16 %v5418_v52, %v5417_v0 }
 0x67a   :  { %14721 = vst [vmem:[#allocation62_spill] sm:$0xff] %v13232_v46  ;;  %v5420_v62 = vmul.f32 %v13232_v46, %v13232_v46 }
 0x67b   :  { %14723 = vst [vmem:[#allocation20_spill] sm:$0xff] %v13235_v40  ;;  %v5419_v24 = vmul.f32 %v13235_v40, %v13235_v40  ;;  %v8654_v19 = vpop.f32.mrb[46].mxu0  ;;  %9340 = vmatprep.subr.bf16.mxu1 %v9339_v15  ;;  %v9345_v0 = vpack.c.bf16 %v13232_v46, %v13235_v40  ;;  %v14728_v15 = vld [vmem:[#allocation14_spill] sm:$0xff] }
 0x67c   :  { %v13244_v49 = vadd.f32 %v8654_v19, %v14724_v43  ;;  %v5220_v16 = vpop.f32.mrb[47].mxu0  ;;  %9342 = vmatpush1.bf16.msra.mxu1 %v9341_v10  ;;  %v14730_v10 = vld [vmem:[#allocation6_spill] sm:$0xff] }
 0x67d   :  { %v13247_v11 = vadd.f32 %v5220_v16, %v14726_v54  ;;  %v9343_v52 = vpack.c.bf16 %v5420_v62, %v5419_v24 }
 0x67e   :  { %14725 = vst [vmem:[#allocation7_spill] sm:$0xff] %v13244_v49  ;;  %v5422_v30 = vmul.f32 %v13244_v49, %v13244_v49 }
 0x67f   :  { %14727 = vst [vmem:[#allocation21_spill] sm:$0xff] %v13247_v11  ;;  %v5421_v6 = vmul.f32 %v13247_v11, %v13247_v11  ;;  %v8657_v60 = vpop.f32.mrb[48].mxu0  ;;  %9344 = vmatprep.subr.bf16.mxu1 %v9343_v52  ;;  %v9349_v24 = vpack.c.bf16 %v13244_v49, %v13247_v11  ;;  %v14732_v52 = vld [vmem:[#allocation10_spill] sm:$0xff] }
 0x680   :  { %v13256_v19 = vadd.f32 %v8657_v60, %v14728_v15  ;;  %v5230_v43 = vpop.f32.mrb[49].mxu0  ;;  %9346 = vmatpush1.bf16.msra.mxu1 %v9345_v0  ;;  %v14734_v0 = vld [vmem:[#allocation5_spill] sm:$0xff] }
 0x681   :  { %v13259_v16 = vadd.f32 %v5230_v43, %v14730_v10  ;;  %v9347_v62 = vpack.c.bf16 %v5422_v30, %v5421_v6 }
 0x682   :  { %14729 = vst [vmem:[#allocation23_spill] sm:$0xff] %v13256_v19  ;;  %v5424_v54 = vmul.f32 %v13256_v19, %v13256_v19 }
 0x683   :  { %14731 = vst [vmem:[#allocation30_spill] sm:$0xff] %v13259_v16  ;;  %v5423_v40 = vmul.f32 %v13259_v16, %v13259_v16  ;;  %v8660_v46 = vpop.f32.mrb[50].mxu0  ;;  %9348 = vmatprep.subr.bf16.mxu1 %v9347_v62  ;;  %v9353_v6 = vpack.c.bf16 %v13256_v19, %v13259_v16  ;;  %v14736_v62 = vld [vmem:[#allocation13_spill] sm:$0xff] }
 0x684   :  { %v13268_v60 = vadd.f32 %v8660_v46, %v14732_v52  ;;  %v5240_v15 = vpop.f32.mrb[51].mxu0  ;;  %9350 = vmatpush1.bf16.msra.mxu1 %v9349_v24  ;;  %v14737_v24 = vld [vmem:[#allocation22_spill] sm:$0xff] }
 0x685   :  { %v13271_v43 = vadd.f32 %v5240_v15, %v14734_v0  ;;  %v9351_v30 = vpack.c.bf16 %v5424_v54, %v5423_v40 }
 0x686   :  { %14733 = vst [vmem:[#allocation24_spill] sm:$0xff] %v13268_v60  ;;  %v5426_v10 = vmul.f32 %v13268_v60, %v13268_v60 }
 0x687   :  { %14735 = vst [vmem:[#allocation34_spill] sm:$0xff] %v13271_v43  ;;  %v5425_v11 = vmul.f32 %v13271_v43, %v13271_v43  ;;  %v8663_v49 = vpop.f32.mrb[52].mxu0  ;;  %9352 = vmatprep.subr.bf16.mxu1 %v9351_v30  ;;  %v9357_v54 = vpack.c.bf16 %v13268_v60, %v13271_v43  ;;  %v14739_v30 = vld [vmem:[#allocation16_spill] sm:$0xff] }
 0x688   :  { %v13280_v46 = vadd.f32 %v8663_v49, %v14736_v62  ;;  %v5250_v52 = vpop.f32.mrb[53].mxu0  ;;  %9354 = vmatpush1.bf16.msra.mxu1 %v9353_v6  ;;  %v14741_v6 = vld [vmem:[#allocation63_spill] sm:$0xff] }
 0x689   :  { %v13283_v15 = vadd.f32 %v5250_v52, %v14737_v24  ;;  %v9355_v40 = vpack.c.bf16 %v5426_v10, %v5425_v11 }
 0x68a   :  { %v5428_v0 = vmul.f32 %v13280_v46, %v13280_v46 }
 0x68b   :  { %14738 = vst [vmem:[#allocation35_spill] sm:$0xff] %v13283_v15  ;;  %v5427_v16 = vmul.f32 %v13283_v15, %v13283_v15  ;;  %v8666_v19 = vpop.f32.mrb[54].mxu0  ;;  %9356 = vmatprep.subr.bf16.mxu1 %v9355_v40  ;;  %v9361_v10 = vpack.c.bf16 %v13280_v46, %v13283_v15 }
 0x68c   :  { %v13292_v49 = vadd.f32 %v8666_v19, %v14739_v30  ;;  %v5260_v62 = vpop.f32.mrb[55].mxu0  ;;  %9358 = vmatpush1.bf16.msra.mxu1 %v9357_v54  ;;  %v14744_v54 = vld [vmem:[#allocation64_spill] sm:$0xff] }
 0x68d   :  { %v13295_v52 = vadd.f32 %v5260_v62, %v14741_v6  ;;  %v9359_v11 = vpack.c.bf16 %v5428_v0, %v5427_v16 }
 0x68e   :  { %14740 = vst [vmem:[#allocation29_spill] sm:$0xff] %v13292_v49  ;;  %v5430_v24 = vmul.f32 %v13292_v49, %v13292_v49 }
 0x68f   :  { %14742 = vst [vmem:[#allocation25_spill] sm:$0xff] %v13295_v52  ;;  %v5429_v43 = vmul.f32 %v13295_v52, %v13295_v52  ;;  %v8669_v60 = vpop.f32.mrb[56].mxu0  ;;  %9360 = vmatprep.subr.bf16.mxu1 %v9359_v11  ;;  %v9365_v0 = vpack.c.bf16 %v13292_v49, %v13295_v52  ;;  %v14746_v11 = vld [vmem:[#allocation65_spill] sm:$0xff] }
 0x690   :  { %v13304_v19 = vadd.f32 %v8669_v60, %v12792_v63  ;;  %v5270_v40 = vpop.f32.mrb[57].mxu0  ;;  %9362 = vmatpush1.bf16.msra.mxu1 %v9361_v10  ;;  %v14747_v10 = vld [vmem:[#allocation66_spill] sm:$0xff] }
 0x691   :  { %v13307_v30 = vadd.f32 %v5270_v40, %v14744_v54  ;;  %v9363_v16 = vpack.c.bf16 %v5430_v24, %v5429_v43 }
 0x692   :  { %14743 = vst [vmem:[#allocation36_spill] sm:$0xff] %v13304_v19  ;;  %v5432_v62 = vmul.f32 %v13304_v19, %v13304_v19 }
 0x693   :  { %14745 = vst [vmem:[#allocation37_spill] sm:$0xff] %v13307_v30  ;;  %v5431_v6 = vmul.f32 %v13307_v30, %v13307_v30  ;;  %v8672_v15 = vpop.f32.mrb[58].mxu0  ;;  %9364 = vmatprep.subr.bf16.mxu1 %v9363_v16  ;;  %v9369_v24 = vpack.c.bf16 %v13304_v19, %v13307_v30  ;;  %v14748_v16 = vld [vmem:[#allocation67_spill] sm:$0xff] }
 0x694   :  { %v13316_v63 = vadd.f32 %v8672_v15, %v14746_v11  ;;  %v5280_v60 = vpop.f32.mrb[59].mxu0  ;;  %9366 = vmatpush1.bf16.msra.mxu1 %v9365_v0  ;;  %v14749_v0 = vld [vmem:[#allocation68_spill] sm:$0xff] }
 0x695   :  { %v13319_v40 = vadd.f32 %v5280_v60, %v14747_v10  ;;  %v9367_v43 = vpack.c.bf16 %v5432_v62, %v5431_v6 }
 0x696   :  { %v5434_v54 = vmul.f32 %v13316_v63, %v13316_v63 }
 0x697   :  { %v5433_v52 = vmul.f32 %v13319_v40, %v13319_v40  ;;  %v8675_v49 = vpop.f32.mrb[60].mxu0  ;;  %9368 = vmatprep.subr.bf16.mxu1 %v9367_v43  ;;  %v9373_v6 = vpack.c.bf16 %v13316_v63, %v13319_v40 }
 0x698   :  { %v13328_v15 = vadd.f32 %v8675_v49, %v14748_v16  ;;  %v5290_v11 = vpop.f32.mrb[61].mxu0  ;;  %9370 = vmatpush1.bf16.msra.mxu1 %v9369_v24  ;;  %v14750_v24 = vld [vmem:[#allocation69_spill] sm:$0xff] }
 0x699   :  { %v13331_v60 = vadd.f32 %v5290_v11, %v14749_v0  ;;  %v9371_v62 = vpack.c.bf16 %v5434_v54, %v5433_v52  ;;  %v5654_v0 = vld [vmem:[%s14172_s4] sm:$0xff] }
 0x69a   :  { %v5436_v10 = vmul.f32 %v13328_v15, %v13328_v15 }
 0x69b   :  { %v5435_v30 = vmul.f32 %v13331_v60, %v13331_v60  ;;  %v8678_v19 = vpop.f32.mrb[62].mxu0  ;;  %9372 = vmatprep.subr.bf16.mxu1 %v9371_v62  ;;  %v9377_v54 = vpack.c.bf16 %v13328_v15, %v13331_v60 }
 0x69c   :  { %v13340_v49 = vadd.f32 %v8678_v19, %v12828_v59  ;;  %v5300_v43 = vpop.f32.mrb[63].mxu0  ;;  %9374 = vmatpush1.bf16.msra.mxu1 %v9373_v6  ;;  %v5655_v59 = vld [vmem:[%s14172_s4 + $0x8] sm:$0xff] }
 0x69d   :  { %v13343_v16 = vadd.f32 %v5300_v43, %v14750_v24  ;;  %v9375_v52 = vpack.c.bf16 %v5436_v10, %v5435_v30  ;;  %v9383_v62 = vpack.c.bf16 %v5655_v59, %v5654_v0  ;;  %v5656_v10 = vld [vmem:[%s14172_s4 + $0x10] sm:$0xff]  ;;  %v5657_v43 = vld [vmem:[%s14172_s4 + $0x18] sm:$0xff] }
 0x69e   :  { %v5438_v11 = vmul.f32 %v13340_v49, %v13340_v49  ;;  %v9387_v24 = vpack.c.bf16 %v5657_v43, %v5656_v10  ;;  %v5660_v59 = vld [vmem:[%s14172_s4 + $0x30] sm:$0xff]  ;;  %v5665_v43 = vld [vmem:[%s14172_s4 + $0x58] sm:$0xff] }
 0x69f   :  { %14751 = vst [vmem:[#allocation26_spill] sm:$0xff] %v13343_v16  ;;  %v5437_v19 = vmul.f32 %v13343_v16, %v13343_v16  ;;  %9376 = vmatprep.subr.bf16.mxu1 %v9375_v52  ;;  %v9381_v6 = vpack.c.bf16 %v13340_v49, %v13343_v16  ;;  %v5590_v52 = vld [vmem:[%s14173_s1] sm:$0xff]  ;;  %v5664_v10 = vld [vmem:[%s14172_s4 + $0x50] sm:$0xff] }
 0x6a0   :  { %9378 = vmatpush1.bf16.msra.mxu1 %v9377_v54  ;;  %v5658_v54 = vld [vmem:[%s14172_s4 + $0x20] sm:$0xff] }
 0x6a1   :  { %v9379_v30 = vpack.c.bf16 %v5438_v11, %v5437_v19  ;;  %v5659_v11 = vld [vmem:[%s14172_s4 + $0x28] sm:$0xff]  ;;  %v5661_v19 = vld [vmem:[%s14172_s4 + $0x38] sm:$0xff] }
 0x6a2   :  { %v9391_v0 = vpack.c.bf16 %v5659_v11, %v5658_v54  ;;  %v5667_v54 = vld [vmem:[%s14172_s4 + $0x68] sm:$0xff] }
 0x6a3   :  { %9380 = vmatprep.subr.bf16.mxu1 %v9379_v30  ;;  %v9395_v30 = vpack.c.bf16 %v5661_v19, %v5660_v59  ;;  %v5669_v59 = vld [vmem:[%s14172_s4 + $0x78] sm:$0xff] }
 0x6a4   :  { %9382 = vmatpush1.bf16.msra.mxu1 %v9381_v6  ;;  %v5662_v6 = vld [vmem:[%s14172_s4 + $0x40] sm:$0xff] }
 0x6a5   :  { %9384 = vmatprep.subr.bf16.mxu1 %v9383_v62 }
 0x6a7   :  { %5575 = vmatmul.mubr.f32.vlgmr.msra.gmra.mrb[130].mxu1 %v14711_v45  ;;  %v5663_v45 = vld [vmem:[%s14172_s4 + $0x48] sm:$0xff] }
 0x6a8   :  { %9386 = vmatpush3.bf16.msra.mxu1 %v9383_v62  ;;  %8711 = vmatprep.mubr.f32.mxu1 %v5590_v52  ;;  %v9399_v62 = vpack.c.bf16 %v5663_v45, %v5662_v6  ;;  %v5666_v52 = vld [vmem:[%s14172_s4 + $0x60] sm:$0xff]  ;;  %v5592_v6 = vld [vmem:[%s14173_s1 + $0x10] sm:$0xff]  ;;  %v5593_v45 = vld [vmem:[%s14173_s1 + $0x18] sm:$0xff] }
 0x6a9   :  { %9388 = vmatprep.subr.bf16.mxu1 %v9387_v24  ;;  %v9407_v11 = vpack.c.bf16 %v5667_v54, %v5666_v52  ;;  %v5598_v52 = vld [vmem:[%s14173_s1 + $0x40] sm:$0xff]  ;;  %v5599_v54 = vld [vmem:[%s14173_s1 + $0x48] sm:$0xff] }
 0x6ac   :  { %9390 = vmatpush3.bf16.msra.mxu1 %v9387_v24  ;;  %v9403_v24 = vpack.c.bf16 %v5665_v43, %v5664_v10  ;;  %v5595_v10 = vld [vmem:[%s14173_s1 + $0x28] sm:$0xff]  ;;  %v5596_v43 = vld [vmem:[%s14173_s1 + $0x30] sm:$0xff] }
 0x6ad   :  { %9392 = vmatprep.subr.bf16.mxu1 %v9391_v0 }
 0x6b0   :  { %9394 = vmatpush3.bf16.msra.mxu1 %v9391_v0  ;;  %v5668_v0 = vld [vmem:[%s14172_s4 + $0x70] sm:$0xff] }
 0x6b1   :  { %9396 = vmatprep.subr.bf16.mxu1 %v9395_v30  ;;  %v9411_v19 = vpack.c.bf16 %v5669_v59, %v5668_v0  ;;  %v5601_v0 = vld [vmem:[%s14173_s1 + $0x58] sm:$0xff]  ;;  %v5602_v59 = vld [vmem:[%s14173_s1 + $0x60] sm:$0xff] }
 0x6b4   :  { %9398 = vmatpush3.bf16.msra.mxu1 %v9395_v30  ;;  %v5591_v30 = vld [vmem:[%s14173_s1 + $0x8] sm:$0xff] }
 0x6b5   :  { %9400 = vmatprep.subr.bf16.mxu1 %v9399_v62 }
 0x6b8   :  { %9402 = vmatpush3.bf16.msra.mxu1 %v9399_v62  ;;  %v5594_v62 = vld [vmem:[%s14173_s1 + $0x20] sm:$0xff] }
 0x6b9   :  { %9404 = vmatprep.subr.bf16.mxu1 %v9403_v24 }
 0x6bc   :  { %9406 = vmatpush3.bf16.msra.mxu1 %v9403_v24  ;;  %v5597_v24 = vld [vmem:[%s14173_s1 + $0x38] sm:$0xff] }
 0x6bd   :  { %9408 = vmatprep.subr.bf16.mxu1 %v9407_v11 }
 0x6c0   :  { %9410 = vmatpush3.bf16.msra.mxu1 %v9407_v11  ;;  %v5600_v11 = vld [vmem:[%s14173_s1 + $0x50] sm:$0xff] }
 0x6c1   :  { %9412 = vmatprep.subr.bf16.mxu1 %v9411_v19 }
 0x6c4   :  { %9414 = vmatpush3.bf16.msra.mxu1 %v9411_v19  ;;  %v5603_v19 = vld [vmem:[%s14173_s1 + $0x68] sm:$0xff] }
 0x6c7   :  { %8712 = vmatmul.mubr.f32.vlgmr.msra.gmra.mrb[132].mxu1 %v5591_v30  ;;  %v5604_v30 = vld [vmem:[%s14173_s1 + $0x70] sm:$0xff] }
 0x6c8   :  { %8714 = vmatprep.mubr.f32.mxu1 %v5592_v6  ;;  %v5605_v6 = vld [vmem:[%s14173_s1 + $0x78] sm:$0xff] }
 0x6cb   :  { %8715 = vmatmul.mubr.f32.gmra.mrb[134].mxu1 %v5593_v45  ;;  %v5606_v45 = vld [vmem:[%s14173_s1 + $0x80] sm:$0xff] }
 0x6cc   :  { %8717 = vmatprep.mubr.f32.mxu1 %v5594_v62  ;;  %v5607_v62 = vld [vmem:[%s14173_s1 + $0x88] sm:$0xff] }
 0x6cf   :  { %8718 = vmatmul.mubr.f32.gmra.mrb[136].mxu1 %v5595_v10  ;;  %v5608_v10 = vld [vmem:[%s14173_s1 + $0x90] sm:$0xff] }
 0x6d0   :  { %8720 = vmatprep.mubr.f32.mxu1 %v5596_v43  ;;  %v5609_v43 = vld [vmem:[%s14173_s1 + $0x98] sm:$0xff] }
 0x6d3   :  { %8721 = vmatmul.mubr.f32.gmra.mrb[138].mxu1 %v5597_v24  ;;  %v5610_v24 = vld [vmem:[%s14173_s1 + $0xa0] sm:$0xff] }
 0x6d4   :  { %8723 = vmatprep.mubr.f32.mxu1 %v5598_v52  ;;  %v5611_v52 = vld [vmem:[%s14173_s1 + $0xa8] sm:$0xff] }
 0x6d7   :  { %8724 = vmatmul.mubr.f32.gmra.mrb[140].mxu1 %v5599_v54  ;;  %v5612_v54 = vld [vmem:[%s14173_s1 + $0xb0] sm:$0xff] }
 0x6d8   :  { %8726 = vmatprep.mubr.f32.mxu1 %v5600_v11  ;;  %v5613_v11 = vld [vmem:[%s14173_s1 + $0xb8] sm:$0xff] }
 0x6db   :  { %8727 = vmatmul.mubr.f32.gmra.mrb[142].mxu1 %v5601_v0  ;;  %v5614_v0 = vld [vmem:[%s14173_s1 + $0xc0] sm:$0xff] }
 0x6dc   :  { %8729 = vmatprep.mubr.f32.mxu1 %v5602_v59  ;;  %v5615_v59 = vld [vmem:[%s14173_s1 + $0xc8] sm:$0xff] }
 0x6df   :  { %8730 = vmatmul.mubr.f32.gmra.mrb[144].mxu1 %v5603_v19  ;;  %v5616_v19 = vld [vmem:[%s14173_s1 + $0xd0] sm:$0xff] }
 0x6e0   :  { %8732 = vmatprep.mubr.f32.mxu1 %v5604_v30  ;;  %v5617_v30 = vld [vmem:[%s14173_s1 + $0xd8] sm:$0xff] }
 0x6e3   :  { %8733 = vmatmul.mubr.f32.gmra.mrb[146].mxu1 %v5605_v6  ;;  %v5618_v6 = vld [vmem:[%s14173_s1 + $0xe0] sm:$0xff] }
 0x6e4   :  { %8735 = vmatprep.mubr.f32.mxu1 %v5606_v45  ;;  %v5619_v45 = vld [vmem:[%s14173_s1 + $0xe8] sm:$0xff] }
 0x6e7   :  { %8736 = vmatmul.mubr.f32.gmra.mrb[148].mxu1 %v5607_v62  ;;  %v5620_v62 = vld [vmem:[%s14173_s1 + $0xf0] sm:$0xff] }
 0x6e8   :  { %8738 = vmatprep.mubr.f32.mxu1 %v5608_v10  ;;  %v5621_v10 = vld [vmem:[%s14173_s1 + $0xf8] sm:$0xff] }
 0x6eb   :  { %8739 = vmatmul.mubr.f32.gmra.mrb[150].mxu1 %v5609_v43  ;;  %v5622_v43 = vld [vmem:[%s14173_s1 + $0x100] sm:$0xff] }
 0x6ec   :  { %8741 = vmatprep.mubr.f32.mxu1 %v5610_v24  ;;  %v5623_v24 = vld [vmem:[%s14173_s1 + $0x108] sm:$0xff] }
 0x6ef   :  { %8742 = vmatmul.mubr.f32.gmra.mrb[152].mxu1 %v5611_v52  ;;  %v5624_v52 = vld [vmem:[%s14173_s1 + $0x110] sm:$0xff] }
 0x6f0   :  { %8744 = vmatprep.mubr.f32.mxu1 %v5612_v54  ;;  %v5625_v54 = vld [vmem:[%s14173_s1 + $0x118] sm:$0xff] }
 0x6f3   :  { %8745 = vmatmul.mubr.f32.gmra.mrb[154].mxu1 %v5613_v11  ;;  %v5626_v11 = vld [vmem:[%s14173_s1 + $0x120] sm:$0xff] }
 0x6f4   :  { %8747 = vmatprep.mubr.f32.mxu1 %v5614_v0  ;;  %v5627_v0 = vld [vmem:[%s14173_s1 + $0x128] sm:$0xff] }
 0x6f7   :  { %8748 = vmatmul.mubr.f32.gmra.mrb[156].mxu1 %v5615_v59  ;;  %v5628_v59 = vld [vmem:[%s14173_s1 + $0x130] sm:$0xff] }
 0x6f8   :  { %8750 = vmatprep.mubr.f32.mxu1 %v5616_v19  ;;  %v5629_v19 = vld [vmem:[%s14173_s1 + $0x138] sm:$0xff] }
 0x6fb   :  { %8751 = vmatmul.mubr.f32.gmra.mrb[158].mxu1 %v5617_v30  ;;  %v5630_v30 = vld [vmem:[%s14173_s1 + $0x140] sm:$0xff] }
 0x6fc   :  { %8753 = vmatprep.mubr.f32.mxu1 %v5618_v6  ;;  %v5631_v6 = vld [vmem:[%s14173_s1 + $0x148] sm:$0xff] }
 0x6ff   :  { %8754 = vmatmul.mubr.f32.gmra.mrb[160].mxu1 %v5619_v45  ;;  %v5632_v45 = vld [vmem:[%s14173_s1 + $0x150] sm:$0xff] }
 0x700   :  { %8756 = vmatprep.mubr.f32.mxu1 %v5620_v62  ;;  %v5633_v62 = vld [vmem:[%s14173_s1 + $0x158] sm:$0xff] }
 0x703   :  { %8757 = vmatmul.mubr.f32.gmra.mrb[162].mxu1 %v5621_v10  ;;  %v5634_v10 = vld [vmem:[%s14173_s1 + $0x160] sm:$0xff] }
 0x704   :  { %8759 = vmatprep.mubr.f32.mxu1 %v5622_v43  ;;  %v5635_v43 = vld [vmem:[%s14173_s1 + $0x168] sm:$0xff] }
 0x707   :  { %8760 = vmatmul.mubr.f32.gmra.mrb[164].mxu1 %v5623_v24  ;;  %v5636_v24 = vld [vmem:[%s14173_s1 + $0x170] sm:$0xff] }
 0x708   :  { %8762 = vmatprep.mubr.f32.mxu1 %v5624_v52  ;;  %v5637_v52 = vld [vmem:[%s14173_s1 + $0x178] sm:$0xff] }
 0x70b   :  { %8763 = vmatmul.mubr.f32.gmra.mrb[166].mxu1 %v5625_v54  ;;  %v5638_v54 = vld [vmem:[%s14173_s1 + $0x180] sm:$0xff] }
 0x70c   :  { %8765 = vmatprep.mubr.f32.mxu1 %v5626_v11  ;;  %v5639_v11 = vld [vmem:[%s14173_s1 + $0x188] sm:$0xff] }
 0x70f   :  { %8766 = vmatmul.mubr.f32.gmra.mrb[168].mxu1 %v5627_v0  ;;  %v5640_v0 = vld [vmem:[%s14173_s1 + $0x190] sm:$0xff] }
 0x710   :  { %8768 = vmatprep.mubr.f32.mxu1 %v5628_v59  ;;  %v5641_v59 = vld [vmem:[%s14173_s1 + $0x198] sm:$0xff] }
 0x713   :  { %8769 = vmatmul.mubr.f32.gmra.mrb[170].mxu1 %v5629_v19  ;;  %v5642_v19 = vld [vmem:[%s14173_s1 + $0x1a0] sm:$0xff] }
 0x714   :  { %8771 = vmatprep.mubr.f32.mxu1 %v5630_v30  ;;  %v5643_v30 = vld [vmem:[%s14173_s1 + $0x1a8] sm:$0xff] }
 0x717   :  { %8772 = vmatmul.mubr.f32.gmra.mrb[172].mxu1 %v5631_v6  ;;  %v5644_v6 = vld [vmem:[%s14173_s1 + $0x1b0] sm:$0xff] }
 0x718   :  { %8774 = vmatprep.mubr.f32.mxu1 %v5632_v45  ;;  %v5645_v45 = vld [vmem:[%s14173_s1 + $0x1b8] sm:$0xff] }
 0x71b   :  { %8775 = vmatmul.mubr.f32.gmra.mrb[174].mxu1 %v5633_v62  ;;  %v5646_v62 = vld [vmem:[%s14173_s1 + $0x1c0] sm:$0xff] }
 0x71c   :  { %8777 = vmatprep.mubr.f32.mxu1 %v5634_v10  ;;  %v5647_v10 = vld [vmem:[%s14173_s1 + $0x1c8] sm:$0xff] }
 0x71f   :  { %8778 = vmatmul.mubr.f32.gmra.mrb[176].mxu1 %v5635_v43  ;;  %v5648_v43 = vld [vmem:[%s14173_s1 + $0x1d0] sm:$0xff] }
 0x720   :  { %8780 = vmatprep.mubr.f32.mxu1 %v5636_v24  ;;  %v5649_v24 = vld [vmem:[%s14173_s1 + $0x1d8] sm:$0xff] }
 0x723   :  { %8781 = vmatmul.mubr.f32.gmra.mrb[178].mxu1 %v5637_v52  ;;  %v5650_v52 = vld [vmem:[%s14173_s1 + $0x1e0] sm:$0xff] }
 0x724   :  { %8783 = vmatprep.mubr.f32.mxu1 %v5638_v54  ;;  %v5651_v54 = vld [vmem:[%s14173_s1 + $0x1e8] sm:$0xff] }
 0x727   :  { %8784 = vmatmul.mubr.f32.gmra.mrb[180].mxu1 %v5639_v11  ;;  %v5652_v11 = vld [vmem:[%s14173_s1 + $0x1f0] sm:$0xff] }
 0x728   :  { %8786 = vmatprep.mubr.f32.mxu1 %v5640_v0  ;;  %v5653_v0 = vld [vmem:[%s14173_s1 + $0x1f8] sm:$0xff] }
 0x72b   :  { %8787 = vmatmul.mubr.f32.gmra.mrb[182].mxu1 %v5641_v59 }
 0x72c   :  { %8789 = vmatprep.mubr.f32.mxu1 %v5642_v19 }
 0x72f   :  { %8790 = vmatmul.mubr.f32.gmra.mrb[184].mxu1 %v5643_v30 }
 0x730   :  { %8792 = vmatprep.mubr.f32.mxu1 %v5644_v6 }
 0x733   :  { %8793 = vmatmul.mubr.f32.gmra.mrb[186].mxu1 %v5645_v45 }
 0x734   :  { %8795 = vmatprep.mubr.f32.mxu1 %v5646_v62 }
 0x737   :  { %8796 = vmatmul.mubr.f32.gmra.mrb[188].mxu1 %v5647_v10 }
 0x738   :  { %8798 = vmatprep.mubr.f32.mxu1 %v5648_v43  ;;  %v5373_v43 = vld [vmem:[%s14174_s7] sm:$0x1] }
 0x73b   :  { %8799 = vmatmul.mubr.f32.gmra.mrb[190].mxu1 %v5649_v24 }
 0x73c   :  { %8801 = vmatprep.mubr.f32.mxu1 %v5650_v52 }
 0x73f   :  { %8802 = vmatmul.mubr.f32.gmra.mrb[192].mxu1 %v5651_v54  ;;  %v5374_v54 = vld [vmem:[%s14175_s8] sm:$0x1] }
 0x740   :  { %8804 = vmatprep.mubr.f32.mxu1 %v5652_v11 }
 0x743   :  { %8805 = vmatmul.mubr.f32.gmra.mrb[194].mxu1 %v5653_v0  ;;  %v14752_v0 = vld [vmem:[#allocation28_spill] sm:$0xff] }
 0x77a   :  { %v5576_v59 = vpop.f32.mrb[130].mxu1 }
 0x77b   :  { %v5581_v19 = vmul.f32 0.001953125, %v5576_v59  ;;  %v5578_v30 = vpop.f32.mrb[131].mxu1  ;;  %v6055_v59 = vld [vmem:[%s14176_s9] sm:$0x1] }
 0x77c   :  { %v5582_v6 = vmul.f32 0.001953125, %v5578_v30 }
 0x77d   :  { %v5583_v45 = vmul.f32 %v5581_v19, %v5581_v19 }
 0x77f   :  { %v5584_v62 = vsub.f32 %v5582_v6, %v5583_v45 }
 0x781   :  { %v5585_v10 = vadd.f32 1e-05, %v5584_v62 }
 0x783   :  { %9951 = vrsqrt.f32 %v5585_v10 }
 0x78d   :  { %v9952_v24 = vpop.eup %9951 }
 0x78e   :  { %v5587_v52 = vmul.f32 %v9952_v24, %v5373_v43 }
 0x790   :  { %v5588_v11 = vmul.f32 %v5587_v52, %v5581_v19  ;;  %v13601_v16 = vrot.slane %v5587_v52, %v14752_v0 }
 0x792   :  { %v5589_v30 = vsub.f32 %v5374_v54, %v5588_v11  ;;  %v6062_v6 = vmul.f32 %v12968_v18, %v13601_v16  ;;  %v6061_v45 = vmul.f32 %v12971_v7, %v13601_v16  ;;  %v6064_v62 = vmul.f32 %v12978_v23, %v13601_v16 }
 0x793   :  { %v6063_v19 = vmul.f32 %v12981_v53, %v13601_v16  ;;  %v6066_v10 = vmul.f32 %v12990_v25, %v13601_v16  ;;  %v6065_v43 = vmul.f32 %v12993_v21, %v13601_v16  ;;  %v6068_v24 = vmul.f32 %v13002_v3, %v13601_v16 }
 0x794   :  { %v6056_v52 = vadd.f32 %v6055_v59, %v5589_v30  ;;  %v6067_v18 = vmul.f32 %v13005_v58, %v13601_v16  ;;  %v6070_v7 = vmul.f32 %v13014_v28, %v13601_v16  ;;  %v6069_v23 = vmul.f32 %v13017_v32, %v13601_v16 }
 0x795   :  { %v6072_v53 = vmul.f32 %v13026_v26, %v13601_v16  ;;  %v6071_v25 = vmul.f32 %v13029_v50, %v13601_v16  ;;  %v6074_v21 = vmul.f32 %v13038_v48, %v13601_v16  ;;  %v6073_v3 = vmul.f32 %v13041_v31, %v13601_v16 }
 0x796   :  { %v13635_v58 = vrot.slane %v6056_v52, %v14752_v0  ;;  %v6076_v28 = vmul.f32 %v13050_v14, %v13601_v16  ;;  %v6075_v32 = vmul.f32 %v13053_v41, %v13601_v16  ;;  %v6078_v26 = vmul.f32 %v13062_v44, %v13601_v16 }
 0x797   :  { %v6077_v50 = vmul.f32 %v13065_v4, %v13601_v16  ;;  %v6080_v48 = vmul.f32 %v13074_v35, %v13601_v16  ;;  %v6079_v31 = vmul.f32 %v13077_v1, %v13601_v16  ;;  %v6082_v54 = vmul.f32 %v13086_v33, %v13601_v16 }
 0x798   :  { %v6132_v14 = vadd.f32 %v13635_v58, %v6062_v6  ;;  %v6131_v11 = vadd.f32 %v13635_v58, %v6061_v45  ;;  %v6134_v41 = vadd.f32 %v13635_v58, %v6064_v62  ;;  %v6133_v44 = vadd.f32 %v13635_v58, %v6063_v19 }
 0x799   :  { %v6136_v0 = vadd.f32 %v13635_v58, %v6066_v10  ;;  %v6135_v4 = vadd.f32 %v13635_v58, %v6065_v43  ;;  %v13658_v35 = vadd.f32 %v13635_v58, %v6068_v24  ;;  %v13661_v1 = vadd.f32 %v13635_v58, %v6067_v18 }
 0x79a   :  { %v8713_v59 = vpop.f32.mrb[132].mxu1  ;;  %v13664_v33 = vadd.f32 %v13635_v58, %v6070_v7  ;;  %v13667_v30 = vadd.f32 %v13635_v58, %v6069_v23  ;;  %v13670_v6 = vadd.f32 %v13635_v58, %v6072_v53  ;;  %v13673_v45 = vadd.f32 %v13635_v58, %v6071_v25 }
 0x79b   :  { %v6196_v62 = vadd.f32 %v8713_v59, %v6132_v14  ;;  %v5736_v19 = vpop.f32.mrb[133].mxu1  ;;  %v13676_v10 = vadd.f32 %v13635_v58, %v6074_v21  ;;  %v13679_v43 = vadd.f32 %v13635_v58, %v6073_v3  ;;  %v13682_v24 = vadd.f32 %v13635_v58, %v6076_v28 }
 0x79c   :  { %v6195_v52 = vadd.f32 %v6131_v11, %v5736_v19  ;;  %v13685_v18 = vadd.f32 %v13635_v58, %v6075_v32  ;;  %v13688_v7 = vadd.f32 %v13635_v58, %v6078_v26  ;;  %v13691_v23 = vadd.f32 %v13635_v58, %v6077_v50 }
 0x79d   :  { %v6260_v53 = vmax.f32 %v6196_v62, 0.0  ;;  %v13694_v25 = vadd.f32 %v13635_v58, %v6080_v48  ;;  %v13697_v21 = vadd.f32 %v13635_v58, %v6079_v31  ;;  %v13700_v3 = vadd.f32 %v13635_v58, %v6082_v54 }
 0x79e   :  { %v6259_v28 = vmax.f32 %v6195_v52, 0.0  ;;  %v8716_v14 = vpop.f32.mrb[134].mxu1  ;;  %v6081_v32 = vmul.f32 %v13089_v38, %v13601_v16  ;;  %v6084_v26 = vmul.f32 %v13098_v34, %v13601_v16  ;;  %v6083_v50 = vmul.f32 %v13101_v27, %v13601_v16 }
 0x79f   :  { %6324 = vst [vmem:[%s14177_s10 + $0x8] sm:$0xff] %v6260_v53  ;;  %v6198_v48 = vadd.f32 %v8716_v14, %v6134_v41  ;;  %v5746_v31 = vpop.f32.mrb[135].mxu1  ;;  %v6086_v54 = vmul.f32 %v13110_v17, %v13601_v16  ;;  %v6085_v11 = vmul.f32 %v13113_v5, %v13601_v16  ;;  %v6088_v38 = vmul.f32 %v13122_v36, %v13601_v16 }
 0x7a0   :  { %6323 = vst [vmem:[%s14177_s10] sm:$0xff] %v6259_v28  ;;  %v6197_v34 = vadd.f32 %v6133_v44, %v5746_v31  ;;  %v13721_v27 = vadd.f32 %v13635_v58, %v6081_v32  ;;  %v13724_v41 = vadd.f32 %v13635_v58, %v6084_v26  ;;  %v13727_v59 = vadd.f32 %v13635_v58, %v6083_v50 }
 0x7a1   :  { %v6262_v17 = vmax.f32 %v6198_v48, 0.0  ;;  %v13730_v5 = vadd.f32 %v13635_v58, %v6086_v54  ;;  %v13733_v36 = vadd.f32 %v13635_v58, %v6085_v11  ;;  %v13736_v62 = vadd.f32 %v13635_v58, %v6088_v38 }
 0x7a2   :  { %v6261_v44 = vmax.f32 %v6197_v34, 0.0  ;;  %v8719_v19 = vpop.f32.mrb[136].mxu1  ;;  %v6087_v52 = vmul.f32 %v13125_v9, %v13601_v16  ;;  %v6090_v53 = vmul.f32 %v13134_v22, %v13601_v16  ;;  %v6089_v28 = vmul.f32 %v13137_v29, %v13601_v16 }
 0x7a3   :  { %6326 = vst [vmem:[%s14177_s10 + $0x18] sm:$0xff] %v6262_v17  ;;  %v6200_v14 = vadd.f32 %v8719_v19, %v6136_v0  ;;  %v5756_v32 = vpop.f32.mrb[137].mxu1  ;;  %v6092_v26 = vmul.f32 %v13146_v42, %v13601_v16  ;;  %v6091_v50 = vmul.f32 %v13149_v55, %v13601_v16  ;;  %v6094_v9 = vmul.f32 %v13158_v39, %v13601_v16 }
 0x7a4   :  { %6325 = vst [vmem:[%s14177_s10 + $0x10] sm:$0xff] %v6261_v44  ;;  %v6199_v22 = vadd.f32 %v6135_v4, %v5756_v32  ;;  %v13757_v29 = vadd.f32 %v13635_v58, %v6087_v52  ;;  %v13760_v0 = vadd.f32 %v13635_v58, %v6090_v53  ;;  %v13763_v48 = vadd.f32 %v13635_v58, %v6089_v28 }
 0x7a5   :  { %v6264_v42 = vmax.f32 %v6200_v14, 0.0  ;;  %v13766_v55 = vadd.f32 %v13635_v58, %v6092_v26  ;;  %v13769_v39 = vadd.f32 %v13635_v58, %v6091_v50  ;;  %v13772_v31 = vadd.f32 %v13635_v58, %v6094_v9 }
 0x7a6   :  { %v6263_v4 = vmax.f32 %v6199_v22, 0.0  ;;  %v8722_v54 = vpop.f32.mrb[138].mxu1  ;;  %v6093_v11 = vmul.f32 %v13161_v57, %v13601_v16  ;;  %v6096_v38 = vmul.f32 %v13170_v2, %v13601_v16  ;;  %v6095_v34 = vmul.f32 %v13173_v13, %v13601_v16 }
 0x7a7   :  { %6328 = vst [vmem:[%s14177_s10 + $0x28] sm:$0xff] %v6264_v42  ;;  %v6202_v17 = vadd.f32 %v8722_v54, %v13658_v35  ;;  %v5766_v44 = vpop.f32.mrb[139].mxu1  ;;  %v6098_v19 = vmul.f32 %v13183_v8, %v13601_v16  ;;  %v6097_v52 = vmul.f32 %v13187_v56, %v13601_v16  ;;  %v6100_v57 = vmul.f32 %v13196_v51, %v13601_v16 }
 0x7a8   :  { %6327 = vst [vmem:[%s14177_s10 + $0x20] sm:$0xff] %v6263_v4  ;;  %v6201_v2 = vadd.f32 %v13661_v1, %v5766_v44  ;;  %v13795_v13 = vadd.f32 %v13635_v58, %v6093_v11  ;;  %v13798_v35 = vadd.f32 %v13635_v58, %v6096_v38  ;;  %v13801_v8 = vadd.f32 %v13635_v58, %v6095_v34  ;;  %v14754_v44 = vld [vmem:[#allocation20_spill] sm:$0xff] }
 0x7a9   :  { %v6266_v53 = vmax.f32 %v6202_v17, 0.0  ;;  %v13804_v56 = vadd.f32 %v13635_v58, %v6098_v19  ;;  %v13807_v51 = vadd.f32 %v13635_v58, %v6097_v52  ;;  %v13810_v28 = vadd.f32 %v13635_v58, %v6100_v57  ;;  %v14755_v52 = vld [vmem:[#allocation7_spill] sm:$0xff] }
 0x7aa   :  { %v6265_v1 = vmax.f32 %v6201_v2, 0.0  ;;  %v8725_v14 = vpop.f32.mrb[140].mxu1  ;;  %v6099_v32 = vmul.f32 %v13199_v61, %v13601_v16  ;;  %v6102_v26 = vmul.f32 %v13208_v12, %v13601_v16  ;;  %v6101_v50 = vmul.f32 %v13211_v37, %v13601_v16  ;;  %v14753_v61 = vld [vmem:[#allocation62_spill] sm:$0xff]  ;;  %v14756_v2 = vld [vmem:[#allocation21_spill] sm:$0xff] }
 0x7ab   :  { %6330 = vst [vmem:[%s14177_s10 + $0x38] sm:$0xff] %v6266_v53  ;;  %v6204_v9 = vadd.f32 %v8725_v14, %v13664_v33  ;;  %v5776_v22 = vpop.f32.mrb[141].mxu1  ;;  %v6104_v42 = vmul.f32 %v13220_v47, %v13601_v16  ;;  %v6103_v4 = vmul.f32 %v13223_v20, %v13601_v16  ;;  %v6106_v54 = vmul.f32 %v14753_v61, %v13601_v16 }
 0x7ac   :  { %6329 = vst [vmem:[%s14177_s10 + $0x30] sm:$0xff] %v6265_v1  ;;  %v6203_v12 = vadd.f32 %v13667_v30, %v5776_v22  ;;  %v13833_v37 = vadd.f32 %v13635_v58, %v6099_v32  ;;  %v13836_v33 = vadd.f32 %v13635_v58, %v6102_v26  ;;  %v13839_v47 = vadd.f32 %v13635_v58, %v6101_v50  ;;  %v14757_v32 = vld [vmem:[#allocation23_spill] sm:$0xff]  ;;  %v14758_v50 = vld [vmem:[#allocation30_spill] sm:$0xff]  ;;  %v14759_v22 = vld [vmem:[#allocation24_spill] sm:$0xff] }
 0x7ad   :  { %v6268_v11 = vmax.f32 %v6204_v9, 0.0  ;;  %v13842_v20 = vadd.f32 %v13635_v58, %v6104_v42  ;;  %v13845_v38 = vadd.f32 %v13635_v58, %v6103_v4  ;;  %v13848_v34 = vadd.f32 %v13635_v58, %v6106_v54 }
 0x7ae   :  { %v6267_v30 = vmax.f32 %v6203_v12, 0.0  ;;  %v8728_v17 = vpop.f32.mrb[142].mxu1  ;;  %v6105_v19 = vmul.f32 %v14754_v44, %v13601_v16  ;;  %v6108_v57 = vmul.f32 %v14755_v52, %v13601_v16  ;;  %v6107_v53 = vmul.f32 %v14756_v2, %v13601_v16  ;;  %v14761_v2 = vld [vmem:[#allocation35_spill] sm:$0xff] }
 0x7af   :  { %6332 = vst [vmem:[%s14177_s10 + $0x48] sm:$0xff] %v6268_v11  ;;  %v6206_v1 = vadd.f32 %v8728_v17, %v13670_v6  ;;  %v5786_v14 = vpop.f32.mrb[143].mxu1  ;;  %v6110_v26 = vmul.f32 %v14757_v32, %v13601_v16  ;;  %v6109_v9 = vmul.f32 %v14758_v50, %v13601_v16  ;;  %v6112_v42 = vmul.f32 %v14759_v22, %v13601_v16  ;;  %v14762_v32 = vld [vmem:[#allocation29_spill] sm:$0xff]  ;;  %v14764_v22 = vld [vmem:[#allocation36_spill] sm:$0xff] }
 0x7b0   :  { %6331 = vst [vmem:[%s14177_s10 + $0x40] sm:$0xff] %v6267_v30  ;;  %v6205_v4 = vadd.f32 %v13673_v45, %v5786_v14  ;;  %v13871_v61 = vadd.f32 %v13635_v58, %v6105_v19  ;;  %v13874_v6 = vadd.f32 %v13635_v58, %v6108_v57  ;;  %v13877_v54 = vadd.f32 %v13635_v58, %v6107_v53  ;;  %v14760_v19 = vld [vmem:[#allocation34_spill] sm:$0xff]  ;;  %v14763_v50 = vld [vmem:[#allocation25_spill] sm:$0xff] }
 0x7b1   :  { %v6270_v12 = vmax.f32 %v6206_v1, 0.0  ;;  %v13880_v11 = vadd.f32 %v13635_v58, %v6110_v26  ;;  %v13883_v17 = vadd.f32 %v13635_v58, %v6109_v9  ;;  %v13886_v30 = vadd.f32 %v13635_v58, %v6112_v42 }
 0x7b2   :  { %v6269_v45 = vmax.f32 %v6205_v4, 0.0  ;;  %v8731_v44 = vpop.f32.mrb[144].mxu1  ;;  %v6111_v52 = vmul.f32 %v14760_v19, %v13601_v16  ;;  %v6114_v57 = vmul.f32 %v13280_v46, %v13601_v16  ;;  %v6113_v53 = vmul.f32 %v14761_v2, %v13601_v16 }
 0x7b3   :  { %6334 = vst [vmem:[%s14177_s10 + $0x58] sm:$0xff] %v6270_v12  ;;  %v6208_v1 = vadd.f32 %v8731_v44, %v13676_v10  ;;  %v5796_v14 = vpop.f32.mrb[145].mxu1  ;;  %v6116_v26 = vmul.f32 %v14762_v32, %v13601_v16  ;;  %v6115_v9 = vmul.f32 %v14763_v50, %v13601_v16  ;;  %v6118_v42 = vmul.f32 %v14764_v22, %v13601_v16 }
 0x7b4   :  { %6333 = vst [vmem:[%s14177_s10 + $0x50] sm:$0xff] %v6269_v45  ;;  %v6207_v46 = vadd.f32 %v13679_v43, %v5796_v14  ;;  %v13909_v4 = vadd.f32 %v13635_v58, %v6111_v52  ;;  %v13912_v10 = vadd.f32 %v13635_v58, %v6114_v57  ;;  %v13915_v12 = vadd.f32 %v13635_v58, %v6113_v53  ;;  %v14765_v52 = vld [vmem:[#allocation37_spill] sm:$0xff] }
 0x7b5   :  { %v6272_v44 = vmax.f32 %v6208_v1, 0.0  ;;  %v13918_v19 = vadd.f32 %v13635_v58, %v6116_v26  ;;  %v13921_v2 = vadd.f32 %v13635_v58, %v6115_v9  ;;  %v13924_v45 = vadd.f32 %v13635_v58, %v6118_v42 }
 0x7b6   :  { %v6271_v43 = vmax.f32 %v6207_v46, 0.0  ;;  %v8734_v14 = vpop.f32.mrb[146].mxu1  ;;  %v6117_v32 = vmul.f32 %v14765_v52, %v13601_v16  ;;  %v6120_v57 = vmul.f32 %v13316_v63, %v13601_v16  ;;  %v6119_v53 = vmul.f32 %v13319_v40, %v13601_v16 }
 0x7b7   :  { %6336 = vst [vmem:[%s14177_s10 + $0x68] sm:$0xff] %v6272_v44  ;;  %v6210_v1 = vadd.f32 %v8734_v14, %v13682_v24  ;;  %v5806_v26 = vpop.f32.mrb[147].mxu1  ;;  %v6122_v50 = vmul.f32 %v13328_v15, %v13601_v16  ;;  %v6121_v9 = vmul.f32 %v13331_v60, %v13601_v16  ;;  %v6124_v22 = vmul.f32 %v13340_v49, %v13601_v16 }
 0x7b8   :  { %6335 = vst [vmem:[%s14177_s10 + $0x60] sm:$0xff] %v6271_v43  ;;  %v6209_v63 = vadd.f32 %v13685_v18, %v5806_v26  ;;  %v13947_v40 = vadd.f32 %v13635_v58, %v6117_v32  ;;  %v13950_v24 = vadd.f32 %v13635_v58, %v6120_v57  ;;  %v13953_v15 = vadd.f32 %v13635_v58, %v6119_v53  ;;  %v14766_v43 = vld [vmem:[#allocation26_spill] sm:$0xff] }
 0x7b9   :  { %v6274_v42 = vmax.f32 %v6210_v1, 0.0  ;;  %v13956_v60 = vadd.f32 %v13635_v58, %v6122_v50  ;;  %v13959_v49 = vadd.f32 %v13635_v58, %v6121_v9  ;;  %v13962_v46 = vadd.f32 %v13635_v58, %v6124_v22 }
 0x7ba   :  { %v6273_v18 = vmax.f32 %v6209_v63, 0.0  ;;  %v8737_v44 = vpop.f32.mrb[148].mxu1  ;;  %v6123_v14 = vmul.f32 %v14766_v43, %v13601_v16 }
 0x7bb   :  { %6338 = vst [vmem:[%s14177_s10 + $0x78] sm:$0xff] %v6274_v42  ;;  %v6212_v52 = vadd.f32 %v8737_v44, %v13688_v7  ;;  %v5816_v32 = vpop.f32.mrb[149].mxu1 }
 0x7bc   :  { %6337 = vst [vmem:[%s14177_s10 + $0x70] sm:$0xff] %v6273_v18  ;;  %v6211_v57 = vadd.f32 %v13691_v23, %v5816_v32  ;;  %v13975_v53 = vadd.f32 %v13635_v58, %v6123_v14 }
 0x7bd   :  { %v6276_v1 = vmax.f32 %v6212_v52, 0.0 }
 0x7be   :  { %v6275_v26 = vmax.f32 %v6211_v57, 0.0  ;;  %v8740_v50 = vpop.f32.mrb[150].mxu1 }
 0x7bf   :  { %6340 = vst [vmem:[%s14177_s10 + $0x88] sm:$0xff] %v6276_v1  ;;  %v6214_v16 = vadd.f32 %v8740_v50, %v13694_v25  ;;  %v5826_v7 = vpop.f32.mrb[151].mxu1 }
 0x7c0   :  { %6339 = vst [vmem:[%s14177_s10 + $0x80] sm:$0xff] %v6275_v26  ;;  %v6213_v9 = vadd.f32 %v13697_v21, %v5826_v7 }
 0x7c1   :  { %v6278_v23 = vmax.f32 %v6214_v16, 0.0 }
 0x7c2   :  { %v6277_v22 = vmax.f32 %v6213_v9, 0.0  ;;  %v8743_v58 = vpop.f32.mrb[152].mxu1 }
 0x7c3   :  { %6342 = vst [vmem:[%s14177_s10 + $0x98] sm:$0xff] %v6278_v23  ;;  %v6216_v63 = vadd.f32 %v8743_v58, %v13700_v3  ;;  %v5836_v42 = vpop.f32.mrb[153].mxu1 }
 0x7c4   :  { %6341 = vst [vmem:[%s14177_s10 + $0x90] sm:$0xff] %v6277_v22  ;;  %v6215_v25 = vadd.f32 %v13721_v27, %v5836_v42 }
 0x7c5   :  { %v6280_v18 = vmax.f32 %v6216_v63, 0.0 }
 0x7c6   :  { %v6279_v44 = vmax.f32 %v6215_v25, 0.0  ;;  %v8746_v43 = vpop.f32.mrb[154].mxu1 }
 0x7c7   :  { %6344 = vst [vmem:[%s14177_s10 + $0xa8] sm:$0xff] %v6280_v18  ;;  %v6218_v21 = vadd.f32 %v8746_v43, %v13724_v41  ;;  %v5846_v14 = vpop.f32.mrb[155].mxu1 }
 0x7c8   :  { %6343 = vst [vmem:[%s14177_s10 + $0xa0] sm:$0xff] %v6279_v44  ;;  %v6217_v3 = vadd.f32 %v13727_v59, %v5846_v14 }
 0x7c9   :  { %v6282_v52 = vmax.f32 %v6218_v21, 0.0 }
 0x7ca   :  { %v6281_v32 = vmax.f32 %v6217_v3, 0.0  ;;  %v8749_v57 = vpop.f32.mrb[156].mxu1 }
 0x7cb   :  { %6346 = vst [vmem:[%s14177_s10 + $0xb8] sm:$0xff] %v6282_v52  ;;  %v6220_v27 = vadd.f32 %v8749_v57, %v13730_v5  ;;  %v5856_v1 = vpop.f32.mrb[157].mxu1 }
 0x7cc   :  { %6345 = vst [vmem:[%s14177_s10 + $0xb0] sm:$0xff] %v6281_v32  ;;  %v6219_v41 = vadd.f32 %v13733_v36, %v5856_v1 }
 0x7cd   :  { %v6284_v26 = vmax.f32 %v6220_v27, 0.0 }
 0x7ce   :  { %v6283_v50 = vmax.f32 %v6219_v41, 0.0  ;;  %v8752_v16 = vpop.f32.mrb[158].mxu1 }
 0x7cf   :  { %6348 = vst [vmem:[%s14177_s10 + $0xc8] sm:$0xff] %v6284_v26  ;;  %v6222_v59 = vadd.f32 %v8752_v16, %v13736_v62  ;;  %v5866_v7 = vpop.f32.mrb[159].mxu1 }
 0x7d0   :  { %6347 = vst [vmem:[%s14177_s10 + $0xc0] sm:$0xff] %v6283_v50  ;;  %v6221_v5 = vadd.f32 %v13757_v29, %v5866_v7 }
 0x7d1   :  { %v6286_v9 = vmax.f32 %v6222_v59, 0.0 }
 0x7d2   :  { %v6285_v23 = vmax.f32 %v6221_v5, 0.0  ;;  %v8755_v22 = vpop.f32.mrb[160].mxu1 }
 0x7d3   :  { %6350 = vst [vmem:[%s14177_s10 + $0xd8] sm:$0xff] %v6286_v9  ;;  %v6224_v36 = vadd.f32 %v8755_v22, %v13760_v0  ;;  %v5876_v58 = vpop.f32.mrb[161].mxu1 }
 0x7d4   :  { %6349 = vst [vmem:[%s14177_s10 + $0xd0] sm:$0xff] %v6285_v23  ;;  %v6223_v62 = vadd.f32 %v13763_v48, %v5876_v58 }
 0x7d5   :  { %v6288_v63 = vmax.f32 %v6224_v36, 0.0 }
 0x7d6   :  { %v6287_v42 = vmax.f32 %v6223_v62, 0.0  ;;  %v8758_v25 = vpop.f32.mrb[162].mxu1 }
 0x7d7   :  { %6352 = vst [vmem:[%s14177_s10 + $0xe8] sm:$0xff] %v6288_v63  ;;  %v6226_v29 = vadd.f32 %v8758_v25, %v13766_v55  ;;  %v5886_v18 = vpop.f32.mrb[163].mxu1 }
 0x7d8   :  { %6351 = vst [vmem:[%s14177_s10 + $0xe0] sm:$0xff] %v6287_v42  ;;  %v6225_v0 = vadd.f32 %v13769_v39, %v5886_v18 }
 0x7d9   :  { %v6290_v44 = vmax.f32 %v6226_v29, 0.0 }
 0x7da   :  { %v6289_v43 = vmax.f32 %v6225_v0, 0.0  ;;  %v8761_v21 = vpop.f32.mrb[164].mxu1 }
 0x7db   :  { %6354 = vst [vmem:[%s14177_s10 + $0xf8] sm:$0xff] %v6290_v44  ;;  %v6228_v48 = vadd.f32 %v8761_v21, %v13772_v31  ;;  %v5896_v14 = vpop.f32.mrb[165].mxu1 }
 0x7dc   :  { %6353 = vst [vmem:[%s14177_s10 + $0xf0] sm:$0xff] %v6289_v43  ;;  %v6227_v55 = vadd.f32 %v13795_v13, %v5896_v14 }
 0x7dd   :  { %v6292_v3 = vmax.f32 %v6228_v48, 0.0 }
 0x7de   :  { %v6291_v52 = vmax.f32 %v6227_v55, 0.0  ;;  %v8764_v32 = vpop.f32.mrb[166].mxu1 }
 0x7df   :  { %6356 = vst [vmem:[%s14177_s10 + $0x108] sm:$0xff] %v6292_v3  ;;  %v6230_v39 = vadd.f32 %v8764_v32, %v13798_v35  ;;  %v5906_v57 = vpop.f32.mrb[167].mxu1 }
 0x7e0   :  { %6355 = vst [vmem:[%s14177_s10 + $0x100] sm:$0xff] %v6291_v52  ;;  %v6229_v31 = vadd.f32 %v13801_v8, %v5906_v57 }
 0x7e1   :  { %v6294_v27 = vmax.f32 %v6230_v39, 0.0 }
 0x7e2   :  { %v6293_v1 = vmax.f32 %v6229_v31, 0.0  ;;  %v8767_v41 = vpop.f32.mrb[168].mxu1 }
 0x7e3   :  { %6358 = vst [vmem:[%s14177_s10 + $0x118] sm:$0xff] %v6294_v27  ;;  %v6232_v13 = vadd.f32 %v8767_v41, %v13804_v56  ;;  %v5916_v26 = vpop.f32.mrb[169].mxu1 }
 0x7e4   :  { %6357 = vst [vmem:[%s14177_s10 + $0x110] sm:$0xff] %v6293_v1  ;;  %v6231_v35 = vadd.f32 %v13807_v51, %v5916_v26 }
 0x7e5   :  { %v6296_v50 = vmax.f32 %v6232_v13, 0.0 }
 0x7e6   :  { %v6295_v16 = vmax.f32 %v6231_v35, 0.0  ;;  %v8770_v59 = vpop.f32.mrb[170].mxu1 }
 0x7e7   :  { %6360 = vst [vmem:[%s14177_s10 + $0x128] sm:$0xff] %v6296_v50  ;;  %v6234_v8 = vadd.f32 %v8770_v59, %v13810_v28  ;;  %v5926_v7 = vpop.f32.mrb[171].mxu1 }
 0x7e8   :  { %6359 = vst [vmem:[%s14177_s10 + $0x120] sm:$0xff] %v6295_v16  ;;  %v6233_v56 = vadd.f32 %v13833_v37, %v5926_v7 }
 0x7e9   :  { %v6298_v5 = vmax.f32 %v6234_v8, 0.0 }
 0x7ea   :  { %v6297_v9 = vmax.f32 %v6233_v56, 0.0  ;;  %v8773_v23 = vpop.f32.mrb[172].mxu1 }
 0x7eb   :  { %6362 = vst [vmem:[%s14177_s10 + $0x138] sm:$0xff] %v6298_v5  ;;  %v6236_v51 = vadd.f32 %v8773_v23, %v13836_v33  ;;  %v5936_v22 = vpop.f32.mrb[173].mxu1 }
 0x7ec   :  { %6361 = vst [vmem:[%s14177_s10 + $0x130] sm:$0xff] %v6297_v9  ;;  %v6235_v28 = vadd.f32 %v13839_v47, %v5936_v22 }
 0x7ed   :  { %v6300_v36 = vmax.f32 %v6236_v51, 0.0 }
 0x7ee   :  { %v6299_v58 = vmax.f32 %v6235_v28, 0.0  ;;  %v8776_v62 = vpop.f32.mrb[174].mxu1 }
 0x7ef   :  { %6364 = vst [vmem:[%s14177_s10 + $0x148] sm:$0xff] %v6300_v36  ;;  %v6238_v37 = vadd.f32 %v8776_v62, %v13842_v20  ;;  %v5946_v63 = vpop.f32.mrb[175].mxu1 }
 0x7f0   :  { %6363 = vst [vmem:[%s14177_s10 + $0x140] sm:$0xff] %v6299_v58  ;;  %v6237_v33 = vadd.f32 %v13845_v38, %v5946_v63 }
 0x7f1   :  { %v6302_v42 = vmax.f32 %v6238_v37, 0.0 }
 0x7f2   :  { %v6301_v25 = vmax.f32 %v6237_v33, 0.0  ;;  %v8779_v29 = vpop.f32.mrb[176].mxu1 }
 0x7f3   :  { %6366 = vst [vmem:[%s14177_s10 + $0x158] sm:$0xff] %v6302_v42  ;;  %v6240_v47 = vadd.f32 %v8779_v29, %v13848_v34  ;;  %v5956_v18 = vpop.f32.mrb[177].mxu1 }
 0x7f4   :  { %6365 = vst [vmem:[%s14177_s10 + $0x150] sm:$0xff] %v6301_v25  ;;  %v6239_v20 = vadd.f32 %v13871_v61, %v5956_v18 }
 0x7f5   :  { %v6304_v0 = vmax.f32 %v6240_v47, 0.0 }
 0x7f6   :  { %v6303_v44 = vmax.f32 %v6239_v20, 0.0  ;;  %v8782_v43 = vpop.f32.mrb[178].mxu1 }
 0x7f7   :  { %6368 = vst [vmem:[%s14177_s10 + $0x168] sm:$0xff] %v6304_v0  ;;  %v6242_v38 = vadd.f32 %v8782_v43, %v13874_v6  ;;  %v5966_v21 = vpop.f32.mrb[179].mxu1 }
 0x7f8   :  { %6367 = vst [vmem:[%s14177_s10 + $0x160] sm:$0xff] %v6303_v44  ;;  %v6241_v34 = vadd.f32 %v13877_v54, %v5966_v21 }
 0x7f9   :  { %v6306_v48 = vmax.f32 %v6242_v38, 0.0 }
 0x7fa   :  { %v6305_v14 = vmax.f32 %v6241_v34, 0.0  ;;  %v8785_v55 = vpop.f32.mrb[180].mxu1 }
 0x7fb   :  { %6370 = vst [vmem:[%s14177_s10 + $0x178] sm:$0xff] %v6306_v48  ;;  %v6244_v61 = vadd.f32 %v8785_v55, %v13880_v11  ;;  %v5976_v3 = vpop.f32.mrb[181].mxu1 }
 0x7fc   :  { %6369 = vst [vmem:[%s14177_s10 + $0x170] sm:$0xff] %v6305_v14  ;;  %v6243_v6 = vadd.f32 %v13883_v17, %v5976_v3 }
 0x7fd   :  { %v6308_v52 = vmax.f32 %v6244_v61, 0.0 }
 0x7fe   :  { %v6307_v32 = vmax.f32 %v6243_v6, 0.0  ;;  %v8788_v39 = vpop.f32.mrb[182].mxu1 }
 0x7ff   :  { %6372 = vst [vmem:[%s14177_s10 + $0x188] sm:$0xff] %v6308_v52  ;;  %v6246_v54 = vadd.f32 %v8788_v39, %v13886_v30  ;;  %v5986_v57 = vpop.f32.mrb[183].mxu1 }
 0x800   :  { %6371 = vst [vmem:[%s14177_s10 + $0x180] sm:$0xff] %v6307_v32  ;;  %v6245_v11 = vadd.f32 %v13909_v4, %v5986_v57 }
 0x801   :  { %v6310_v31 = vmax.f32 %v6246_v54, 0.0 }
 0x802   :  { %v6309_v27 = vmax.f32 %v6245_v11, 0.0  ;;  %v8791_v1 = vpop.f32.mrb[184].mxu1 }
 0x803   :  { %6374 = vst [vmem:[%s14177_s10 + $0x198] sm:$0xff] %v6310_v31  ;;  %v6248_v17 = vadd.f32 %v8791_v1, %v13912_v10  ;;  %v5996_v41 = vpop.f32.mrb[185].mxu1 }
 0x804   :  { %6373 = vst [vmem:[%s14177_s10 + $0x190] sm:$0xff] %v6309_v27  ;;  %v6247_v30 = vadd.f32 %v13915_v12, %v5996_v41 }
 0x805   :  { %v6312_v13 = vmax.f32 %v6248_v17, 0.0 }
 0x806   :  { %v6311_v26 = vmax.f32 %v6247_v30, 0.0  ;;  %v8794_v35 = vpop.f32.mrb[186].mxu1 }
 0x807   :  { %6376 = vst [vmem:[%s14177_s10 + $0x1a8] sm:$0xff] %v6312_v13  ;;  %v6250_v4 = vadd.f32 %v8794_v35, %v13918_v19  ;;  %v6006_v50 = vpop.f32.mrb[187].mxu1 }
 0x808   :  { %6375 = vst [vmem:[%s14177_s10 + $0x1a0] sm:$0xff] %v6311_v26  ;;  %v6249_v10 = vadd.f32 %v13921_v2, %v6006_v50 }
 0x809   :  { %v6314_v16 = vmax.f32 %v6250_v4, 0.0 }
 0x80a   :  { %v6313_v59 = vmax.f32 %v6249_v10, 0.0  ;;  %v8797_v8 = vpop.f32.mrb[188].mxu1 }
 0x80b   :  { %6378 = vst [vmem:[%s14177_s10 + $0x1b8] sm:$0xff] %v6314_v16  ;;  %v6252_v12 = vadd.f32 %v8797_v8, %v13924_v45  ;;  %v6016_v7 = vpop.f32.mrb[189].mxu1 }
 0x80c   :  { %6377 = vst [vmem:[%s14177_s10 + $0x1b0] sm:$0xff] %v6313_v59  ;;  %v6251_v19 = vadd.f32 %v13947_v40, %v6016_v7 }
 0x80d   :  { %v6316_v56 = vmax.f32 %v6252_v12, 0.0 }
 0x80e   :  { %v6315_v5 = vmax.f32 %v6251_v19, 0.0  ;;  %v8800_v9 = vpop.f32.mrb[190].mxu1 }
 0x80f   :  { %6380 = vst [vmem:[%s14177_s10 + $0x1c8] sm:$0xff] %v6316_v56  ;;  %v6254_v2 = vadd.f32 %v8800_v9, %v13950_v24  ;;  %v6026_v23 = vpop.f32.mrb[191].mxu1 }
 0x810   :  { %6379 = vst [vmem:[%s14177_s10 + $0x1c0] sm:$0xff] %v6315_v5  ;;  %v6253_v45 = vadd.f32 %v13953_v15, %v6026_v23 }
 0x811   :  { %v6318_v51 = vmax.f32 %v6254_v2, 0.0 }
 0x812   :  { %v6317_v22 = vmax.f32 %v6253_v45, 0.0  ;;  %v8803_v28 = vpop.f32.mrb[192].mxu1 }
 0x813   :  { %6382 = vst [vmem:[%s14177_s10 + $0x1d8] sm:$0xff] %v6318_v51  ;;  %v6256_v40 = vadd.f32 %v8803_v28, %v13956_v60  ;;  %v6036_v36 = vpop.f32.mrb[193].mxu1 }
 0x814   :  { %6381 = vst [vmem:[%s14177_s10 + $0x1d0] sm:$0xff] %v6317_v22  ;;  %v6255_v24 = vadd.f32 %v13959_v49, %v6036_v36 }
 0x815   :  { %v6320_v58 = vmax.f32 %v6256_v40, 0.0 }
 0x816   :  { %v6319_v62 = vmax.f32 %v6255_v24, 0.0  ;;  %v8806_v37 = vpop.f32.mrb[194].mxu1 }
 0x817   :  { %6384 = vst [vmem:[%s14177_s10 + $0x1e8] sm:$0xff] %v6320_v58  ;;  %v6258_v15 = vadd.f32 %v8806_v37, %v13962_v46  ;;  %v6046_v63 = vpop.f32.mrb[195].mxu1 }
 0x818   :  { %6383 = vst [vmem:[%s14177_s10 + $0x1e0] sm:$0xff] %v6319_v62  ;;  %v6257_v60 = vadd.f32 %v13975_v53, %v6046_v63 }
 0x819   :  { %v6322_v33 = vmax.f32 %v6258_v15, 0.0 }
 0x81a   :  { %v6321_v42 = vmax.f32 %v6257_v60, 0.0 }
 0x81b   :  { %6386 = vst [vmem:[%s14177_s10 + $0x1f8] sm:$0xff] %v6322_v33 }
 0x81c   :  { %6385 = vst [vmem:[%s14177_s10 + $0x1f0] sm:$0xff] %v6321_v42 }

</bundles_post_ra>
